<compile_context>
chip_gen: v5e
topology: v5e:2x2
jax: 0.10.0
libtpu: 0.0.40
codegen_flags: <defaults>
</compile_context>

<pallas_src>
import jax
import jax.numpy as jnp
from jax import lax
from jax.experimental import pallas as pl
from jax.experimental.pallas import tpu as pltpu

EPS = 1e-5


# ----------------------------- Pallas kernels -----------------------------------------
def _matmul_stats_kernel(w_ref, x_ref, y_ref, stats_ref):
    """Pass 1: one MXU matmul per M-tile (channel-major) + per-channel BN partials.

    w_ref    : (Cout, Kc)   transposed conv weights (same block every grid step)
    x_ref    : (Kc, TM)     transposed im2col tile (Kc = K^3*Cin folded contraction)
    y_ref    : (Cout, TM)   raw conv output tile (pre-BN), lane-dense stores
    stats_ref: (1, Cout, 2) per-tile partial [sum, sum-of-squares] over the TM cols
    """
    y = jnp.dot(w_ref[...], x_ref[...], preferred_element_type=jnp.float32)
    y_ref[...] = y
    s = jnp.sum(y, axis=1, keepdims=True)          # (Cout, 1)
    ss = jnp.sum(y * y, axis=1, keepdims=True)     # (Cout, 1)
    stats_ref[0] = jnp.concatenate([s, ss], axis=1)


def _bn_relu_kernel(y_ref, scale_ref, shift_ref, o_ref):
    """Pass 2: y * scale + shift, ReLU  (scale/shift fold BN mean/var/gamma/beta)."""
    o_ref[...] = jnp.maximum(
        y_ref[...] * scale_ref[...] + shift_ref[...], 0.0).astype(o_ref.dtype)


# ----------------------------- host-side glue ------------------------------------------
def _pick_tile_m(M, max_tm=512):
    """Largest divisor of M that is a multiple of 128 and <= max_tm (fallback: M)."""
    for tm in range(min(max_tm, M), 127, -1):
        if M % tm == 0 and tm % 128 == 0:
            return tm
    return M


def _conv_bn_relu_t(wt, xt, gamma, beta, *, eps=EPS, max_tm=512):
    """Fused Conv(as matmul) + BatchNorm(batch stats) + ReLU, channel-major layout.

    wt: (Cout, Kc); xt: (Kc, M) transposed im2col; gamma/beta: (Cout,).
    Returns (Cout, M) f32.
    """
    Cout, Kc = wt.shape
    M = xt.shape[1]
    TM = _pick_tile_m(M, max_tm)
    G = M // TM

    y, partial = pl.pallas_call(
        _matmul_stats_kernel,
        out_shape=(jax.ShapeDtypeStruct((Cout, M), jnp.float32),
                   jax.ShapeDtypeStruct((G, Cout, 2), jnp.float32)),
        grid=(G,),
        in_specs=[pl.BlockSpec((Cout, Kc), lambda i: (0, 0)),
                  pl.BlockSpec((Kc, TM), lambda i: (0, i))],
        out_specs=(pl.BlockSpec((Cout, TM), lambda i: (0, i)),
                   pl.BlockSpec((1, Cout, 2), lambda i: (i, 0, 0))),
        compiler_params=pltpu.CompilerParams(dimension_semantics=("parallel",)),
        cost_estimate=pl.CostEstimate(
            flops=2 * M * Kc * Cout + 4 * M * Cout,
            transcendentals=0,
            bytes_accessed=4 * (M * Kc + Kc * Cout + M * Cout + G * 2 * Cout)),
    )(wt, xt)

    # Tiny host-side (XLA) reduction of the per-tile partials -> fused scale/shift.
    stats = jnp.sum(partial, axis=0)                   # (Cout, 2)
    mean = stats[:, 0] / M
    var = stats[:, 1] / M - mean * mean                # biased variance (BN training)
    scale = gamma * lax.rsqrt(var + eps)               # (Cout,)
    shift = beta - mean * scale                        # (Cout,)

    out = pl.pallas_call(
        _bn_relu_kernel,
        out_shape=jax.ShapeDtypeStruct((Cout, M), jnp.float32),
        grid=(G,),
        in_specs=[pl.BlockSpec((Cout, TM), lambda i: (0, i)),
                  pl.BlockSpec((Cout, 1), lambda i: (0, 0)),
                  pl.BlockSpec((Cout, 1), lambda i: (0, 0))],
        out_specs=pl.BlockSpec((Cout, TM), lambda i: (0, i)),
        compiler_params=pltpu.CompilerParams(dimension_semantics=("parallel",)),
        cost_estimate=pl.CostEstimate(
            flops=3 * M * Cout, transcendentals=0,
            bytes_accessed=4 * (2 * M * Cout + 2 * Cout)),
    )(y, scale.reshape(Cout, 1), shift.reshape(Cout, 1))
    return out


def _im2col_t(xcf, dilation, padding, K=3):
    """xcf: (Cin, N, D, H, W) channel-first -> (K^3*Cin, N*Do*Ho*Wo).

    Row (contraction) order is (kd, kh, kw, cin) — matches w.reshape(-1, Cout).
    Column order is (n, d, h, w).
    """
    Cin, N, D, H, W = xcf.shape
    xp = jnp.pad(xcf, ((0, 0), (0, 0), (padding, padding),
                       (padding, padding), (padding, padding)))
    Do = D + 2 * padding - dilation * (K - 1)
    Ho = H + 2 * padding - dilation * (K - 1)
    Wo = W + 2 * padding - dilation * (K - 1)
    rows = []
    for kd in range(K):
        for kh in range(K):
            for kw in range(K):
                s = xp[:, :, kd * dilation:kd * dilation + Do,
                             kh * dilation:kh * dilation + Ho,
                             kw * dilation:kw * dilation + Wo]
                rows.append(s.reshape(Cin, N * Do * Ho * Wo))
    return jnp.concatenate(rows, axis=0)


def _block_diag(mats):
    rows = sum(m.shape[0] for m in mats)
    cols = sum(m.shape[1] for m in mats)
    out = jnp.zeros((rows, cols), mats[0].dtype)
    r = c = 0
    for m in mats:
        out = out.at[r:r + m.shape[0], c:c + m.shape[1]].set(m)
        r += m.shape[0]
        c += m.shape[1]
    return out


def dilated_conv_forward(x_ncdhw, p):
    """Pallas implementation of dilatedConv.forward. Input/output are NCDHW."""
    N, C, D, H, W = x_ncdhw.shape
    xcf = jnp.transpose(x_ncdhw, (1, 0, 2, 3, 4))          # (C, N, D, H, W)
    M = N * D * H * W

    # --- three dilated branches + torch.concat fused into one conv-BN-ReLU pair -------
    X1 = _im2col_t(xcf, dilation=1, padding=1)             # (27*C, M)
    X3 = _im2col_t(xcf, dilation=3, padding=3)
    X5 = _im2col_t(xcf, dilation=5, padding=5)
    Xb = jnp.concatenate([X1, X3, X5], axis=0)             # (3*27*C, M)

    (w1, _, g1, bt1) = p["b1"]
    (w3, _, g3, bt3) = p["b3"]
    (w5, _, g5, bt5) = p["b5"]
    Wbd = _block_diag([w1.reshape(-1, C).T,
                       w3.reshape(-1, C).T,
                       w5.reshape(-1, C).T])               # (3C, 3*27*C)
    gcat = jnp.concatenate([g1.reshape(-1), g3.reshape(-1), g5.reshape(-1)])
    bcat = jnp.concatenate([bt1.reshape(-1), bt3.reshape(-1), bt5.reshape(-1)])

    cat_cf = _conv_bn_relu_t(Wbd, Xb, gcat, bcat)          # (3C, M) == concat(dim=1)
    cat_cf = cat_cf.reshape(3 * C, N, D, H, W)             # already channel-first

    # --- fuse conv ---------------------------------------------------------------------
    wf, _, gf, btf = p["fuse"]
    Xf = _im2col_t(cat_cf, dilation=1, padding=1)          # (27*3C, M)
    out_cf = _conv_bn_relu_t(wf.reshape(-1, C).T, Xf,
                             gf.reshape(-1), btf.reshape(-1))   # (C, M)
    out = out_cf.reshape(C, N, D, H, W)
    return jnp.transpose(out, (1, 0, 2, 3, 4))             # -> NCDHW


# ----------------------------- pure-JAX reference --------------------------------------
def _ref_cbr(x, w, b, g, bt, dilation, padding):
    y = lax.conv_general_dilated(
        x, w, window_strides=(1, 1, 1),
        padding=[(padding, padding)] * 3,
        rhs_dilation=(dilation,) * 3,
        dimension_numbers=("NDHWC", "DHWIO", "NDHWC"),
    )
    y = y + b[0]
    mean = jnp.mean(y, axis=(0, 1, 2, 3), keepdims=True)
    var = jnp.mean((y - mean) ** 2, axis=(0, 1, 2, 3), keepdims=True)
    y = (y - mean) * lax.rsqrt(var + EPS) * g[0] + bt[0]
    return jnp.maximum(y, 0.0)


def dilated_conv_reference(x_ncdhw, p):
    x = jnp.transpose(x_ncdhw, (0, 2, 3, 4, 1))
    c1 = _ref_cbr(x, *p["b1"], dilation=1, padding=1)
    c3 = _ref_cbr(x, *p["b3"], dilation=3, padding=3)
    c5 = _ref_cbr(x, *p["b5"], dilation=5, padding=5)
    cat = jnp.concatenate([c1, c3, c5], axis=-1)
    out = _ref_cbr(cat, *p["fuse"], dilation=1, padding=1)
    return jnp.transpose(out, (0, 4, 1, 2, 3))


# ----------------------------- parameter init ------------------------------------------
def _init_block(key, cin, cout, K=3):
    k1, k2, k3, k4 = jax.random.split(key, 4)
    scale = 1.0 / jnp.sqrt(jnp.float32(cin * K * K * K))
    w = jax.random.normal(k1, (K, K, K, cin, cout), jnp.float32) * scale
    b = jax.random.normal(k2, (1, cout), jnp.float32) * 0.1   # cancelled by training-mode BN
    g = 1.0 + 0.1 * jax.random.normal(k3, (1, cout), jnp.float32)
    bt = 0.1 * jax.random.normal(k4, (1, cout), jnp.float32)
    return (w, b, g, bt)


if __name__ == "__main__":
    key = jax.random.PRNGKey(0)
    kx, k1, k3, k5, kf = jax.random.split(key, 5)

    N, C, D, H, W = 2, 4, 8, 8, 8
    x = jax.random.normal(kx, (N, C, D, H, W), jnp.float32)  # NCDHW like PyTorch

    params = {
        "b1": _init_block(k1, C, C),
        "b3": _init_block(k3, C, C),
        "b5": _init_block(k5, C, C),
        "fuse": _init_block(kf, 3 * C, C),
    }

    out = jax.block_until_ready(jax.jit(dilated_conv_forward)(x, params))
    ref = jax.block_until_ready(dilated_conv_reference(x, params))

    max_diff = float(jnp.max(jnp.abs(out - ref)))
    assert out.shape == (N, C, D, H, W), out.shape
    assert max_diff < 1e-3, f"mismatch vs reference: {max_diff}"

    print("KERNEL_OK")
</pallas_src>

<mosaic_0001>
module attributes {stable_mosaic.version = 11 : i64} {
  func.func @_matmul_stats_kernel(%arg0: i32, %arg1: memref<12x324xf32, #tpu.memory_space<vmem>>, %arg2: memref<324x512xf32, #tpu.memory_space<vmem>>, %arg3: memref<12x512xf32, #tpu.memory_space<vmem>>, %arg4: memref<1x12x2xf32, #tpu.memory_space<vmem>>) attributes {dimension_semantics = [#tpu.dimension_semantics<parallel>], iteration_bounds = array<i64: 2>, scalar_prefetch = 0 : i64, scratch_operands = 0 : i64, tpu.core_type = #tpu.core_type<tc>, window_params = [{pipeline_mode = #tpu.pipeline_mode<synchronous>, transform_indices = @transform_0, window_bounds = array<i64: 12, 324>}, {transform_indices = @transform_1, window_bounds = array<i64: 324, 512>}, {transform_indices = @transform_2, window_bounds = array<i64: 12, 512>}, {transform_indices = @transform_3, window_bounds = array<i64: 1, 12, 2>}]} {
    %c0 = arith.constant 0 : index
    %c0_0 = arith.constant 0 : index
    %0 = vector.load %arg1[%c0, %c0_0] : memref<12x324xf32, #tpu.memory_space<vmem>>, vector<12x324xf32>
    %c0_1 = arith.constant 0 : index
    %c0_2 = arith.constant 0 : index
    %1 = vector.load %arg2[%c0_1, %c0_2] : memref<324x512xf32, #tpu.memory_space<vmem>>, vector<324x512xf32>
    %cst = arith.constant dense<0.000000e+00> : vector<12x512xf32>
    %2 = tpu.matmul %0, %1, %cst {dimension_numbers = #tpu.dot_dimension_numbers<[1], [0], [0], [1], [0, 0, 1, 1], [], []>} : vector<12x324xf32>, vector<324x512xf32>, vector<12x512xf32> -> vector<12x512xf32>
    %c0_3 = arith.constant 0 : index
    %c0_4 = arith.constant 0 : index
    %3 = vector.load %arg3[%c0_3, %c0_4] : memref<12x512xf32, #tpu.memory_space<vmem>>, vector<12x512xf32>
    tpu.vector_store %arg3[%c0_3, %c0_4], %2 {strides = array<i32>} : memref<12x512xf32, #tpu.memory_space<vmem>>, vector<12x512xf32>,
    %cst_5 = arith.constant dense<0.000000e+00> : vector<12xf32>
    %4 = vector.multi_reduction <add>, %2, %cst_5 [1] : vector<12x512xf32> to vector<12xf32>
    %5 = vector.shape_cast %4 : vector<12xf32> to vector<12x1xf32>
    %6 = arith.mulf %2, %2 : vector<12x512xf32>
    %cst_6 = arith.constant dense<0.000000e+00> : vector<12xf32>
    %7 = vector.multi_reduction <add>, %6, %cst_6 [1] : vector<12x512xf32> to vector<12xf32>
    %8 = vector.shape_cast %7 : vector<12xf32> to vector<12x1xf32>
    %9 = tpu.concatenate %5, %8 in 1 : vector<12x1xf32>, vector<12x1xf32> -> vector<12x2xf32>
    %c0_7 = arith.constant 0 : index
    %c0_8 = arith.constant 0 : index
    %c0_9 = arith.constant 0 : index
    %10 = vector.load %arg4[%c0_7, %c0_8, %c0_9] : memref<1x12x2xf32, #tpu.memory_space<vmem>>, vector<1x12x2xf32>
    %11 = vector.shape_cast %10 : vector<1x12x2xf32> to vector<12x2xf32>
    %12 = vector.shape_cast %9 : vector<12x2xf32> to vector<1x12x2xf32>
    tpu.vector_store %arg4[%c0_7, %c0_8, %c0_9], %12 {strides = array<i32>} : memref<1x12x2xf32, #tpu.memory_space<vmem>>, vector<1x12x2xf32>,
    return
  }
  func.func @transform_0(%arg0: i32) -> (i32, i32) {
    %c0_i32 = arith.constant 0 : i32
    %c0_i32_0 = arith.constant 0 : i32
    %c0_i32_1 = arith.constant 0 : i32
    return %c0_i32, %c0_i32_0 : i32, i32
  }
  func.func @transform_1(%arg0: i32) -> (i32, i32) {
    %c0_i32 = arith.constant 0 : i32
    %c0_i32_0 = arith.constant 0 : i32
    return %c0_i32, %arg0 : i32, i32
  }
  func.func @transform_2(%arg0: i32) -> (i32, i32) {
    %c0_i32 = arith.constant 0 : i32
    %c0_i32_0 = arith.constant 0 : i32
    return %c0_i32, %arg0 : i32, i32
  }
  func.func @transform_3(%arg0: i32) -> (i32, i32, i32) {
    %c0_i32 = arith.constant 0 : i32
    %c0_i32_0 = arith.constant 0 : i32
    %c0_i32_1 = arith.constant 0 : i32
    return %arg0, %c0_i32, %c0_i32_0 : i32, i32, i32
  }
}

module attributes {stable_mosaic.version = 11 : i64} {
  func.func @_bn_relu_kernel(%arg0: i32, %arg1: memref<12x512xf32, #tpu.memory_space<vmem>>, %arg2: memref<12x1xf32, #tpu.memory_space<vmem>>, %arg3: memref<12x1xf32, #tpu.memory_space<vmem>>, %arg4: memref<12x512xf32, #tpu.memory_space<vmem>>) attributes {dimension_semantics = [#tpu.dimension_semantics<parallel>], iteration_bounds = array<i64: 2>, scalar_prefetch = 0 : i64, scratch_operands = 0 : i64, tpu.core_type = #tpu.core_type<tc>, window_params = [{transform_indices = @transform_0, window_bounds = array<i64: 12, 512>}, {pipeline_mode = #tpu.pipeline_mode<synchronous>, transform_indices = @transform_1, window_bounds = array<i64: 12, 1>}, {pipeline_mode = #tpu.pipeline_mode<synchronous>, transform_indices = @transform_2, window_bounds = array<i64: 12, 1>}, {transform_indices = @transform_3, window_bounds = array<i64: 12, 512>}]} {
    %c0 = arith.constant 0 : index
    %c0_0 = arith.constant 0 : index
    %0 = vector.load %arg1[%c0, %c0_0] : memref<12x512xf32, #tpu.memory_space<vmem>>, vector<12x512xf32>
    %c0_1 = arith.constant 0 : index
    %c0_2 = arith.constant 0 : index
    %1 = vector.load %arg2[%c0_1, %c0_2] : memref<12x1xf32, #tpu.memory_space<vmem>>, vector<12x1xf32>
    %2 = vector.broadcast %1 : vector<12x1xf32> to vector<12x512xf32>
    %3 = arith.mulf %0, %2 : vector<12x512xf32>
    %c0_3 = arith.constant 0 : index
    %c0_4 = arith.constant 0 : index
    %4 = vector.load %arg3[%c0_3, %c0_4] : memref<12x1xf32, #tpu.memory_space<vmem>>, vector<12x1xf32>
    %5 = vector.broadcast %4 : vector<12x1xf32> to vector<12x512xf32>
    %6 = arith.addf %3, %5 : vector<12x512xf32>
    %cst = arith.constant 0.000000e+00 : f32
    %7 = vector.broadcast %cst : f32 to vector<12x512xf32>
    %8 = arith.maximumf %6, %7 : vector<12x512xf32>
    %c0_5 = arith.constant 0 : index
    %c0_6 = arith.constant 0 : index
    %9 = vector.load %arg4[%c0_5, %c0_6] : memref<12x512xf32, #tpu.memory_space<vmem>>, vector<12x512xf32>
    tpu.vector_store %arg4[%c0_5, %c0_6], %8 {strides = array<i32>} : memref<12x512xf32, #tpu.memory_space<vmem>>, vector<12x512xf32>,
    return
  }
  func.func @transform_0(%arg0: i32) -> (i32, i32) {
    %c0_i32 = arith.constant 0 : i32
    %c0_i32_0 = arith.constant 0 : i32
    return %c0_i32, %arg0 : i32, i32
  }
  func.func @transform_1(%arg0: i32) -> (i32, i32) {
    %c0_i32 = arith.constant 0 : i32
    %c0_i32_0 = arith.constant 0 : i32
    %c0_i32_1 = arith.constant 0 : i32
    return %c0_i32, %c0_i32_0 : i32, i32
  }
  func.func @transform_2(%arg0: i32) -> (i32, i32) {
    %c0_i32 = arith.constant 0 : i32
    %c0_i32_0 = arith.constant 0 : i32
    %c0_i32_1 = arith.constant 0 : i32
    return %c0_i32, %c0_i32_0 : i32, i32
  }
  func.func @transform_3(%arg0: i32) -> (i32, i32) {
    %c0_i32 = arith.constant 0 : i32
    %c0_i32_0 = arith.constant 0 : i32
    return %c0_i32, %arg0 : i32, i32
  }
}

module attributes {stable_mosaic.version = 11 : i64} {
  func.func @_matmul_stats_kernel(%arg0: i32, %arg1: memref<4x324xf32, #tpu.memory_space<vmem>>, %arg2: memref<324x512xf32, #tpu.memory_space<vmem>>, %arg3: memref<4x512xf32, #tpu.memory_space<vmem>>, %arg4: memref<1x4x2xf32, #tpu.memory_space<vmem>>) attributes {dimension_semantics = [#tpu.dimension_semantics<parallel>], iteration_bounds = array<i64: 2>, scalar_prefetch = 0 : i64, scratch_operands = 0 : i64, tpu.core_type = #tpu.core_type<tc>, window_params = [{pipeline_mode = #tpu.pipeline_mode<synchronous>, transform_indices = @transform_0, window_bounds = array<i64: 4, 324>}, {transform_indices = @transform_1, window_bounds = array<i64: 324, 512>}, {transform_indices = @transform_2, window_bounds = array<i64: 4, 512>}, {transform_indices = @transform_3, window_bounds = array<i64: 1, 4, 2>}]} {
    %c0 = arith.constant 0 : index
    %c0_0 = arith.constant 0 : index
    %0 = vector.load %arg1[%c0, %c0_0] : memref<4x324xf32, #tpu.memory_space<vmem>>, vector<4x324xf32>
    %c0_1 = arith.constant 0 : index
    %c0_2 = arith.constant 0 : index
    %1 = vector.load %arg2[%c0_1, %c0_2] : memref<324x512xf32, #tpu.memory_space<vmem>>, vector<324x512xf32>
    %cst = arith.constant dense<0.000000e+00> : vector<4x512xf32>
    %2 = tpu.matmul %0, %1, %cst {dimension_numbers = #tpu.dot_dimension_numbers<[1], [0], [0], [1], [0, 0, 1, 1], [], []>} : vector<4x324xf32>, vector<324x512xf32>, vector<4x512xf32> -> vector<4x512xf32>
    %c0_3 = arith.constant 0 : index
    %c0_4 = arith.constant 0 : index
    %3 = vector.load %arg3[%c0_3, %c0_4] : memref<4x512xf32, #tpu.memory_space<vmem>>, vector<4x512xf32>
    tpu.vector_store %arg3[%c0_3, %c0_4], %2 {strides = array<i32>} : memref<4x512xf32, #tpu.memory_space<vmem>>, vector<4x512xf32>,
    %cst_5 = arith.constant dense<0.000000e+00> : vector<4xf32>
    %4 = vector.multi_reduction <add>, %2, %cst_5 [1] : vector<4x512xf32> to vector<4xf32>
    %5 = vector.shape_cast %4 : vector<4xf32> to vector<4x1xf32>
    %6 = arith.mulf %2, %2 : vector<4x512xf32>
    %cst_6 = arith.constant dense<0.000000e+00> : vector<4xf32>
    %7 = vector.multi_reduction <add>, %6, %cst_6 [1] : vector<4x512xf32> to vector<4xf32>
    %8 = vector.shape_cast %7 : vector<4xf32> to vector<4x1xf32>
    %9 = tpu.concatenate %5, %8 in 1 : vector<4x1xf32>, vector<4x1xf32> -> vector<4x2xf32>
    %c0_7 = arith.constant 0 : index
    %c0_8 = arith.constant 0 : index
    %c0_9 = arith.constant 0 : index
    %10 = vector.load %arg4[%c0_7, %c0_8, %c0_9] : memref<1x4x2xf32, #tpu.memory_space<vmem>>, vector<1x4x2xf32>
    %11 = vector.shape_cast %10 : vector<1x4x2xf32> to vector<4x2xf32>
    %12 = vector.shape_cast %9 : vector<4x2xf32> to vector<1x4x2xf32>
    tpu.vector_store %arg4[%c0_7, %c0_8, %c0_9], %12 {strides = array<i32>} : memref<1x4x2xf32, #tpu.memory_space<vmem>>, vector<1x4x2xf32>,
    return
  }
  func.func @transform_0(%arg0: i32) -> (i32, i32) {
    %c0_i32 = arith.constant 0 : i32
    %c0_i32_0 = arith.constant 0 : i32
    %c0_i32_1 = arith.constant 0 : i32
    return %c0_i32, %c0_i32_0 : i32, i32
  }
  func.func @transform_1(%arg0: i32) -> (i32, i32) {
    %c0_i32 = arith.constant 0 : i32
    %c0_i32_0 = arith.constant 0 : i32
    return %c0_i32, %arg0 : i32, i32
  }
  func.func @transform_2(%arg0: i32) -> (i32, i32) {
    %c0_i32 = arith.constant 0 : i32
    %c0_i32_0 = arith.constant 0 : i32
    return %c0_i32, %arg0 : i32, i32
  }
  func.func @transform_3(%arg0: i32) -> (i32, i32, i32) {
    %c0_i32 = arith.constant 0 : i32
    %c0_i32_0 = arith.constant 0 : i32
    %c0_i32_1 = arith.constant 0 : i32
    return %arg0, %c0_i32, %c0_i32_0 : i32, i32, i32
  }
}

module attributes {stable_mosaic.version = 11 : i64} {
  func.func @_bn_relu_kernel(%arg0: i32, %arg1: memref<4x512xf32, #tpu.memory_space<vmem>>, %arg2: memref<4x1xf32, #tpu.memory_space<vmem>>, %arg3: memref<4x1xf32, #tpu.memory_space<vmem>>, %arg4: memref<4x512xf32, #tpu.memory_space<vmem>>) attributes {dimension_semantics = [#tpu.dimension_semantics<parallel>], iteration_bounds = array<i64: 2>, scalar_prefetch = 0 : i64, scratch_operands = 0 : i64, tpu.core_type = #tpu.core_type<tc>, window_params = [{transform_indices = @transform_0, window_bounds = array<i64: 4, 512>}, {pipeline_mode = #tpu.pipeline_mode<synchronous>, transform_indices = @transform_1, window_bounds = array<i64: 4, 1>}, {pipeline_mode = #tpu.pipeline_mode<synchronous>, transform_indices = @transform_2, window_bounds = array<i64: 4, 1>}, {transform_indices = @transform_3, window_bounds = array<i64: 4, 512>}]} {
    %c0 = arith.constant 0 : index
    %c0_0 = arith.constant 0 : index
    %0 = vector.load %arg1[%c0, %c0_0] : memref<4x512xf32, #tpu.memory_space<vmem>>, vector<4x512xf32>
    %c0_1 = arith.constant 0 : index
    %c0_2 = arith.constant 0 : index
    %1 = vector.load %arg2[%c0_1, %c0_2] : memref<4x1xf32, #tpu.memory_space<vmem>>, vector<4x1xf32>
    %2 = vector.broadcast %1 : vector<4x1xf32> to vector<4x512xf32>
    %3 = arith.mulf %0, %2 : vector<4x512xf32>
    %c0_3 = arith.constant 0 : index
    %c0_4 = arith.constant 0 : index
    %4 = vector.load %arg3[%c0_3, %c0_4] : memref<4x1xf32, #tpu.memory_space<vmem>>, vector<4x1xf32>
    %5 = vector.broadcast %4 : vector<4x1xf32> to vector<4x512xf32>
    %6 = arith.addf %3, %5 : vector<4x512xf32>
    %cst = arith.constant 0.000000e+00 : f32
    %7 = vector.broadcast %cst : f32 to vector<4x512xf32>
    %8 = arith.maximumf %6, %7 : vector<4x512xf32>
    %c0_5 = arith.constant 0 : index
    %c0_6 = arith.constant 0 : index
    %9 = vector.load %arg4[%c0_5, %c0_6] : memref<4x512xf32, #tpu.memory_space<vmem>>, vector<4x512xf32>
    tpu.vector_store %arg4[%c0_5, %c0_6], %8 {strides = array<i32>} : memref<4x512xf32, #tpu.memory_space<vmem>>, vector<4x512xf32>,
    return
  }
  func.func @transform_0(%arg0: i32) -> (i32, i32) {
    %c0_i32 = arith.constant 0 : i32
    %c0_i32_0 = arith.constant 0 : i32
    return %c0_i32, %arg0 : i32, i32
  }
  func.func @transform_1(%arg0: i32) -> (i32, i32) {
    %c0_i32 = arith.constant 0 : i32
    %c0_i32_0 = arith.constant 0 : i32
    %c0_i32_1 = arith.constant 0 : i32
    return %c0_i32, %c0_i32_0 : i32, i32
  }
  func.func @transform_2(%arg0: i32) -> (i32, i32) {
    %c0_i32 = arith.constant 0 : i32
    %c0_i32_0 = arith.constant 0 : i32
    %c0_i32_1 = arith.constant 0 : i32
    return %c0_i32, %c0_i32_0 : i32, i32
  }
  func.func @transform_3(%arg0: i32) -> (i32, i32) {
    %c0_i32 = arith.constant 0 : i32
    %c0_i32_0 = arith.constant 0 : i32
    return %c0_i32, %arg0 : i32, i32
  }
}

</mosaic_0001>

<bundles_post_ra>
// kernel: dilated_conv_forward.5
= control target key start
LH: loop header
LB: loop body
LE: loop exit
PB: predicated region body
PF: predicated region fallthrough
CT: control target
= control target key end

     0   :  { %s451_s12 = smov 0   ;;  %s453_s13 = smov 0   ;;  %s541_s0 = inlined_call_operand.vmem [shape: f32[12,1024], index: 0, kind: input, shape index: {}]   ;;  %s542_s1 = inlined_call_operand.vmem [shape: f32[12,1], index: 1, kind: input, shape index: {}]   ;;  %s543_s2 = inlined_call_operand.vmem [shape: f32[12,1], index: 2, kind: input, shape index: {}]   ;;  %s544_s3 = inlined_call_operand.vmem [shape: f32[12,1024], index: 3, kind: output, shape index: {}]  }
   0x1   :  { %s455_s14 = smov 0  }
   0x2 LB: > { %s362_s15 = sadd.s32 4294967295, %s428_s14   ;;  %s468_s16 = sadd.s32 1, %s428_s14   ;;  %s428_s14 = sphi %s455_s14, %s548_s14   ;;  %s424_s13 = sphi %s453_s13, %s547_s13   ;;  %s420_s12 = sphi %s451_s12, %s546_s12  }
   0x3   : > { %s17_s17 = ssub.s32 %s428_s14, %s468_s16  ;;  %s20_s18 = sadd.s32 1, %s424_s13 }
   0x4   : > { %p18_p0 = scmp.eq.s32.totalorder %s17_s17, 0  ;;  %p27_p1 = scmp.ne.s32.totalorder %s424_s13, %s420_s12 }
   0x5   : > { %p28_p2 = scmp.eq.s32.totalorder %s428_s14, 0  ;;  %p99_p3 = scmp.eq.s32.totalorder %s362_s15, 1 }
   0x6   : > { %s479_s19 = scalar_select %p18_p0, %s424_s13, %s20_s18  }
   0x7   : > { %p29_p4 = por %p28_p2, %p27_p1  ;;  %p481_p5 = por %p99_p3, %p27_p1 }
   0x8   : > { %p365_p6 = scmp.ge.s32.totalorder %s428_s14, 2 }
   0xa   : > { %127 = sbr.rel (%p365_p6) target bundleno = 27 (0x1b), region = 24 }
   0xf   : > { %130 = sbr.rel (!%p29_p4) target bundleno = 27 (0x1b), region = 28  ;;  %s132_s21 = sand.u32 (%p29_p4), 1, %s424_s13  }
  0x10   : > { %s377_s22 = sshll.u32 (%p29_p4), %s428_s14, 5  ;;  %s366_s23 = sshll.u32 (%p29_p4), %s132_s21, 6 }
  0x11   : > { %s137_s26 = scalar_lea.vmem (%p29_p4), %s541_s0, %s377_s22  ;;  %s134_s27 = scalar_lea.vmem (%p29_p4), [#allocation2], %s366_s23 }
  0x12   : > { %v150_v0 = vld [vmem:[%s137_s26] sm:$0xff] (%p29_p4)  ;;  %v152_v1 = vld [vmem:[%s137_s26 + $0x8] sm:$0xff] (%p29_p4)  ;;  %v154_v2 = vld [vmem:[%s137_s26 + $0x10] sm:$0xff] (%p29_p4) }
  0x13   : > { %151 = vst [vmem:[%s134_s27] sm:$0xff] (%p29_p4), %v150_v0  ;;  %v156_v3 = vld [vmem:[%s137_s26 + $0x18] sm:$0xff] (%p29_p4)  ;;  %v158_v4 = vld [vmem:[%s137_s26 + $0x40] sm:$0xff] (%p29_p4)  ;;  %v160_v5 = vld [vmem:[%s137_s26 + $0x48] sm:$0xff] (%p29_p4) }
  0x14   : > { %153 = vst [vmem:[%s134_s27 + $0x8] sm:$0xff] %v152_v1  ;;  %v162_v6 = vld [vmem:[%s137_s26 + $0x50] sm:$0xff]  ;;  %v164_v7 = vld [vmem:[%s137_s26 + $0x58] sm:$0xff] }
  0x15   : > { %155 = vst [vmem:[%s134_s27 + $0x10] sm:$0xff] %v154_v2 }
  0x16   : > { %157 = vst [vmem:[%s134_s27 + $0x18] sm:$0xff] %v156_v3 }
  0x17   : > { %159 = vst [vmem:[%s134_s27 + $0x20] sm:$0xff] %v158_v4 }
  0x18   : > { %161 = vst [vmem:[%s134_s27 + $0x28] sm:$0xff] %v160_v5 }
  0x19   : > { %163 = vst [vmem:[%s134_s27 + $0x30] sm:$0xff] %v162_v6 }
  0x1a   : > { %165 = vst [vmem:[%s134_s27 + $0x38] sm:$0xff] %v164_v7 }
  0x1b PF: > { %p369_p7 = scmp.ge.s32.totalorder %s428_s14, 1  ;;  %p170_p8 = scmp.lt.s32.totalorder %s428_s14, 3 }
  0x1d   : > { %p171_p9 = pnand %p369_p7, %p170_p8 }
  0x1e   : > { %s177_s9 = sand.u32 (!%p171_p9), 1, %s420_s12  }
  0x1f   : > { %174 = sbr.rel (%p171_p9) target bundleno = 179 (0xb3), region = 51  ;;  %s370_s10 = sshll.u32 (!%p171_p9), %s177_s9, 6 }
  0x20   : > { %s179_s11 = scalar_lea.vmem (!%p171_p9), [#allocation2], %s370_s10  ;;  %s506_s12 = scalar_lea.vmem (!%p171_p9), [#allocation3], %s370_s10 }
  0x24   : > { %v229_v8 = vld [vmem:[%s543_s2] sm:$0xff]  ;;  %v430_v10 = vmov 0   ;;  %v230_v11 = vld [vmem:[%s543_s2 + $0x8] sm:$0xf]  ;;  %v203_v15 = vld [vmem:[%s179_s11 + $0x10] sm:$0xff]  ;;  %s378_s17 = sshll.u32 (%p481_p5), %s362_s15, 5 }
  0x25   : > { %v209_v9 = vld [vmem:[%s542_s1] sm:$0xff]  ;;  %405 = vset.pattern.permute.xlu1 %v430_v10  ;;  %404 = vset.pattern.permute.xlu0 %v430_v10  ;;  %v210_v12 = vld [vmem:[%s542_s1 + $0x8] sm:$0xf]  ;;  %v204_v16 = vld [vmem:[%s179_s11 + $0x18] sm:$0xff]  ;;  %s274_s22 = scalar_lea.vmem (%p481_p5), %s544_s3, %s378_s17 }
  0x26   : > { %233 = vperm.xlu1 %405, %v229_v8   ;;  %213 = vperm.xlu0 %404, %v209_v9   ;;  %v201_v13 = vld [vmem:[%s179_s11] sm:$0xff]  ;;  %v202_v14 = vld [vmem:[%s179_s11 + $0x8] sm:$0xff]  ;;  %v207_v33 = vld [vmem:[%s179_s11 + $0x30] sm:$0xf] }
  0x27   : > { %v205_v27 = vld [vmem:[%s179_s11 + $0x20] sm:$0xf]  ;;  %v206_v31 = vld [vmem:[%s179_s11 + $0x28] sm:$0xf]  ;;  %v208_v34 = vld [vmem:[%s179_s11 + $0x38] sm:$0xf] }
  0x2e   : > { %238 = vperm.xlu1 %405, %v230_v11   ;;  %218 = vperm.xlu0 %404, %v210_v12  }
  0x98   : > { %v234_v17 = vpop.permute.xlu1 %233  ;;  %v214_v18 = vpop.permute.xlu0 %213 }
  0x99   : > { %v221_v19 = vmul.f32 %v214_v18, %v201_v13  ;;  %v222_v20 = vmul.f32 %v214_v18, %v202_v14  ;;  %v223_v21 = vmul.f32 %v214_v18, %v203_v15  ;;  %v224_v22 = vmul.f32 %v214_v18, %v204_v16 }
  0x9b   : > { %v241_v23 = vadd.f32 %v234_v17, %v221_v19  ;;  %v242_v24 = vadd.f32 %v234_v17, %v222_v20  ;;  %v243_v25 = vadd.f32 %v234_v17, %v223_v21  ;;  %v244_v26 = vadd.f32 %v234_v17, %v224_v22 }
  0x9d   : > { %v249_v28 = vmax.f32 %v241_v23, 0.0  ;;  %v250_v29 = vmax.f32 %v242_v24, 0.0  ;;  %v251_v30 = vmax.f32 %v243_v25, 0.0  ;;  %v252_v32 = vmax.f32 %v244_v26, 0.0 }
  0x9f   : > { %257 = vst [vmem:[%s506_s12] sm:$0xff] %v249_v28 }
  0xa0   : > { %258 = vst [vmem:[%s506_s12 + $0x8] sm:$0xff] %v250_v29  ;;  %v219_v35 = vpop.permute.xlu0 %218  ;;  %v239_v40 = vpop.permute.xlu1 %238 }
  0xa1   : > { %259 = vst [vmem:[%s506_s12 + $0x10] sm:$0xff] %v251_v30  ;;  %v225_v36 = vmul.f32 %v219_v35, %v205_v27  ;;  %v226_v37 = vmul.f32 %v219_v35, %v206_v31  ;;  %v227_v38 = vmul.f32 %v219_v35, %v207_v33  ;;  %v228_v39 = vmul.f32 %v219_v35, %v208_v34 }
  0xa2   : > { %260 = vst [vmem:[%s506_s12 + $0x18] sm:$0xff] %v252_v32 }
  0xa3   : > { %v245_v41 = vadd.f32 %v239_v40, %v225_v36  ;;  %v246_v42 = vadd.f32 %v239_v40, %v226_v37  ;;  %v247_v43 = vadd.f32 %v239_v40, %v227_v38  ;;  %v248_v44 = vadd.f32 %v239_v40, %v228_v39 }
  0xa5   : > { %v253_v45 = vmax.f32 %v245_v41, 0.0  ;;  %v254_v46 = vmax.f32 %v246_v42, 0.0  ;;  %v255_v47 = vmax.f32 %v247_v43, 0.0  ;;  %v256_v48 = vmax.f32 %v248_v44, 0.0 }
  0xa6   : > { %271 = sbr.rel (!%p481_p5) target bundleno = 179 (0xb3), region = 59  ;;  %v287_v49 = vld [vmem:[%s506_s12] sm:$0xff] (%p481_p5) }
  0xa7   : > { %261 = vst [vmem:[%s506_s12 + $0x20] sm:$0xf] %v253_v45  ;;  %v289_v50 = vld [vmem:[%s506_s12 + $0x8] sm:$0xff] (%p481_p5) }
  0xa8   : > { %262 = vst [vmem:[%s506_s12 + $0x28] sm:$0xf] %v254_v46  ;;  %v291_v51 = vld [vmem:[%s506_s12 + $0x10] sm:$0xff] (%p481_p5) }
  0xa9   : > { %263 = vst [vmem:[%s506_s12 + $0x30] sm:$0xf] %v255_v47  ;;  %v293_v52 = vld [vmem:[%s506_s12 + $0x18] sm:$0xff] (%p481_p5) }
  0xaa   : > { %264 = vst [vmem:[%s506_s12 + $0x38] sm:$0xf] %v256_v48 }
  0xab   : > { %288 = vst [vmem:[%s274_s22] sm:$0xff] %v287_v49 }
  0xac   : > { %290 = vst [vmem:[%s274_s22 + $0x8] sm:$0xff] %v289_v50 }
  0xad   : > { %292 = vst [vmem:[%s274_s22 + $0x10] sm:$0xff] %v291_v51 }
  0xae   : > { %v295_v53 = vld [vmem:[%s506_s12 + $0x20] sm:$0xff]  ;;  %294 = vst [vmem:[%s274_s22 + $0x18] sm:$0xff] %v293_v52 }
  0xaf   : > { %v297_v54 = vld [vmem:[%s506_s12 + $0x28] sm:$0xff]  ;;  %296 = vst [vmem:[%s274_s22 + $0x40] sm:$0xff] %v295_v53 }
  0xb0   : > { %v299_v55 = vld [vmem:[%s506_s12 + $0x30] sm:$0xff]  ;;  %298 = vst [vmem:[%s274_s22 + $0x48] sm:$0xff] %v297_v54 }
  0xb1   : > { %v301_v56 = vld [vmem:[%s506_s12 + $0x38] sm:$0xff]  ;;  %300 = vst [vmem:[%s274_s22 + $0x50] sm:$0xff] %v299_v55 }
  0xb2   : > { %302 = vst [vmem:[%s274_s22 + $0x58] sm:$0xff] %v301_v56 }
  0xb3 PF: > { %p10_p10 = scmp.ge.s32.totalorder %s468_s16, 4   ;;  %s546_s12 = smov %s424_s13 }
  0xb4   : > { %s547_s13 = smov %s479_s19  ;;  %s548_s14 = smov %s468_s16 }
  0xb5   :  { %12 = sbr.rel (!%p10_p10) target bundleno = 2 (0x2), region = 113 }

// kernel: dilated_conv_forward.4
= control target key start
LH: loop header
LB: loop body
LE: loop exit
PB: predicated region body
PF: predicated region fallthrough
CT: control target
= control target key end

     0   :  { %s1289_s12 = smov 0   ;;  %s1291_s13 = smov 0   ;;  %s1948_s0 = inlined_call_operand.vmem [shape: f32[12,324], index: 0, kind: input, shape index: {}]   ;;  %s1949_s1 = inlined_call_operand.vmem [shape: f32[324,1024], index: 1, kind: input, shape index: {}]   ;;  %s1950_s2 = inlined_call_operand.vmem [shape: f32[12,1024], index: 2, kind: output, shape index: {0}]   ;;  %s1951_s3 = inlined_call_operand.vmem [shape: f32[2,12,2], index: 3, kind: output, shape index: {1}]  }
   0x1   :  { %s1293_s14 = smov 0  }
   0x2 LB: > { %s1305_s15 = sadd.s32 4294967295, %s1267_s14   ;;  %s1308_s16 = sadd.s32 1, %s1267_s14   ;;  %s1267_s14 = sphi %s1293_s14, %s1955_s14   ;;  %s1263_s13 = sphi %s1291_s13, %s1954_s13   ;;  %s1259_s12 = sphi %s1289_s12, %s1953_s12  }
   0x3   : > { %s39_s17 = ssub.s32 %s1267_s14, %s1308_s16  ;;  %s42_s18 = sadd.s32 1, %s1263_s13 }
   0x4   : > { %p40_p0 = scmp.eq.s32.totalorder %s39_s17, 0  ;;  %p49_p1 = scmp.ne.s32.totalorder %s1263_s13, %s1259_s12 }
   0x5   : > { %p50_p2 = scmp.eq.s32.totalorder %s1267_s14, 0  ;;  %p79_p3 = scmp.eq.s32.totalorder %s1305_s15, 1 }
   0x6   : > { %s1318_s19 = scalar_select %p40_p0, %s1263_s13, %s42_s18  }
   0x7   : > { %p51_p4 = por %p50_p2, %p49_p1  ;;  %p1320_p5 = por %p79_p3, %p49_p1 }
   0x8   : > { %p1176_p6 = scmp.ge.s32.totalorder %s1267_s14, 2 }
   0xa   : > { %130 = sbr.rel (%p1176_p6) target bundleno = 183 (0xb7), region = 20 }
   0xf   : > { %133 = sbr.rel (!%p51_p4) target bundleno = 183 (0xb7), region = 24  ;;  %s135_s21 = sand.u32 (%p51_p4), 1, %s1263_s13  }
  0x10   : > { %s1200_s22 = sshll.u32 (%p51_p4), %s1267_s14, 5  ;;  %s1219_s23 = smul.u32 (%p51_p4), 1312, %s135_s21 }
  0x11   : > { %s1330_s26 = scalar_lea.vmem (%p51_p4), %s1949_s1, %s1200_s22 }
  0x12   : > { %v153_v0 = vld [vmem:[%s1330_s26] sm:$0xff] (%p51_p4)  ;;  %v155_v1 = vld [vmem:[%s1330_s26 + $0x8] sm:$0xff] (%p51_p4)  ;;  %v157_v2 = vld [vmem:[%s1330_s26 + $0x10] sm:$0xff] (%p51_p4)  ;;  %s1335_s27 = scalar_lea.vmem (%p51_p4), [#allocation2], %s1219_s23 }
  0x13   : > { %154 = vst [vmem:[%s1335_s27] sm:$0xff] (%p51_p4), %v153_v0  ;;  %v159_v3 = vld [vmem:[%s1330_s26 + $0x18] sm:$0xff] (%p51_p4)  ;;  %v161_v4 = vld [vmem:[%s1330_s26 + $0x40] sm:$0xff] (%p51_p4)  ;;  %v163_v5 = vld [vmem:[%s1330_s26 + $0x48] sm:$0xff] (%p51_p4) }
  0x14   : > { %156 = vst [vmem:[%s1335_s27 + $0x8] sm:$0xff] %v155_v1  ;;  %v165_v6 = vld [vmem:[%s1330_s26 + $0x50] sm:$0xff]  ;;  %v167_v7 = vld [vmem:[%s1330_s26 + $0x58] sm:$0xff]  ;;  %v169_v8 = vld [vmem:[%s1330_s26 + $0x80] sm:$0xff] }
  0x15   : > { %158 = vst [vmem:[%s1335_s27 + $0x10] sm:$0xff] %v157_v2  ;;  %v171_v9 = vld [vmem:[%s1330_s26 + $0x88] sm:$0xff]  ;;  %v173_v10 = vld [vmem:[%s1330_s26 + $0x90] sm:$0xff]  ;;  %v175_v11 = vld [vmem:[%s1330_s26 + $0x98] sm:$0xff] }
  0x16   : > { %160 = vst [vmem:[%s1335_s27 + $0x18] sm:$0xff] %v159_v3  ;;  %v177_v12 = vld [vmem:[%s1330_s26 + $0xc0] sm:$0xff]  ;;  %v179_v13 = vld [vmem:[%s1330_s26 + $0xc8] sm:$0xff]  ;;  %v181_v14 = vld [vmem:[%s1330_s26 + $0xd0] sm:$0xff] }
  0x17   : > { %162 = vst [vmem:[%s1335_s27 + $0x20] sm:$0xff] %v161_v4  ;;  %v183_v15 = vld [vmem:[%s1330_s26 + $0xd8] sm:$0xff]  ;;  %v185_v16 = vld [vmem:[%s1330_s26 + $0x100] sm:$0xff]  ;;  %v187_v17 = vld [vmem:[%s1330_s26 + $0x108] sm:$0xff] }
  0x18   : > { %164 = vst [vmem:[%s1335_s27 + $0x28] sm:$0xff] %v163_v5  ;;  %v189_v18 = vld [vmem:[%s1330_s26 + $0x110] sm:$0xff]  ;;  %v191_v19 = vld [vmem:[%s1330_s26 + $0x118] sm:$0xff]  ;;  %v193_v20 = vld [vmem:[%s1330_s26 + $0x140] sm:$0xff] }
  0x19   : > { %166 = vst [vmem:[%s1335_s27 + $0x30] sm:$0xff] %v165_v6  ;;  %v195_v21 = vld [vmem:[%s1330_s26 + $0x148] sm:$0xff]  ;;  %v197_v22 = vld [vmem:[%s1330_s26 + $0x150] sm:$0xff]  ;;  %v199_v23 = vld [vmem:[%s1330_s26 + $0x158] sm:$0xff] }
  0x1a   : > { %168 = vst [vmem:[%s1335_s27 + $0x38] sm:$0xff] %v167_v7  ;;  %v201_v24 = vld [vmem:[%s1330_s26 + $0x180] sm:$0xff]  ;;  %v203_v25 = vld [vmem:[%s1330_s26 + $0x188] sm:$0xff]  ;;  %v205_v26 = vld [vmem:[%s1330_s26 + $0x190] sm:$0xff] }
  0x1b   : > { %170 = vst [vmem:[%s1335_s27 + $0x40] sm:$0xff] %v169_v8  ;;  %v207_v27 = vld [vmem:[%s1330_s26 + $0x198] sm:$0xff]  ;;  %v209_v28 = vld [vmem:[%s1330_s26 + $0x1c0] sm:$0xff]  ;;  %v211_v29 = vld [vmem:[%s1330_s26 + $0x1c8] sm:$0xff] }
  0x1c   : > { %172 = vst [vmem:[%s1335_s27 + $0x48] sm:$0xff] %v171_v9  ;;  %v213_v30 = vld [vmem:[%s1330_s26 + $0x1d0] sm:$0xff]  ;;  %v215_v31 = vld [vmem:[%s1330_s26 + $0x1d8] sm:$0xff]  ;;  %v217_v32 = vld [vmem:[%s1330_s26 + $0x200] sm:$0xff] }
  0x1d   : > { %174 = vst [vmem:[%s1335_s27 + $0x50] sm:$0xff] %v173_v10  ;;  %v219_v33 = vld [vmem:[%s1330_s26 + $0x208] sm:$0xff]  ;;  %v221_v34 = vld [vmem:[%s1330_s26 + $0x210] sm:$0xff]  ;;  %v223_v35 = vld [vmem:[%s1330_s26 + $0x218] sm:$0xff] }
  0x1e   : > { %176 = vst [vmem:[%s1335_s27 + $0x58] sm:$0xff] %v175_v11  ;;  %v225_v36 = vld [vmem:[%s1330_s26 + $0x240] sm:$0xff]  ;;  %v227_v37 = vld [vmem:[%s1330_s26 + $0x248] sm:$0xff]  ;;  %v229_v38 = vld [vmem:[%s1330_s26 + $0x250] sm:$0xff] }
  0x1f   : > { %178 = vst [vmem:[%s1335_s27 + $0x60] sm:$0xff] %v177_v12  ;;  %v231_v39 = vld [vmem:[%s1330_s26 + $0x258] sm:$0xff]  ;;  %v233_v40 = vld [vmem:[%s1330_s26 + $0x280] sm:$0xff]  ;;  %v235_v41 = vld [vmem:[%s1330_s26 + $0x288] sm:$0xff] }
  0x20   : > { %180 = vst [vmem:[%s1335_s27 + $0x68] sm:$0xff] %v179_v13  ;;  %v237_v42 = vld [vmem:[%s1330_s26 + $0x290] sm:$0xff]  ;;  %v239_v43 = vld [vmem:[%s1330_s26 + $0x298] sm:$0xff]  ;;  %v241_v44 = vld [vmem:[%s1330_s26 + $0x2c0] sm:$0xff] }
  0x21   : > { %182 = vst [vmem:[%s1335_s27 + $0x70] sm:$0xff] %v181_v14  ;;  %v243_v45 = vld [vmem:[%s1330_s26 + $0x2c8] sm:$0xff]  ;;  %v245_v46 = vld [vmem:[%s1330_s26 + $0x2d0] sm:$0xff]  ;;  %v247_v47 = vld [vmem:[%s1330_s26 + $0x2d8] sm:$0xff] }
  0x22   : > { %184 = vst [vmem:[%s1335_s27 + $0x78] sm:$0xff] %v183_v15  ;;  %v249_v48 = vld [vmem:[%s1330_s26 + $0x300] sm:$0xff]  ;;  %v251_v49 = vld [vmem:[%s1330_s26 + $0x308] sm:$0xff]  ;;  %v253_v50 = vld [vmem:[%s1330_s26 + $0x310] sm:$0xff] }
  0x23   : > { %186 = vst [vmem:[%s1335_s27 + $0x80] sm:$0xff] %v185_v16  ;;  %v255_v51 = vld [vmem:[%s1330_s26 + $0x318] sm:$0xff]  ;;  %v257_v52 = vld [vmem:[%s1330_s26 + $0x340] sm:$0xff]  ;;  %v259_v53 = vld [vmem:[%s1330_s26 + $0x348] sm:$0xff] }
  0x24   : > { %188 = vst [vmem:[%s1335_s27 + $0x88] sm:$0xff] %v187_v17  ;;  %v261_v54 = vld [vmem:[%s1330_s26 + $0x350] sm:$0xff]  ;;  %v263_v55 = vld [vmem:[%s1330_s26 + $0x358] sm:$0xff]  ;;  %v265_v56 = vld [vmem:[%s1330_s26 + $0x380] sm:$0xff] }
  0x25   : > { %190 = vst [vmem:[%s1335_s27 + $0x90] sm:$0xff] %v189_v18  ;;  %v267_v57 = vld [vmem:[%s1330_s26 + $0x388] sm:$0xff]  ;;  %v269_v58 = vld [vmem:[%s1330_s26 + $0x390] sm:$0xff]  ;;  %v271_v59 = vld [vmem:[%s1330_s26 + $0x398] sm:$0xff] }
  0x26   : > { %192 = vst [vmem:[%s1335_s27 + $0x98] sm:$0xff] %v191_v19  ;;  %v273_v60 = vld [vmem:[%s1330_s26 + $0x3c0] sm:$0xff]  ;;  %v275_v61 = vld [vmem:[%s1330_s26 + $0x3c8] sm:$0xff]  ;;  %v277_v62 = vld [vmem:[%s1330_s26 + $0x3d0] sm:$0xff] }
  0x27   : > { %194 = vst [vmem:[%s1335_s27 + $0xa0] sm:$0xff] %v193_v20  ;;  %v279_v63 = vld [vmem:[%s1330_s26 + $0x3d8] sm:$0xff]  ;;  %v281_v0 = vld [vmem:[%s1330_s26 + $0x400] sm:$0xff]  ;;  %v283_v1 = vld [vmem:[%s1330_s26 + $0x408] sm:$0xff] }
  0x28   : > { %196 = vst [vmem:[%s1335_s27 + $0xa8] sm:$0xff] %v195_v21  ;;  %v285_v2 = vld [vmem:[%s1330_s26 + $0x410] sm:$0xff]  ;;  %v287_v3 = vld [vmem:[%s1330_s26 + $0x418] sm:$0xff]  ;;  %v289_v4 = vld [vmem:[%s1330_s26 + $0x440] sm:$0xff] }
  0x29   : > { %198 = vst [vmem:[%s1335_s27 + $0xb0] sm:$0xff] %v197_v22  ;;  %v291_v5 = vld [vmem:[%s1330_s26 + $0x448] sm:$0xff]  ;;  %v293_v6 = vld [vmem:[%s1330_s26 + $0x450] sm:$0xff]  ;;  %v295_v7 = vld [vmem:[%s1330_s26 + $0x458] sm:$0xff] }
  0x2a   : > { %200 = vst [vmem:[%s1335_s27 + $0xb8] sm:$0xff] %v199_v23  ;;  %v297_v8 = vld [vmem:[%s1330_s26 + $0x480] sm:$0xff]  ;;  %v299_v9 = vld [vmem:[%s1330_s26 + $0x488] sm:$0xff]  ;;  %v301_v10 = vld [vmem:[%s1330_s26 + $0x490] sm:$0xff] }
  0x2b   : > { %202 = vst [vmem:[%s1335_s27 + $0xc0] sm:$0xff] %v201_v24  ;;  %v303_v11 = vld [vmem:[%s1330_s26 + $0x498] sm:$0xff]  ;;  %v305_v12 = vld [vmem:[%s1330_s26 + $0x4c0] sm:$0xff]  ;;  %v307_v13 = vld [vmem:[%s1330_s26 + $0x4c8] sm:$0xff] }
  0x2c   : > { %204 = vst [vmem:[%s1335_s27 + $0xc8] sm:$0xff] %v203_v25  ;;  %v309_v14 = vld [vmem:[%s1330_s26 + $0x4d0] sm:$0xff]  ;;  %v311_v15 = vld [vmem:[%s1330_s26 + $0x4d8] sm:$0xff]  ;;  %v313_v16 = vld [vmem:[%s1330_s26 + $0x500] sm:$0xff] }
  0x2d   : > { %206 = vst [vmem:[%s1335_s27 + $0xd0] sm:$0xff] %v205_v26  ;;  %v315_v17 = vld [vmem:[%s1330_s26 + $0x508] sm:$0xff]  ;;  %v317_v18 = vld [vmem:[%s1330_s26 + $0x510] sm:$0xff]  ;;  %v319_v19 = vld [vmem:[%s1330_s26 + $0x518] sm:$0xff] }
  0x2e   : > { %208 = vst [vmem:[%s1335_s27 + $0xd8] sm:$0xff] %v207_v27  ;;  %v321_v20 = vld [vmem:[%s1330_s26 + $0x540] sm:$0xff]  ;;  %v323_v21 = vld [vmem:[%s1330_s26 + $0x548] sm:$0xff]  ;;  %v325_v22 = vld [vmem:[%s1330_s26 + $0x550] sm:$0xff] }
  0x2f   : > { %210 = vst [vmem:[%s1335_s27 + $0xe0] sm:$0xff] %v209_v28  ;;  %v327_v23 = vld [vmem:[%s1330_s26 + $0x558] sm:$0xff]  ;;  %v329_v24 = vld [vmem:[%s1330_s26 + $0x580] sm:$0xff]  ;;  %v331_v25 = vld [vmem:[%s1330_s26 + $0x588] sm:$0xff] }
  0x30   : > { %212 = vst [vmem:[%s1335_s27 + $0xe8] sm:$0xff] %v211_v29  ;;  %v333_v26 = vld [vmem:[%s1330_s26 + $0x590] sm:$0xff]  ;;  %v335_v27 = vld [vmem:[%s1330_s26 + $0x598] sm:$0xff]  ;;  %v337_v28 = vld [vmem:[%s1330_s26 + $0x5c0] sm:$0xff] }
  0x31   : > { %214 = vst [vmem:[%s1335_s27 + $0xf0] sm:$0xff] %v213_v30  ;;  %v339_v29 = vld [vmem:[%s1330_s26 + $0x5c8] sm:$0xff]  ;;  %v341_v30 = vld [vmem:[%s1330_s26 + $0x5d0] sm:$0xff] }
  0x32   : > { %216 = vst [vmem:[%s1335_s27 + $0xf8] sm:$0xff] %v215_v31  ;;  %v343_v31 = vld [vmem:[%s1330_s26 + $0x5d8] sm:$0xff] }
  0x33   : > { %218 = vst [vmem:[%s1335_s27 + $0x100] sm:$0xff] %v217_v32  ;;  %v345_v32 = vld [vmem:[%s1330_s26 + $0x600] sm:$0xff] }
  0x34   : > { %220 = vst [vmem:[%s1335_s27 + $0x108] sm:$0xff] %v219_v33  ;;  %v347_v33 = vld [vmem:[%s1330_s26 + $0x608] sm:$0xff] }
  0x35   : > { %222 = vst [vmem:[%s1335_s27 + $0x110] sm:$0xff] %v221_v34  ;;  %v349_v34 = vld [vmem:[%s1330_s26 + $0x610] sm:$0xff] }
  0x36   : > { %224 = vst [vmem:[%s1335_s27 + $0x118] sm:$0xff] %v223_v35  ;;  %v351_v35 = vld [vmem:[%s1330_s26 + $0x618] sm:$0xff] }
  0x37   : > { %226 = vst [vmem:[%s1335_s27 + $0x120] sm:$0xff] %v225_v36  ;;  %v353_v36 = vld [vmem:[%s1330_s26 + $0x640] sm:$0xff] }
  0x38   : > { %228 = vst [vmem:[%s1335_s27 + $0x128] sm:$0xff] %v227_v37  ;;  %v355_v37 = vld [vmem:[%s1330_s26 + $0x648] sm:$0xff] }
  0x39   : > { %230 = vst [vmem:[%s1335_s27 + $0x130] sm:$0xff] %v229_v38  ;;  %v357_v38 = vld [vmem:[%s1330_s26 + $0x650] sm:$0xff] }
  0x3a   : > { %232 = vst [vmem:[%s1335_s27 + $0x138] sm:$0xff] %v231_v39  ;;  %v359_v39 = vld [vmem:[%s1330_s26 + $0x658] sm:$0xff] }
  0x3b   : > { %234 = vst [vmem:[%s1335_s27 + $0x140] sm:$0xff] %v233_v40  ;;  %v361_v40 = vld [vmem:[%s1330_s26 + $0x680] sm:$0xff] }
  0x3c   : > { %236 = vst [vmem:[%s1335_s27 + $0x148] sm:$0xff] %v235_v41  ;;  %v363_v41 = vld [vmem:[%s1330_s26 + $0x688] sm:$0xff] }
  0x3d   : > { %238 = vst [vmem:[%s1335_s27 + $0x150] sm:$0xff] %v237_v42  ;;  %v365_v42 = vld [vmem:[%s1330_s26 + $0x690] sm:$0xff] }
  0x3e   : > { %240 = vst [vmem:[%s1335_s27 + $0x158] sm:$0xff] %v239_v43  ;;  %v367_v43 = vld [vmem:[%s1330_s26 + $0x698] sm:$0xff] }
  0x3f   : > { %242 = vst [vmem:[%s1335_s27 + $0x160] sm:$0xff] %v241_v44  ;;  %v369_v44 = vld [vmem:[%s1330_s26 + $0x6c0] sm:$0xff] }
  0x40   : > { %244 = vst [vmem:[%s1335_s27 + $0x168] sm:$0xff] %v243_v45  ;;  %v371_v45 = vld [vmem:[%s1330_s26 + $0x6c8] sm:$0xff] }
  0x41   : > { %246 = vst [vmem:[%s1335_s27 + $0x170] sm:$0xff] %v245_v46  ;;  %v373_v46 = vld [vmem:[%s1330_s26 + $0x6d0] sm:$0xff] }
  0x42   : > { %248 = vst [vmem:[%s1335_s27 + $0x178] sm:$0xff] %v247_v47  ;;  %v375_v47 = vld [vmem:[%s1330_s26 + $0x6d8] sm:$0xff] }
  0x43   : > { %250 = vst [vmem:[%s1335_s27 + $0x180] sm:$0xff] %v249_v48  ;;  %v377_v48 = vld [vmem:[%s1330_s26 + $0x700] sm:$0xff] }
  0x44   : > { %252 = vst [vmem:[%s1335_s27 + $0x188] sm:$0xff] %v251_v49  ;;  %v379_v49 = vld [vmem:[%s1330_s26 + $0x708] sm:$0xff] }
  0x45   : > { %254 = vst [vmem:[%s1335_s27 + $0x190] sm:$0xff] %v253_v50  ;;  %v381_v50 = vld [vmem:[%s1330_s26 + $0x710] sm:$0xff] }
  0x46   : > { %256 = vst [vmem:[%s1335_s27 + $0x198] sm:$0xff] %v255_v51  ;;  %v383_v51 = vld [vmem:[%s1330_s26 + $0x718] sm:$0xff] }
  0x47   : > { %258 = vst [vmem:[%s1335_s27 + $0x1a0] sm:$0xff] %v257_v52  ;;  %v385_v52 = vld [vmem:[%s1330_s26 + $0x740] sm:$0xff] }
  0x48   : > { %260 = vst [vmem:[%s1335_s27 + $0x1a8] sm:$0xff] %v259_v53  ;;  %v387_v53 = vld [vmem:[%s1330_s26 + $0x748] sm:$0xff] }
  0x49   : > { %262 = vst [vmem:[%s1335_s27 + $0x1b0] sm:$0xff] %v261_v54  ;;  %v389_v54 = vld [vmem:[%s1330_s26 + $0x750] sm:$0xff] }
  0x4a   : > { %264 = vst [vmem:[%s1335_s27 + $0x1b8] sm:$0xff] %v263_v55  ;;  %v391_v55 = vld [vmem:[%s1330_s26 + $0x758] sm:$0xff] }
  0x4b   : > { %266 = vst [vmem:[%s1335_s27 + $0x1c0] sm:$0xff] %v265_v56  ;;  %v393_v56 = vld [vmem:[%s1330_s26 + $0x780] sm:$0xff] }
  0x4c   : > { %268 = vst [vmem:[%s1335_s27 + $0x1c8] sm:$0xff] %v267_v57  ;;  %v395_v57 = vld [vmem:[%s1330_s26 + $0x788] sm:$0xff] }
  0x4d   : > { %270 = vst [vmem:[%s1335_s27 + $0x1d0] sm:$0xff] %v269_v58  ;;  %v397_v58 = vld [vmem:[%s1330_s26 + $0x790] sm:$0xff] }
  0x4e   : > { %272 = vst [vmem:[%s1335_s27 + $0x1d8] sm:$0xff] %v271_v59  ;;  %v399_v59 = vld [vmem:[%s1330_s26 + $0x798] sm:$0xff] }
  0x4f   : > { %274 = vst [vmem:[%s1335_s27 + $0x1e0] sm:$0xff] %v273_v60  ;;  %v401_v60 = vld [vmem:[%s1330_s26 + $0x7c0] sm:$0xff] }
  0x50   : > { %276 = vst [vmem:[%s1335_s27 + $0x1e8] sm:$0xff] %v275_v61  ;;  %v403_v61 = vld [vmem:[%s1330_s26 + $0x7c8] sm:$0xff] }
  0x51   : > { %278 = vst [vmem:[%s1335_s27 + $0x1f0] sm:$0xff] %v277_v62  ;;  %v405_v62 = vld [vmem:[%s1330_s26 + $0x7d0] sm:$0xff] }
  0x52   : > { %280 = vst [vmem:[%s1335_s27 + $0x1f8] sm:$0xff] %v279_v63  ;;  %v407_v63 = vld [vmem:[%s1330_s26 + $0x7d8] sm:$0xff] }
  0x53   : > { %282 = vst [vmem:[%s1335_s27 + $0x200] sm:$0xff] %v281_v0  ;;  %v409_v0 = vld [vmem:[%s1330_s26 + $0x800] sm:$0xff] }
  0x54   : > { %284 = vst [vmem:[%s1335_s27 + $0x208] sm:$0xff] %v283_v1  ;;  %v411_v1 = vld [vmem:[%s1330_s26 + $0x808] sm:$0xff] }
  0x55   : > { %286 = vst [vmem:[%s1335_s27 + $0x210] sm:$0xff] %v285_v2  ;;  %v413_v2 = vld [vmem:[%s1330_s26 + $0x810] sm:$0xff] }
  0x56   : > { %288 = vst [vmem:[%s1335_s27 + $0x218] sm:$0xff] %v287_v3  ;;  %v415_v3 = vld [vmem:[%s1330_s26 + $0x818] sm:$0xff] }
  0x57   : > { %290 = vst [vmem:[%s1335_s27 + $0x220] sm:$0xff] %v289_v4  ;;  %v417_v4 = vld [vmem:[%s1330_s26 + $0x840] sm:$0xff] }
  0x58   : > { %292 = vst [vmem:[%s1335_s27 + $0x228] sm:$0xff] %v291_v5  ;;  %v419_v5 = vld [vmem:[%s1330_s26 + $0x848] sm:$0xff] }
  0x59   : > { %294 = vst [vmem:[%s1335_s27 + $0x230] sm:$0xff] %v293_v6  ;;  %v421_v6 = vld [vmem:[%s1330_s26 + $0x850] sm:$0xff] }
  0x5a   : > { %296 = vst [vmem:[%s1335_s27 + $0x238] sm:$0xff] %v295_v7  ;;  %v423_v7 = vld [vmem:[%s1330_s26 + $0x858] sm:$0xff] }
  0x5b   : > { %298 = vst [vmem:[%s1335_s27 + $0x240] sm:$0xff] %v297_v8  ;;  %v425_v8 = vld [vmem:[%s1330_s26 + $0x880] sm:$0xff] }
  0x5c   : > { %300 = vst [vmem:[%s1335_s27 + $0x248] sm:$0xff] %v299_v9  ;;  %v427_v9 = vld [vmem:[%s1330_s26 + $0x888] sm:$0xff] }
  0x5d   : > { %302 = vst [vmem:[%s1335_s27 + $0x250] sm:$0xff] %v301_v10  ;;  %v429_v10 = vld [vmem:[%s1330_s26 + $0x890] sm:$0xff] }
  0x5e   : > { %304 = vst [vmem:[%s1335_s27 + $0x258] sm:$0xff] %v303_v11  ;;  %v431_v11 = vld [vmem:[%s1330_s26 + $0x898] sm:$0xff] }
  0x5f   : > { %306 = vst [vmem:[%s1335_s27 + $0x260] sm:$0xff] %v305_v12  ;;  %v433_v12 = vld [vmem:[%s1330_s26 + $0x8c0] sm:$0xff] }
  0x60   : > { %308 = vst [vmem:[%s1335_s27 + $0x268] sm:$0xff] %v307_v13  ;;  %v435_v13 = vld [vmem:[%s1330_s26 + $0x8c8] sm:$0xff] }
  0x61   : > { %310 = vst [vmem:[%s1335_s27 + $0x270] sm:$0xff] %v309_v14  ;;  %v437_v14 = vld [vmem:[%s1330_s26 + $0x8d0] sm:$0xff] }
  0x62   : > { %312 = vst [vmem:[%s1335_s27 + $0x278] sm:$0xff] %v311_v15  ;;  %v439_v15 = vld [vmem:[%s1330_s26 + $0x8d8] sm:$0xff] }
  0x63   : > { %314 = vst [vmem:[%s1335_s27 + $0x280] sm:$0xff] %v313_v16  ;;  %v441_v16 = vld [vmem:[%s1330_s26 + $0x900] sm:$0xff] }
  0x64   : > { %316 = vst [vmem:[%s1335_s27 + $0x288] sm:$0xff] %v315_v17  ;;  %v443_v17 = vld [vmem:[%s1330_s26 + $0x908] sm:$0xff] }
  0x65   : > { %318 = vst [vmem:[%s1335_s27 + $0x290] sm:$0xff] %v317_v18  ;;  %v445_v18 = vld [vmem:[%s1330_s26 + $0x910] sm:$0xff] }
  0x66   : > { %320 = vst [vmem:[%s1335_s27 + $0x298] sm:$0xff] %v319_v19  ;;  %v447_v19 = vld [vmem:[%s1330_s26 + $0x918] sm:$0xff] }
  0x67   : > { %322 = vst [vmem:[%s1335_s27 + $0x2a0] sm:$0xff] %v321_v20  ;;  %v449_v20 = vld [vmem:[%s1330_s26 + $0x940] sm:$0xff] }
  0x68   : > { %324 = vst [vmem:[%s1335_s27 + $0x2a8] sm:$0xff] %v323_v21  ;;  %v451_v21 = vld [vmem:[%s1330_s26 + $0x948] sm:$0xff] }
  0x69   : > { %326 = vst [vmem:[%s1335_s27 + $0x2b0] sm:$0xff] %v325_v22  ;;  %v453_v22 = vld [vmem:[%s1330_s26 + $0x950] sm:$0xff] }
  0x6a   : > { %328 = vst [vmem:[%s1335_s27 + $0x2b8] sm:$0xff] %v327_v23  ;;  %v455_v23 = vld [vmem:[%s1330_s26 + $0x958] sm:$0xff] }
  0x6b   : > { %330 = vst [vmem:[%s1335_s27 + $0x2c0] sm:$0xff] %v329_v24  ;;  %v457_v24 = vld [vmem:[%s1330_s26 + $0x980] sm:$0xff] }
  0x6c   : > { %332 = vst [vmem:[%s1335_s27 + $0x2c8] sm:$0xff] %v331_v25  ;;  %v459_v25 = vld [vmem:[%s1330_s26 + $0x988] sm:$0xff] }
  0x6d   : > { %334 = vst [vmem:[%s1335_s27 + $0x2d0] sm:$0xff] %v333_v26  ;;  %v461_v26 = vld [vmem:[%s1330_s26 + $0x990] sm:$0xff] }
  0x6e   : > { %336 = vst [vmem:[%s1335_s27 + $0x2d8] sm:$0xff] %v335_v27  ;;  %v463_v27 = vld [vmem:[%s1330_s26 + $0x998] sm:$0xff] }
  0x6f   : > { %338 = vst [vmem:[%s1335_s27 + $0x2e0] sm:$0xff] %v337_v28  ;;  %v465_v28 = vld [vmem:[%s1330_s26 + $0x9c0] sm:$0xff] }
  0x70   : > { %340 = vst [vmem:[%s1335_s27 + $0x2e8] sm:$0xff] %v339_v29  ;;  %v467_v29 = vld [vmem:[%s1330_s26 + $0x9c8] sm:$0xff] }
  0x71   : > { %342 = vst [vmem:[%s1335_s27 + $0x2f0] sm:$0xff] %v341_v30  ;;  %v469_v30 = vld [vmem:[%s1330_s26 + $0x9d0] sm:$0xff] }
  0x72   : > { %344 = vst [vmem:[%s1335_s27 + $0x2f8] sm:$0xff] %v343_v31  ;;  %v471_v31 = vld [vmem:[%s1330_s26 + $0x9d8] sm:$0xff] }
  0x73   : > { %346 = vst [vmem:[%s1335_s27 + $0x300] sm:$0xff] %v345_v32  ;;  %v473_v32 = vld [vmem:[%s1330_s26 + $0xa00] sm:$0xff] }
  0x74   : > { %348 = vst [vmem:[%s1335_s27 + $0x308] sm:$0xff] %v347_v33  ;;  %v475_v33 = vld [vmem:[%s1330_s26 + $0xa08] sm:$0xff] }
  0x75   : > { %350 = vst [vmem:[%s1335_s27 + $0x310] sm:$0xff] %v349_v34  ;;  %v477_v34 = vld [vmem:[%s1330_s26 + $0xa10] sm:$0xff] }
  0x76   : > { %352 = vst [vmem:[%s1335_s27 + $0x318] sm:$0xff] %v351_v35  ;;  %v479_v35 = vld [vmem:[%s1330_s26 + $0xa18] sm:$0xff] }
  0x77   : > { %354 = vst [vmem:[%s1335_s27 + $0x320] sm:$0xff] %v353_v36 }
  0x78   : > { %356 = vst [vmem:[%s1335_s27 + $0x328] sm:$0xff] %v355_v37 }
  0x79   : > { %358 = vst [vmem:[%s1335_s27 + $0x330] sm:$0xff] %v357_v38 }
  0x7a   : > { %360 = vst [vmem:[%s1335_s27 + $0x338] sm:$0xff] %v359_v39 }
  0x7b   : > { %362 = vst [vmem:[%s1335_s27 + $0x340] sm:$0xff] %v361_v40 }
  0x7c   : > { %364 = vst [vmem:[%s1335_s27 + $0x348] sm:$0xff] %v363_v41 }
  0x7d   : > { %366 = vst [vmem:[%s1335_s27 + $0x350] sm:$0xff] %v365_v42 }
  0x7e   : > { %368 = vst [vmem:[%s1335_s27 + $0x358] sm:$0xff] %v367_v43 }
  0x7f   : > { %370 = vst [vmem:[%s1335_s27 + $0x360] sm:$0xff] %v369_v44 }
  0x80   : > { %372 = vst [vmem:[%s1335_s27 + $0x368] sm:$0xff] %v371_v45 }
  0x81   : > { %374 = vst [vmem:[%s1335_s27 + $0x370] sm:$0xff] %v373_v46 }
  0x82   : > { %376 = vst [vmem:[%s1335_s27 + $0x378] sm:$0xff] %v375_v47 }
  0x83   : > { %378 = vst [vmem:[%s1335_s27 + $0x380] sm:$0xff] %v377_v48 }
  0x84   : > { %380 = vst [vmem:[%s1335_s27 + $0x388] sm:$0xff] %v379_v49 }
  0x85   : > { %382 = vst [vmem:[%s1335_s27 + $0x390] sm:$0xff] %v381_v50 }
  0x86   : > { %384 = vst [vmem:[%s1335_s27 + $0x398] sm:$0xff] %v383_v51 }
  0x87   : > { %386 = vst [vmem:[%s1335_s27 + $0x3a0] sm:$0xff] %v385_v52 }
  0x88   : > { %388 = vst [vmem:[%s1335_s27 + $0x3a8] sm:$0xff] %v387_v53 }
  0x89   : > { %390 = vst [vmem:[%s1335_s27 + $0x3b0] sm:$0xff] %v389_v54 }
  0x8a   : > { %392 = vst [vmem:[%s1335_s27 + $0x3b8] sm:$0xff] %v391_v55 }
  0x8b   : > { %394 = vst [vmem:[%s1335_s27 + $0x3c0] sm:$0xff] %v393_v56 }
  0x8c   : > { %396 = vst [vmem:[%s1335_s27 + $0x3c8] sm:$0xff] %v395_v57 }
  0x8d   : > { %398 = vst [vmem:[%s1335_s27 + $0x3d0] sm:$0xff] %v397_v58 }
  0x8e   : > { %400 = vst [vmem:[%s1335_s27 + $0x3d8] sm:$0xff] %v399_v59 }
  0x8f   : > { %402 = vst [vmem:[%s1335_s27 + $0x3e0] sm:$0xff] %v401_v60 }
  0x90   : > { %404 = vst [vmem:[%s1335_s27 + $0x3e8] sm:$0xff] %v403_v61 }
  0x91   : > { %406 = vst [vmem:[%s1335_s27 + $0x3f0] sm:$0xff] %v405_v62 }
  0x92   : > { %408 = vst [vmem:[%s1335_s27 + $0x3f8] sm:$0xff] %v407_v63 }
  0x93   : > { %410 = vst [vmem:[%s1335_s27 + $0x400] sm:$0xff] %v409_v0 }
  0x94   : > { %412 = vst [vmem:[%s1335_s27 + $0x408] sm:$0xff] %v411_v1 }
  0x95   : > { %414 = vst [vmem:[%s1335_s27 + $0x410] sm:$0xff] %v413_v2 }
  0x96   : > { %416 = vst [vmem:[%s1335_s27 + $0x418] sm:$0xff] %v415_v3 }
  0x97   : > { %418 = vst [vmem:[%s1335_s27 + $0x420] sm:$0xff] %v417_v4 }
  0x98   : > { %420 = vst [vmem:[%s1335_s27 + $0x428] sm:$0xff] %v419_v5 }
  0x99   : > { %422 = vst [vmem:[%s1335_s27 + $0x430] sm:$0xff] %v421_v6 }
  0x9a   : > { %424 = vst [vmem:[%s1335_s27 + $0x438] sm:$0xff] %v423_v7 }
  0x9b   : > { %426 = vst [vmem:[%s1335_s27 + $0x440] sm:$0xff] %v425_v8 }
  0x9c   : > { %428 = vst [vmem:[%s1335_s27 + $0x448] sm:$0xff] %v427_v9 }
  0x9d   : > { %430 = vst [vmem:[%s1335_s27 + $0x450] sm:$0xff] %v429_v10 }
  0x9e   : > { %432 = vst [vmem:[%s1335_s27 + $0x458] sm:$0xff] %v431_v11 }
  0x9f   : > { %434 = vst [vmem:[%s1335_s27 + $0x460] sm:$0xff] %v433_v12 }
  0xa0   : > { %436 = vst [vmem:[%s1335_s27 + $0x468] sm:$0xff] %v435_v13 }
  0xa1   : > { %438 = vst [vmem:[%s1335_s27 + $0x470] sm:$0xff] %v437_v14 }
  0xa2   : > { %440 = vst [vmem:[%s1335_s27 + $0x478] sm:$0xff] %v439_v15 }
  0xa3   : > { %442 = vst [vmem:[%s1335_s27 + $0x480] sm:$0xff] %v441_v16 }
  0xa4   : > { %444 = vst [vmem:[%s1335_s27 + $0x488] sm:$0xff] %v443_v17 }
  0xa5   : > { %446 = vst [vmem:[%s1335_s27 + $0x490] sm:$0xff] %v445_v18 }
  0xa6   : > { %448 = vst [vmem:[%s1335_s27 + $0x498] sm:$0xff] %v447_v19 }
  0xa7   : > { %450 = vst [vmem:[%s1335_s27 + $0x4a0] sm:$0xff] %v449_v20 }
  0xa8   : > { %452 = vst [vmem:[%s1335_s27 + $0x4a8] sm:$0xff] %v451_v21 }
  0xa9   : > { %454 = vst [vmem:[%s1335_s27 + $0x4b0] sm:$0xff] %v453_v22 }
  0xaa   : > { %456 = vst [vmem:[%s1335_s27 + $0x4b8] sm:$0xff] %v455_v23 }
  0xab   : > { %458 = vst [vmem:[%s1335_s27 + $0x4c0] sm:$0xff] %v457_v24 }
  0xac   : > { %460 = vst [vmem:[%s1335_s27 + $0x4c8] sm:$0xff] %v459_v25 }
  0xad   : > { %462 = vst [vmem:[%s1335_s27 + $0x4d0] sm:$0xff] %v461_v26 }
  0xae   : > { %464 = vst [vmem:[%s1335_s27 + $0x4d8] sm:$0xff] %v463_v27 }
  0xaf   : > { %466 = vst [vmem:[%s1335_s27 + $0x4e0] sm:$0xff] %v465_v28 }
  0xb0   : > { %468 = vst [vmem:[%s1335_s27 + $0x4e8] sm:$0xff] %v467_v29 }
  0xb1   : > { %470 = vst [vmem:[%s1335_s27 + $0x4f0] sm:$0xff] %v469_v30 }
  0xb2   : > { %472 = vst [vmem:[%s1335_s27 + $0x4f8] sm:$0xff] %v471_v31 }
  0xb3   : > { %474 = vst [vmem:[%s1335_s27 + $0x500] sm:$0xff] %v473_v32 }
  0xb4   : > { %476 = vst [vmem:[%s1335_s27 + $0x508] sm:$0xff] %v475_v33 }
  0xb5   : > { %478 = vst [vmem:[%s1335_s27 + $0x510] sm:$0xff] %v477_v34 }
  0xb6   : > { %480 = vst [vmem:[%s1335_s27 + $0x518] sm:$0xff] %v479_v35 }
  0xb7 PF: > { %p1179_p7 = scmp.ge.s32.totalorder %s1267_s14, 1  ;;  %p485_p8 = scmp.lt.s32.totalorder %s1267_s14, 3 }
  0xb9   : > { %p486_p9 = pnand %p1179_p7, %p485_p8 }
  0xba   : > { %s492_s28 = sand.u32 (!%p486_p9), 1, %s1259_s12   ;;  %p521_p10 = scmp.lt.s32.totalorder (!%p486_p9), %s1305_s15, 1 }
  0xbb   : > { %489 = sbr.rel (%p486_p9) target bundleno = 567 (0x237), region = 47  ;;  %s1180_s22 = sshll.u32 (!%p486_p9), %s492_s28, 6 }
  0xbc   : > { %s1220_s29 = smul.u32 (!%p486_p9), 1312, %s492_s28  ;;  %s1901_s23 = scalar_lea.vmem (!%p486_p9), [#allocation3], %s1180_s22 }
  0xbe   : > { %s1667_s30 = scalar_lea.vmem (!%p486_p9), [#allocation2], %s1220_s29 }
  0xc0   : > { %vm703_vm0 = vcmask 1043456   ;;  %v592_v36 = vld [vmem:[%s1667_s30 + $0x1e0] sm:$0xff]  ;;  %v593_v39 = vld [vmem:[%s1667_s30 + $0x1e8] sm:$0xff]  ;;  %vm696_vm1 = vcmask 556032   ;;  %s522_s12 = scalar_select %p521_p10, %s1305_s15, 1  ;;  %vm1036_vm2 = vcmask 7168  }
  0xc1   : > { %v656_v37 = vld [vmem:[%s1667_s30 + $0x3e0] sm:$0xff]  ;;  %716 = vmatpush.msra.mxu0 %v592_v36  ;;  %785 = vmatpush.msra.mxu3 %v593_v39  ;;  %v589_v43 = vld [vmem:[%s1667_s30 + $0x1c8] sm:$0xff]  ;;  %v658_v39 = vld [vmem:[%s1667_s30 + $0x3f0] sm:$0xff]  ;;  %vm1039_vm3 = vcmask 15360   ;;  %vm1041_vm4 = vcmask 11264   ;;  %s1202_s28 = sshll.u32 (%p1320_p5), %s1305_s15, 5 }
  0xc2   : > { %v692_v38 = vld [vmem:[%s1667_s30 + $0x500] sm:$0xf]  ;;  %739 = vmatpush.msra.mxu1 %v656_v37  ;;  %v585_v47 = vld [vmem:[%s1667_s30 + $0x1a8] sm:$0xff]  ;;  %s1201_s24 = sshll.u32 %s522_s12, 4  ;;  %s1057_s4 = scalar_lea.vmem (%p1320_p5), %s1950_s2, %s1202_s28 }
  0xc3   : > { %v588_v40 = vld [vmem:[%s1667_s30 + $0x1c0] sm:$0xff]  ;;  %1183 = vmatpush.msk.msra.mxu2 %vm703_vm0, %v692_v38  ;;  %786 = vmatpush.msra.mxu3 %v589_v43  ;;  %v581_v51 = vld [vmem:[%s1667_s30 + $0x188] sm:$0xff]  ;;  %v594_v38 = vld [vmem:[%s1667_s30 + $0x1f0] sm:$0xff]  ;;  %s525_s27 = scalar_lea.vmem %s1951_s3, %s1201_s24 }
  0xc4   : > { %v652_v41 = vld [vmem:[%s1667_s30 + $0x3c0] sm:$0xff]  ;;  %717 = vmatpush.msra.mxu0 %v588_v40  ;;  %v577_v55 = vld [vmem:[%s1667_s30 + $0x168] sm:$0xff]  ;;  %v1741_v40 = vld [vmem:[%s1948_s0 + $0x10] sm:$0xff] }
  0xc5   : > { %v688_v42 = vld [vmem:[%s1667_s30 + $0x4e0] sm:$0xff]  ;;  %740 = vmatpush.msra.mxu1 %v652_v41  ;;  %787 = vmatpush.msra.mxu3 %v585_v47  ;;  %v573_v59 = vld [vmem:[%s1667_s30 + $0x148] sm:$0xff]  ;;  %v590_v43 = vld [vmem:[%s1667_s30 + $0x1d0] sm:$0xff] }
  0xc6   : > { %v584_v44 = vld [vmem:[%s1667_s30 + $0x1a0] sm:$0xff]  ;;  %770 = vmatpush.msra.mxu2 %v688_v42  ;;  %v569_v63 = vld [vmem:[%s1667_s30 + $0x128] sm:$0xff]  ;;  %v586_v47 = vld [vmem:[%s1667_s30 + $0x1b0] sm:$0xff] }
  0xc7   : > { %v648_v45 = vld [vmem:[%s1667_s30 + $0x3a0] sm:$0xff]  ;;  %718 = vmatpush.msra.mxu0 %v584_v44  ;;  %788 = vmatpush.msra.mxu3 %v581_v51  ;;  %v565_v3 = vld [vmem:[%s1667_s30 + $0x108] sm:$0xff]  ;;  %v654_v44 = vld [vmem:[%s1667_s30 + $0x3d0] sm:$0xff] }
  0xc8   : > { %v684_v46 = vld [vmem:[%s1667_s30 + $0x4c0] sm:$0xff]  ;;  %741 = vmatpush.msra.mxu1 %v648_v45  ;;  %v561_v7 = vld [vmem:[%s1667_s30 + $0xe8] sm:$0xff]  ;;  %v582_v51 = vld [vmem:[%s1667_s30 + $0x190] sm:$0xff] }
  0xc9   : > { %v580_v48 = vld [vmem:[%s1667_s30 + $0x180] sm:$0xff]  ;;  %771 = vmatpush.msra.mxu2 %v684_v46  ;;  %789 = vmatpush.msra.mxu3 %v577_v55  ;;  %v657_v8 = vld [vmem:[%s1667_s30 + $0x3e8] sm:$0xff] }
  0xca   : > { %v644_v49 = vld [vmem:[%s1667_s30 + $0x380] sm:$0xff]  ;;  %719 = vmatpush.msra.mxu0 %v580_v48  ;;  %v557_v11 = vld [vmem:[%s1667_s30 + $0xc8] sm:$0xff]  ;;  %v650_v48 = vld [vmem:[%s1667_s30 + $0x3b0] sm:$0xff] }
  0xcb   : > { %v680_v50 = vld [vmem:[%s1667_s30 + $0x4a0] sm:$0xff]  ;;  %742 = vmatpush.msra.mxu1 %v644_v49  ;;  %790 = vmatpush.msra.mxu3 %v573_v59  ;;  %v653_v12 = vld [vmem:[%s1667_s30 + $0x3c8] sm:$0xff] }
  0xcc   : > { %v576_v52 = vld [vmem:[%s1667_s30 + $0x160] sm:$0xff]  ;;  %772 = vmatpush.msra.mxu2 %v680_v50  ;;  %v553_v15 = vld [vmem:[%s1667_s30 + $0xa8] sm:$0xff] }
  0xcd   : > { %v640_v53 = vld [vmem:[%s1667_s30 + $0x360] sm:$0xff]  ;;  %720 = vmatpush.msra.mxu0 %v576_v52  ;;  %791 = vmatpush.msra.mxu3 %v569_v63  ;;  %v649_v16 = vld [vmem:[%s1667_s30 + $0x3a8] sm:$0xff]  ;;  %v646_v52 = vld [vmem:[%s1667_s30 + $0x390] sm:$0xff] }
  0xce   : > { %v676_v54 = vld [vmem:[%s1667_s30 + $0x480] sm:$0xff]  ;;  %743 = vmatpush.msra.mxu1 %v640_v53  ;;  %v549_v19 = vld [vmem:[%s1667_s30 + $0x88] sm:$0xff] }
  0xcf   : > { %v572_v56 = vld [vmem:[%s1667_s30 + $0x140] sm:$0xff]  ;;  %773 = vmatpush.msra.mxu2 %v676_v54  ;;  %792 = vmatpush.msra.mxu3 %v565_v3  ;;  %v645_v20 = vld [vmem:[%s1667_s30 + $0x388] sm:$0xff] }
  0xd0   : > { %v636_v57 = vld [vmem:[%s1667_s30 + $0x340] sm:$0xff]  ;;  %721 = vmatpush.msra.mxu0 %v572_v56  ;;  %v545_v23 = vld [vmem:[%s1667_s30 + $0x68] sm:$0xff]  ;;  %v578_v56 = vld [vmem:[%s1667_s30 + $0x170] sm:$0xff] }
  0xd1   : > { %v672_v58 = vld [vmem:[%s1667_s30 + $0x460] sm:$0xff]  ;;  %744 = vmatpush.msra.mxu1 %v636_v57  ;;  %793 = vmatpush.msra.mxu3 %v561_v7  ;;  %v641_v24 = vld [vmem:[%s1667_s30 + $0x368] sm:$0xff]  ;;  %v642_v57 = vld [vmem:[%s1667_s30 + $0x370] sm:$0xff] }
  0xd2   : > { %v568_v60 = vld [vmem:[%s1667_s30 + $0x120] sm:$0xff]  ;;  %774 = vmatpush.msra.mxu2 %v672_v58  ;;  %v541_v27 = vld [vmem:[%s1667_s30 + $0x48] sm:$0xff]  ;;  %v1790_v7 = vld [vmem:[%s1948_s0 + $0x18] sm:$0xf] }
  0xd3   : > { %v632_v61 = vld [vmem:[%s1667_s30 + $0x320] sm:$0xff]  ;;  %722 = vmatpush.msra.mxu0 %v568_v60  ;;  %794 = vmatpush.msra.mxu3 %v557_v11  ;;  %v637_v28 = vld [vmem:[%s1667_s30 + $0x348] sm:$0xff]  ;;  %v626_v11 = vld [vmem:[%s1667_s30 + $0x2f0] sm:$0xff] }
  0xd4   : > { %v668_v62 = vld [vmem:[%s1667_s30 + $0x440] sm:$0xff]  ;;  %745 = vmatpush.msra.mxu1 %v632_v61  ;;  %v537_v31 = vld [vmem:[%s1667_s30 + $0x28] sm:$0xff]  ;;  %v574_v61 = vld [vmem:[%s1667_s30 + $0x150] sm:$0xff] }
  0xd5   : > { %v564_v0 = vld [vmem:[%s1667_s30 + $0x100] sm:$0xff]  ;;  %775 = vmatpush.msra.mxu2 %v668_v62  ;;  %795 = vmatpush.msra.mxu3 %v553_v15  ;;  %v633_v32 = vld [vmem:[%s1667_s30 + $0x328] sm:$0xff]  ;;  %v638_v62 = vld [vmem:[%s1667_s30 + $0x350] sm:$0xff] }
  0xd6   : > { %v628_v1 = vld [vmem:[%s1667_s30 + $0x300] sm:$0xff]  ;;  %723 = vmatpush.msra.mxu0 %v564_v0  ;;  %v533_v35 = vld [vmem:[%s1667_s30 + $0x8] sm:$0xff]  ;;  %v558_v15 = vld [vmem:[%s1667_s30 + $0xd0] sm:$0xff] }
  0xd7   : > { %v664_v2 = vld [vmem:[%s1667_s30 + $0x420] sm:$0xff]  ;;  %746 = vmatpush.msra.mxu1 %v628_v1  ;;  %796 = vmatpush.msra.mxu3 %v549_v19  ;;  %v629_v36 = vld [vmem:[%s1667_s30 + $0x308] sm:$0xff]  ;;  %v570_v1 = vld [vmem:[%s1667_s30 + $0x130] sm:$0xff] }
  0xd8   : > { %v560_v4 = vld [vmem:[%s1667_s30 + $0xe0] sm:$0xff]  ;;  %776 = vmatpush.msra.mxu2 %v664_v2  ;;  %v693_v37 = vld [vmem:[%s1667_s30 + $0x508] sm:$0xf]  ;;  %v634_v2 = vld [vmem:[%s1667_s30 + $0x330] sm:$0xff] }
  0xd9   : > { %v624_v5 = vld [vmem:[%s1667_s30 + $0x2e0] sm:$0xff]  ;;  %724 = vmatpush.msra.mxu0 %v560_v4  ;;  %797 = vmatpush.msra.mxu3 %v545_v23  ;;  %v689_v41 = vld [vmem:[%s1667_s30 + $0x4e8] sm:$0xff]  ;;  %v554_v19 = vld [vmem:[%s1667_s30 + $0xb0] sm:$0xff] }
  0xda   : > { %v660_v6 = vld [vmem:[%s1667_s30 + $0x400] sm:$0xff]  ;;  %747 = vmatpush.msra.mxu1 %v624_v5  ;;  %v625_v42 = vld [vmem:[%s1667_s30 + $0x2e8] sm:$0xff]  ;;  %v566_v5 = vld [vmem:[%s1667_s30 + $0x110] sm:$0xff] }
  0xdb   : > { %v556_v9 = vld [vmem:[%s1667_s30 + $0xc0] sm:$0xff]  ;;  %777 = vmatpush.msra.mxu2 %v660_v6  ;;  %798 = vmatpush.msra.mxu3 %v541_v27  ;;  %v685_v45 = vld [vmem:[%s1667_s30 + $0x4c8] sm:$0xff]  ;;  %v630_v6 = vld [vmem:[%s1667_s30 + $0x310] sm:$0xff] }
  0xdc   : > { %v620_v10 = vld [vmem:[%s1667_s30 + $0x2c0] sm:$0xff]  ;;  %725 = vmatpush.msra.mxu0 %v556_v9  ;;  %1184 = vmatmul.msk.f32.vlgmr.msra.gmra.mxu2 %vm696_vm1, %v1741_v40  ;;  %v621_v46 = vld [vmem:[%s1667_s30 + $0x2c8] sm:$0xff]  ;;  %v550_v23 = vld [vmem:[%s1667_s30 + $0x90] sm:$0xff] }
  0xdd   : > { %v552_v13 = vld [vmem:[%s1667_s30 + $0xa0] sm:$0xff]  ;;  %808 = vmatpush.msrb.mxu2 %v657_v8  ;;  %748 = vmatpush.msra.mxu1 %v620_v10  ;;  %v681_v49 = vld [vmem:[%s1667_s30 + $0x4a8] sm:$0xff]  ;;  %v562_v10 = vld [vmem:[%s1667_s30 + $0xf0] sm:$0xff] }
  0xde   : > { %v616_v14 = vld [vmem:[%s1667_s30 + $0x2a0] sm:$0xff]  ;;  %726 = vmatpush.msra.mxu0 %v552_v13  ;;  %799 = vmatpush.msra.mxu3 %v537_v31  ;;  %v617_v50 = vld [vmem:[%s1667_s30 + $0x2a8] sm:$0xff]  ;;  %v694_v13 = vld [vmem:[%s1667_s30 + $0x510] sm:$0xf] }
  0xdf   : > { %v548_v17 = vld [vmem:[%s1667_s30 + $0x80] sm:$0xff]  ;;  %809 = vmatpush.msrb.mxu2 %v653_v12  ;;  %749 = vmatpush.msra.mxu1 %v616_v14  ;;  %v613_v54 = vld [vmem:[%s1667_s30 + $0x288] sm:$0xff]  ;;  %v595_v14 = vld [vmem:[%s1667_s30 + $0x1f8] sm:$0xff] }
  0xe0   : > { %v612_v18 = vld [vmem:[%s1667_s30 + $0x280] sm:$0xff]  ;;  %727 = vmatpush.msra.mxu0 %v548_v17  ;;  %800 = vmatpush.msra.mxu3 %v533_v35  ;;  %v677_v55 = vld [vmem:[%s1667_s30 + $0x488] sm:$0xff]  ;;  %v690_v17 = vld [vmem:[%s1667_s30 + $0x4f0] sm:$0xff] }
  0xe1   : > { %v544_v21 = vld [vmem:[%s1667_s30 + $0x60] sm:$0xff]  ;;  %810 = vmatpush.msrb.mxu2 %v649_v16  ;;  %750 = vmatpush.msra.mxu1 %v612_v18  ;;  %v1771_v58 = vld [vmem:[%s1948_s0 + $0x28] sm:$0xf]  ;;  %v622_v16 = vld [vmem:[%s1667_s30 + $0x2d0] sm:$0xff] }
  0xe2   : > { %v608_v22 = vld [vmem:[%s1667_s30 + $0x260] sm:$0xff]  ;;  %728 = vmatpush.msra.mxu0 %v544_v21  ;;  %877 = vmatpush.msrb.mxu3 %v658_v39  ;;  %v673_v59 = vld [vmem:[%s1667_s30 + $0x468] sm:$0xff]  ;;  %v591_v18 = vld [vmem:[%s1667_s30 + $0x1d8] sm:$0xff] }
  0xe3   : > { %v540_v25 = vld [vmem:[%s1667_s30 + $0x40] sm:$0xff]  ;;  %811 = vmatpush.msrb.mxu2 %v645_v20  ;;  %751 = vmatpush.msra.mxu1 %v608_v22  ;;  %v609_v60 = vld [vmem:[%s1667_s30 + $0x268] sm:$0xff]  ;;  %v618_v20 = vld [vmem:[%s1667_s30 + $0x2b0] sm:$0xff] }
  0xe4   : > { %v604_v26 = vld [vmem:[%s1667_s30 + $0x240] sm:$0xff]  ;;  %729 = vmatpush.msra.mxu0 %v540_v25  ;;  %878 = vmatpush.msrb.mxu3 %v654_v44  ;;  %v669_v63 = vld [vmem:[%s1667_s30 + $0x448] sm:$0xff]  ;;  %v686_v21 = vld [vmem:[%s1667_s30 + $0x4d0] sm:$0xff] }
  0xe5   : > { %v536_v29 = vld [vmem:[%s1667_s30 + $0x20] sm:$0xff]  ;;  %812 = vmatpush.msrb.mxu2 %v641_v24  ;;  %752 = vmatpush.msra.mxu1 %v604_v26  ;;  %v605_v0 = vld [vmem:[%s1667_s30 + $0x248] sm:$0xff]  ;;  %v587_v22 = vld [vmem:[%s1667_s30 + $0x1b8] sm:$0xff] }
  0xe6   : > { %v600_v30 = vld [vmem:[%s1667_s30 + $0x220] sm:$0xff]  ;;  %730 = vmatpush.msra.mxu0 %v536_v29  ;;  %879 = vmatpush.msrb.mxu3 %v650_v48  ;;  %v665_v3 = vld [vmem:[%s1667_s30 + $0x428] sm:$0xff]  ;;  %v614_v24 = vld [vmem:[%s1667_s30 + $0x290] sm:$0xff] }
  0xe7   : > { %v532_v33 = vld [vmem:[%s1667_s30] sm:$0xff]  ;;  %813 = vmatpush.msrb.mxu2 %v637_v28  ;;  %753 = vmatpush.msra.mxu1 %v600_v30  ;;  %v601_v4 = vld [vmem:[%s1667_s30 + $0x228] sm:$0xff]  ;;  %v682_v25 = vld [vmem:[%s1667_s30 + $0x4b0] sm:$0xff] }
  0xe8   : > { %v596_v34 = vld [vmem:[%s1667_s30 + $0x200] sm:$0xff]  ;;  %731 = vmatpush.msra.mxu0 %v532_v33  ;;  %880 = vmatpush.msrb.mxu3 %v646_v52  ;;  %v597_v8 = vld [vmem:[%s1667_s30 + $0x208] sm:$0xff]  ;;  %v583_v26 = vld [vmem:[%s1667_s30 + $0x198] sm:$0xff] }
  0xe9   : > { %814 = vmatpush.msrb.mxu2 %v633_v32  ;;  %754 = vmatpush.msra.mxu1 %v596_v34  ;;  %v1761_v53 = vld [vmem:[%s1948_s0] sm:$0xff]  ;;  %v661_v9 = vld [vmem:[%s1667_s30 + $0x408] sm:$0xff]  ;;  %v546_v27 = vld [vmem:[%s1667_s30 + $0x70] sm:$0xff] }
  0xea   : > { %1186 = vmatpush.msk.msrb.mxu0 %vm703_vm0, %v693_v37  ;;  %881 = vmatpush.msrb.mxu3 %v642_v57  ;;  %v1800_v12 = vld [vmem:[%s1948_s0 + $0x8] sm:$0xff]  ;;  %v610_v28 = vld [vmem:[%s1667_s30 + $0x270] sm:$0xff]  ;;  %v1827_v29 = vld [vmem:[%s1948_s0 + $0x20] sm:$0xf] }
  0xeb   : > { %815 = vmatpush.msrb.mxu2 %v629_v36  ;;  %854 = vmatpush.msrb.mxu1 %v594_v38  ;;  %v678_v30 = vld [vmem:[%s1667_s30 + $0x490] sm:$0xff]  ;;  %v579_v31 = vld [vmem:[%s1667_s30 + $0x178] sm:$0xff] }
  0xec   : > { %839 = vmatpush.msrb.mxu0 %v689_v41  ;;  %1185 = vmatmul.msk.f32.gmra.mxu2 %vm696_vm1, %v1771_v58  ;;  %v542_v32 = vld [vmem:[%s1667_s30 + $0x50] sm:$0xff]  ;;  %v575_v35 = vld [vmem:[%s1667_s30 + $0x158] sm:$0xff] }
  0xed   : > { %816 = vmatpush.msrb.mxu2 %v625_v42  ;;  %855 = vmatpush.msrb.mxu1 %v590_v43  ;;  %v606_v33 = vld [vmem:[%s1667_s30 + $0x250] sm:$0xff]  ;;  %v571_v39 = vld [vmem:[%s1667_s30 + $0x138] sm:$0xff] }
  0xee   : > { %840 = vmatpush.msrb.mxu0 %v685_v45  ;;  %882 = vmatpush.msrb.mxu3 %v638_v62  ;;  %v674_v34 = vld [vmem:[%s1667_s30 + $0x470] sm:$0xff]  ;;  %v567_v44 = vld [vmem:[%s1667_s30 + $0x118] sm:$0xff] }
  0xef   : > { %817 = vmatpush.msrb.mxu2 %v621_v46  ;;  %856 = vmatpush.msrb.mxu1 %v586_v47  ;;  %v538_v36 = vld [vmem:[%s1667_s30 + $0x30] sm:$0xff]  ;;  %v659_v45 = vld [vmem:[%s1667_s30 + $0x3f8] sm:$0xff] }
  0xf0   : > { %841 = vmatpush.msrb.mxu0 %v681_v49  ;;  %883 = vmatpush.msrb.mxu3 %v634_v2  ;;  %v602_v37 = vld [vmem:[%s1667_s30 + $0x230] sm:$0xff]  ;;  %v695_v47 = vld [vmem:[%s1667_s30 + $0x518] sm:$0xf] }
  0xf1   : > { %818 = vmatpush.msrb.mxu2 %v617_v50  ;;  %857 = vmatpush.msrb.mxu1 %v582_v51  ;;  %v670_v38 = vld [vmem:[%s1667_s30 + $0x450] sm:$0xff]  ;;  %v563_v48 = vld [vmem:[%s1667_s30 + $0xf8] sm:$0xff] }
  0xf2   : > { %732 = vmatmul.f32.vlgmr.msra.gmra.mxu0 %v1761_v53  ;;  %884 = vmatpush.msrb.mxu3 %v630_v6  ;;  %v534_v41 = vld [vmem:[%s1667_s30 + $0x10] sm:$0xff]  ;;  %v655_v49 = vld [vmem:[%s1667_s30 + $0x3d8] sm:$0xff] }
  0xf3   : > { %819 = vmatpush.msrb.mxu2 %v613_v54  ;;  %842 = vmatpush.msrb.mxu0 %v677_v55  ;;  %v598_v42 = vld [vmem:[%s1667_s30 + $0x210] sm:$0xff]  ;;  %v691_v50 = vld [vmem:[%s1667_s30 + $0x4f8] sm:$0xff] }
  0xf4   : > { %858 = vmatpush.msrb.mxu1 %v578_v56  ;;  %801 = vmatmul.f32.vlgmr.msra.gmra.mxu3 %v1761_v53  ;;  %v666_v43 = vld [vmem:[%s1667_s30 + $0x430] sm:$0xff]  ;;  %v559_v51 = vld [vmem:[%s1667_s30 + $0xd8] sm:$0xff] }
  0xf5   : > { %843 = vmatpush.msrb.mxu0 %v673_v59  ;;  %820 = vmatpush.msrb.mxu2 %v609_v60  ;;  %v662_v46 = vld [vmem:[%s1667_s30 + $0x410] sm:$0xff]  ;;  %v651_v52 = vld [vmem:[%s1667_s30 + $0x3b8] sm:$0xff] }
  0xf6   : > { %859 = vmatpush.msrb.mxu1 %v574_v61  ;;  %885 = vmatpush.msrb.mxu3 %v626_v11  ;;  %v555_v54 = vld [vmem:[%s1667_s30 + $0xb8] sm:$0xff] }
  0xf7   : > { %844 = vmatpush.msrb.mxu0 %v669_v63  ;;  %821 = vmatpush.msrb.mxu2 %v605_v0  ;;  %v647_v55 = vld [vmem:[%s1667_s30 + $0x398] sm:$0xff] }
  0xf8   : > { %860 = vmatpush.msrb.mxu1 %v570_v1  ;;  %886 = vmatpush.msrb.mxu3 %v622_v16  ;;  %v687_v56 = vld [vmem:[%s1667_s30 + $0x4d8] sm:$0xff] }
  0xf9   : > { %845 = vmatpush.msrb.mxu0 %v665_v3  ;;  %822 = vmatpush.msrb.mxu2 %v601_v4  ;;  %v551_v57 = vld [vmem:[%s1667_s30 + $0x98] sm:$0xff] }
  0xfa   : > { %861 = vmatpush.msrb.mxu1 %v566_v5  ;;  %735 = vmatmul.f32.gmra.mxu0 %v1790_v7  ;;  %v643_v59 = vld [vmem:[%s1667_s30 + $0x378] sm:$0xff] }
  0xfb   : > { %823 = vmatpush.msrb.mxu2 %v597_v8  ;;  %846 = vmatpush.msrb.mxu0 %v661_v9  ;;  %v683_v60 = vld [vmem:[%s1667_s30 + $0x4b8] sm:$0xff] }
  0xfc   : > { %862 = vmatpush.msrb.mxu1 %v562_v10  ;;  %824 = vmatmul.f32.vlgmr.msrb.gmra.mxu2 %v1800_v12  ;;  %v547_v61 = vld [vmem:[%s1667_s30 + $0x78] sm:$0xff] }
  0xfd   : > { %755 = vmatmul.f32.vlgmr.msra.gmra.mxu1 %v1800_v12  ;;  %1189 = vmatpush.msk.msra.mxu0 %vm703_vm0, %v694_v13  ;;  %v639_v62 = vld [vmem:[%s1667_s30 + $0x358] sm:$0xff] }
  0xfe   : > { %923 = vmatpush.msra.mxu2 %v595_v14  ;;  %863 = vmatpush.msrb.mxu1 %v558_v15  ;;  %v679_v63 = vld [vmem:[%s1667_s30 + $0x498] sm:$0xff] }
  0xff   : > { %908 = vmatpush.msra.mxu0 %v690_v17  ;;  %887 = vmatpush.msrb.mxu3 %v618_v20  ;;  %v543_v0 = vld [vmem:[%s1667_s30 + $0x58] sm:$0xff] }
 0x100   : > { %924 = vmatpush.msra.mxu2 %v591_v18  ;;  %864 = vmatpush.msrb.mxu1 %v554_v19  ;;  %v635_v1 = vld [vmem:[%s1667_s30 + $0x338] sm:$0xff] }
 0x101   : > { %909 = vmatpush.msra.mxu0 %v686_v21  ;;  %888 = vmatpush.msrb.mxu3 %v614_v24  ;;  %v675_v2 = vld [vmem:[%s1667_s30 + $0x478] sm:$0xff] }
 0x102   : > { %925 = vmatpush.msra.mxu2 %v587_v22  ;;  %865 = vmatpush.msrb.mxu1 %v550_v23  ;;  %v539_v3 = vld [vmem:[%s1667_s30 + $0x38] sm:$0xff] }
 0x103   : > { %1187 = vmatmul.msk.f32.vlgmr.msrb.gmra.mxu0 %vm696_vm1, %v1741_v40  ;;  %804 = vmatmul.f32.gmra.mxu3 %v1790_v7  ;;  %v631_v4 = vld [vmem:[%s1667_s30 + $0x318] sm:$0xff] }
 0x104   : > { %910 = vmatpush.msra.mxu0 %v682_v25  ;;  %926 = vmatpush.msra.mxu2 %v583_v26  ;;  %v671_v5 = vld [vmem:[%s1667_s30 + $0x458] sm:$0xff] }
 0x105   : > { %866 = vmatpush.msrb.mxu1 %v546_v27  ;;  %889 = vmatpush.msrb.mxu3 %v610_v28  ;;  %v535_v6 = vld [vmem:[%s1667_s30 + $0x18] sm:$0xff] }
 0x106   : > { %758 = vmatmul.f32.gmra.mxu1 %v1827_v29  ;;  %827 = vmatmul.f32.gmra.mxu2 %v1827_v29  ;;  %v627_v8 = vld [vmem:[%s1667_s30 + $0x2f8] sm:$0xff] }
 0x107   : > { %911 = vmatpush.msra.mxu0 %v678_v30  ;;  %927 = vmatpush.msra.mxu2 %v579_v31  ;;  %v667_v9 = vld [vmem:[%s1667_s30 + $0x438] sm:$0xff] }
 0x108   : > { %867 = vmatpush.msrb.mxu1 %v542_v32  ;;  %890 = vmatpush.msrb.mxu3 %v606_v33  ;;  %v623_v10 = vld [vmem:[%s1667_s30 + $0x2d8] sm:$0xff] }
 0x109   : > { %912 = vmatpush.msra.mxu0 %v674_v34  ;;  %928 = vmatpush.msra.mxu2 %v575_v35  ;;  %v663_v11 = vld [vmem:[%s1667_s30 + $0x418] sm:$0xff] }
 0x10a   : > { %868 = vmatpush.msrb.mxu1 %v538_v36  ;;  %891 = vmatpush.msrb.mxu3 %v602_v37  ;;  %v619_v13 = vld [vmem:[%s1667_s30 + $0x2b8] sm:$0xff] }
 0x10b   : > { %913 = vmatpush.msra.mxu0 %v670_v38  ;;  %929 = vmatpush.msra.mxu2 %v571_v39  ;;  %v615_v14 = vld [vmem:[%s1667_s30 + $0x298] sm:$0xff] }
 0x10c   : > { %869 = vmatpush.msrb.mxu1 %v534_v41  ;;  %892 = vmatpush.msrb.mxu3 %v598_v42  ;;  %v611_v15 = vld [vmem:[%s1667_s30 + $0x278] sm:$0xff] }
 0x10d   : > { %1188 = vmatmul.msk.f32.gmra.mxu0 %vm696_vm1, %v1771_v58  ;;  %893 = vmatmul.f32.vlgmr.msrb.gmra.mxu3 %v1800_v12  ;;  %v607_v16 = vld [vmem:[%s1667_s30 + $0x258] sm:$0xff] }
 0x10e   : > { %914 = vmatpush.msra.mxu0 %v666_v43  ;;  %930 = vmatpush.msra.mxu2 %v567_v44  ;;  %v599_v17 = vld [vmem:[%s1667_s30 + $0x218] sm:$0xff] }
 0x10f   : > { %1203 = vmatpush.msra.mxu1 %v659_v45  ;;  %1192 = vmatpush.msk.msra.mxu3 %vm703_vm0, %v695_v47 }
 0x110   : > { %915 = vmatpush.msra.mxu0 %v662_v46  ;;  %931 = vmatpush.msra.mxu2 %v563_v48 }
 0x111   : > { %1204 = vmatpush.msra.mxu1 %v655_v49  ;;  %977 = vmatpush.msra.mxu3 %v691_v50 }
 0x112   : > { %946 = vmatpush.msrb.mxu0 %v659_v45  ;;  %932 = vmatpush.msra.mxu2 %v559_v51 }
 0x113   : > { %1205 = vmatpush.msra.mxu1 %v651_v52  ;;  %978 = vmatpush.msra.mxu3 %v687_v56 }
 0x114   : > { %947 = vmatpush.msrb.mxu0 %v655_v49  ;;  %870 = vmatmul.f32.vlgmr.msrb.gmra.mxu1 %v1761_v53 }
 0x115   : > { %933 = vmatpush.msra.mxu2 %v555_v54  ;;  %1206 = vmatpush.msra.mxu1 %v647_v55 }
 0x116   : > { %948 = vmatpush.msrb.mxu0 %v651_v52  ;;  %896 = vmatmul.f32.gmra.mxu3 %v1827_v29 }
 0x117   : > { %1190 = vmatmul.msk.f32.vlgmr.msra.gmra.mxu0 %vm696_vm1, %v1741_v40  ;;  %934 = vmatpush.msra.mxu2 %v551_v57 }
 0x118   : > { %1207 = vmatpush.msra.mxu1 %v643_v59  ;;  %979 = vmatpush.msra.mxu3 %v683_v60 }
 0x119   : > { %949 = vmatpush.msrb.mxu0 %v647_v55  ;;  %935 = vmatpush.msra.mxu2 %v547_v61 }
 0x11a   : > { %1208 = vmatpush.msra.mxu1 %v639_v62  ;;  %980 = vmatpush.msra.mxu3 %v679_v63 }
 0x11b   : > { %950 = vmatpush.msrb.mxu0 %v643_v59  ;;  %936 = vmatpush.msra.mxu2 %v543_v0 }
 0x11c   : > { %1209 = vmatpush.msra.mxu1 %v635_v1  ;;  %981 = vmatpush.msra.mxu3 %v675_v2 }
 0x11d   : > { %951 = vmatpush.msrb.mxu0 %v639_v62  ;;  %873 = vmatmul.f32.gmra.mxu1 %v1790_v7 }
 0x11e   : > { %937 = vmatpush.msra.mxu2 %v539_v3  ;;  %1210 = vmatpush.msra.mxu1 %v631_v4 }
 0x11f   : > { %982 = vmatpush.msra.mxu3 %v671_v5  ;;  %952 = vmatpush.msrb.mxu0 %v635_v1 }
 0x120   : > { %938 = vmatpush.msra.mxu2 %v535_v6  ;;  %1191 = vmatmul.msk.f32.gmra.mxu0 %vm696_vm1, %v1771_v58 }
 0x121   : > { %1211 = vmatpush.msra.mxu1 %v627_v8  ;;  %983 = vmatpush.msra.mxu3 %v667_v9 }
 0x122   : > { %939 = vmatmul.f32.vlgmr.msra.gmra.mxu2 %v1761_v53  ;;  %953 = vmatpush.msrb.mxu0 %v631_v4  ;;  %v603_v53 = vld [vmem:[%s1667_s30 + $0x238] sm:$0xff] }
 0x123   : > { %1212 = vmatpush.msra.mxu1 %v623_v10  ;;  %984 = vmatpush.msra.mxu3 %v663_v11 }
 0x124   : > { %954 = vmatpush.msrb.mxu0 %v627_v8  ;;  %1193 = vmatmul.msk.f32.vlgmr.msra.gmra.mxu3 %vm696_vm1, %v1741_v40 }
 0x125   : > { %1213 = vmatpush.msra.mxu1 %v619_v13 }
 0x126   : > { %955 = vmatpush.msrb.mxu0 %v623_v10 }
 0x127   : > { %1214 = vmatpush.msra.mxu1 %v615_v14 }
 0x128   : > { %956 = vmatpush.msrb.mxu0 %v619_v13 }
 0x129   : > { %1215 = vmatpush.msra.mxu1 %v611_v15 }
 0x12a   : > { %942 = vmatmul.f32.gmra.mxu2 %v1790_v7  ;;  %957 = vmatpush.msrb.mxu0 %v615_v14 }
 0x12b   : > { %1216 = vmatpush.msra.mxu1 %v607_v16 }
 0x12c   : > { %958 = vmatpush.msrb.mxu0 %v611_v15  ;;  %1194 = vmatmul.msk.f32.gmra.mxu3 %vm696_vm1, %v1771_v58 }
 0x12d   : > { %1217 = vmatpush.msra.mxu1 %v603_v53 }
 0x12e   : > { %959 = vmatpush.msrb.mxu0 %v607_v16 }
 0x12f   : > { %1218 = vmatpush.msra.mxu1 %v599_v17 }
 0x130   : > { %960 = vmatpush.msrb.mxu0 %v603_v53  ;;  %965 = vmatmul.f32.vlgmr.msra.gmra.mxu1 %v1827_v29 }
 0x132   : > { %961 = vmatpush.msrb.mxu0 %v599_v17 }
 0x133   : > { %962 = vmatmul.f32.vlgmr.msrb.gmra.mxu0 %v1800_v12 }
 0x15f   : > { %v779_v7 = vpop.f32.mrf.mxu2 }
 0x16f   : > { %v733_v40 = vpop.f32.mrf.mxu0  ;;  %v782_v19 = vpop.f32.mrf.mxu2 }
 0x177   : > { %v736_v18 = vpop.f32.mrf.mxu0  ;;  %v802_v58 = vpop.f32.mrf.mxu3 }
 0x17a   : > { %v756_v20 = vpop.f32.mrf.mxu1 }
 0x17b   : > { %v757_v21 = vadd.f32 %v756_v20, %v733_v40 }
 0x17d   : > { %v780_v22 = vadd.f32 %v779_v7, %v757_v21 }
 0x17f   : > { %992 = vst [vmem:[%s1901_s23] sm:$0xff] %v780_v22  ;;  %v825_v23 = vpop.f32.mrf.mxu2  ;;  %v1014_v57 = vmul.f32 %v780_v22, %v780_v22 }
 0x180   : > { %v848_v24 = vpop.f32.mrf.mxu0  ;;  %v826_v12 = vadd.f32 %v825_v23, %v802_v58 }
 0x182   : > { %v849_v25 = vadd.f32 %v848_v24, %v826_v12 }
 0x183   : > { %v759_v26 = vpop.f32.mrf.mxu1 }
 0x184   : > { %v760_v27 = vadd.f32 %v759_v26, %v736_v18  ;;  %993 = vst [vmem:[%s1901_s23 + $0x8] sm:$0xff] %v849_v25  ;;  %v1015_v50 = vmul.f32 %v849_v25, %v849_v25  ;;  %v1000_v56 = vadd.f32 %v849_v25, %v780_v22 }
 0x186   : > { %v783_v28 = vadd.f32 %v782_v19, %v760_v27  ;;  %v805_v29 = vpop.f32.mrf.mxu3  ;;  %v1022_v62 = vadd.f32 %v1015_v50, %v1014_v57  ;;  %v1070_v12 = vld [vmem:[%s1901_s23] sm:$0xff] (%p1320_p5) }
 0x187   : > { %1071 = vst [vmem:[%s1057_s4] sm:$0xff] (%p1320_p5), %v1070_v12 }
 0x188   : > { %996 = vst [vmem:[%s1901_s23 + $0x20] sm:$0xf] %v783_v28  ;;  %v1018_v3 = vmul.f32 %v783_v28, %v783_v28  ;;  %v1005_v8 = vsel %vm703_vm0, %v783_v28, 0.0 }
 0x189   : > { %v828_v30 = vpop.f32.mrf.mxu2 }
 0x18a   : > { %v851_v31 = vpop.f32.mrf.mxu0  ;;  %v829_v32 = vadd.f32 %v828_v30, %v805_v29  ;;  %v1027_v15 = vsel %vm703_vm0, %v1018_v3, 0.0 }
 0x18b   : > { %v1072_v25 = vld [vmem:[%s1901_s23 + $0x8] sm:$0xff] (%p1320_p5) }
 0x18c   : > { %v852_v33 = vadd.f32 %v851_v31, %v829_v32  ;;  %1073 = vst [vmem:[%s1057_s4 + $0x8] sm:$0xff] (%p1320_p5), %v1072_v25 }
 0x18e   : > { %997 = vst [vmem:[%s1901_s23 + $0x28] sm:$0xf] %v852_v33  ;;  %v1019_v63 = vmul.f32 %v852_v33, %v852_v33  ;;  %v1006_v4 = vsel %vm703_vm0, %v852_v33, 0.0 }
 0x18f   : > { %v1007_v13 = vadd.f32 %v1006_v4, %v1005_v8  ;;  %v1078_v28 = vld [vmem:[%s1901_s23 + $0x20] sm:$0xff] (%p1320_p5) }
 0x190   : > { %v894_v35 = vpop.f32.mrf.mxu3  ;;  %v1028_v11 = vsel %vm703_vm0, %v1019_v63, 0.0  ;;  %1079 = vst [vmem:[%s1057_s4 + $0x40] sm:$0xff] (%p1320_p5), %v1078_v28 }
 0x191   : > { %v871_v34 = vpop.f32.mrf.mxu1  ;;  %v1029_v17 = vadd.f32 %v1028_v11, %v1027_v15 }
 0x192   : > { %v895_v36 = vadd.f32 %v894_v35, %v871_v34 }
 0x194   : > { %v917_v37 = vpop.f32.mrf.mxu0 }
 0x195   : > { %v918_v38 = vadd.f32 %v917_v37, %v895_v36  ;;  %v1080_v29 = vld [vmem:[%s1901_s23 + $0x28] sm:$0xff] (%p1320_p5) }
 0x196   : > { %1081 = vst [vmem:[%s1057_s4 + $0x48] sm:$0xff] (%p1320_p5), %v1080_v29 }
 0x197   : > { %994 = vst [vmem:[%s1901_s23 + $0x10] sm:$0xff] %v918_v38  ;;  %v1016_v59 = vmul.f32 %v918_v38, %v918_v38  ;;  %v1001_v61 = vadd.f32 %v1000_v56, %v918_v38 }
 0x199   : > { %v897_v39 = vpop.f32.mrf.mxu3  ;;  %v1023_v2 = vadd.f32 %v1022_v62, %v1016_v59 }
 0x19a   : > { %v874_v41 = vpop.f32.mrf.mxu1 }
 0x19b   : > { %v898_v42 = vadd.f32 %v897_v39, %v874_v41 }
 0x19d   : > { %v920_v43 = vpop.f32.mrf.mxu0 }
 0x19e   : > { %v921_v44 = vadd.f32 %v920_v43, %v898_v42  ;;  %v1074_v26 = vld [vmem:[%s1901_s23 + $0x10] sm:$0xff] (%p1320_p5) }
 0x19f   : > { %1075 = vst [vmem:[%s1057_s4 + $0x10] sm:$0xff] (%p1320_p5), %v1074_v26 }
 0x1a0   : > { %998 = vst [vmem:[%s1901_s23 + $0x30] sm:$0xf] %v921_v44  ;;  %v1020_v5 = vmul.f32 %v921_v44, %v921_v44  ;;  %v1008_v9 = vsel %vm703_vm0, %v921_v44, 0.0 }
 0x1a1   : > { %v1009_v53 = vadd.f32 %v1008_v9, %v1007_v13 }
 0x1a2   : > { %v1030_v16 = vsel %vm703_vm0, %v1020_v5, 0.0 }
 0x1a3   : > { %v1031_v18 = vadd.f32 %v1030_v16, %v1029_v17 }
 0x1a5   : > { %v940_v45 = vpop.f32.mrf.mxu2 }
 0x1a7   : > { %v986_v46 = vpop.f32.mrf.mxu3  ;;  %v1082_v30 = vld [vmem:[%s1901_s23 + $0x30] sm:$0xff] (%p1320_p5) }
 0x1a8   : > { %1083 = vst [vmem:[%s1057_s4 + $0x50] sm:$0xff] (%p1320_p5), %v1082_v30 }
 0x1ad   : > { %v943_v47 = vpop.f32.mrf.mxu2  ;;  %v966_v48 = vpop.f32.mrf.mxu1 }
 0x1ae   : > { %v967_v49 = vadd.f32 %v966_v48, %v943_v47 }
 0x1af   : > { %v989_v51 = vpop.f32.mrf.mxu3 }
 0x1b0   : > { %v990_v52 = vadd.f32 %v989_v51, %v967_v49  ;;  %v963_v54 = vpop.f32.mrf.mxu0 }
 0x1b1   : > { %v964_v55 = vadd.f32 %v963_v54, %v940_v45 }
 0x1b2   : > { %999 = vst [vmem:[%s1901_s23 + $0x38] sm:$0xf] %v990_v52  ;;  %v1021_v10 = vmul.f32 %v990_v52, %v990_v52  ;;  %v1010_v14 = vsel %vm703_vm0, %v990_v52, 0.0 }
 0x1b3   : > { %v987_v60 = vadd.f32 %v986_v46, %v964_v55  ;;  %v1011_v7 = vadd.f32 %v1010_v14, %v1009_v53 }
 0x1b4   : > { %v1032_v40 = vsel %vm703_vm0, %v1021_v10, 0.0 }
 0x1b5   : > { %995 = vst [vmem:[%s1901_s23 + $0x18] sm:$0xff] %v987_v60  ;;  %v1002_v0 = vadd.f32 %v1001_v61, %v987_v60  ;;  %v1017_v1 = vmul.f32 %v987_v60, %v987_v60  ;;  %v1033_v19 = vadd.f32 %v1032_v40, %v1031_v18 }
 0x1b7   : > { %1003 = vadd.xlane.f32.xlu0 %v1002_v0  ;;  %v1024_v6 = vadd.f32 %v1023_v2, %v1017_v1 }
 0x1b9   : > { %1025 = vadd.xlane.f32.xlu1 %v1024_v6  ;;  %v1084_v31 = vld [vmem:[%s1901_s23 + $0x38] sm:$0xff] (%p1320_p5) }
 0x1ba   : > { %1085 = vst [vmem:[%s1057_s4 + $0x58] sm:$0xff] (%p1320_p5), %v1084_v31 }
 0x1bc   : > { %v1076_v27 = vld [vmem:[%s1901_s23 + $0x18] sm:$0xff] (%p1320_p5) }
 0x1bd   : > { %1077 = vst [vmem:[%s1057_s4 + $0x18] sm:$0xff] (%p1320_p5), %v1076_v27 }
 0x1bf   : > { %1012 = vadd.xlane.f32.xlu0 %v1011_v7 }
 0x1c1   : > { %1034 = vadd.xlane.f32.xlu1 %v1033_v19 }
 0x22a   : > { %v1004_v20 = vpop.xlane.xlu0 %1003 }
 0x22c   : > { %v1026_v21 = vpop.xlane.xlu1 %1025 }
 0x22d   : > { %v1037_v22 = vsel %vm1036_vm2, %v1004_v20, %v1026_v21 }
 0x22e   : > { %1040 = vst.msk [vmem:[%s525_s27] sm:$0xff] %vm1039_vm3, %v1037_v22 }
 0x232   : > { %v1013_v58 = vpop.xlane.xlu0 %1012  ;;  %1054 = sbr.rel (!%p1320_p5) target bundleno = 567 (0x237), region = 55 }
 0x234   : > { %v1035_v23 = vpop.xlane.xlu1 %1034 }
 0x235   : > { %v1038_v24 = vsel %vm1036_vm2, %v1013_v58, %v1035_v23 }
 0x236   : > { %1042 = vst.msk [vmem:[%s525_s27 + $0x8] sm:$0xf] %vm1041_vm4, %v1038_v24 }
 0x237 PF: > { %p11_p11 = scmp.ge.s32.totalorder %s1308_s16, 4   ;;  %s1953_s12 = smov %s1263_s13 }
 0x238   : > { %s1954_s13 = smov %s1318_s19  ;;  %s1955_s14 = smov %s1308_s16 }
 0x239   :  { %13 = sbr.rel (!%p11_p11) target bundleno = 2 (0x2), region = 121 }

// kernel: dilated_conv_forward.6
= control target key start
LH: loop header
LB: loop body
LE: loop exit
PB: predicated region body
PF: predicated region fallthrough
CT: control target
= control target key end

     0   :  { %s1184_s12 = smov 0   ;;  %s1186_s13 = smov 0   ;;  %s1782_s0 = inlined_call_operand.vmem [shape: f32[4,324], index: 0, kind: input, shape index: {}]   ;;  %s1783_s1 = inlined_call_operand.vmem [shape: f32[324,1024], index: 1, kind: input, shape index: {}]   ;;  %s1784_s2 = inlined_call_operand.vmem [shape: f32[4,1024], index: 2, kind: output, shape index: {0}]   ;;  %s1785_s3 = inlined_call_operand.vmem [shape: f32[2,4,2], index: 3, kind: output, shape index: {1}]  }
   0x1   :  { %s1188_s14 = smov 0  }
   0x2 LB: > { %s1200_s15 = sadd.s32 4294967295, %s1162_s14   ;;  %s1203_s16 = sadd.s32 1, %s1162_s14   ;;  %s1162_s14 = sphi %s1188_s14, %s1788_s14   ;;  %s1158_s13 = sphi %s1186_s13, %s1787_s13   ;;  %s1154_s12 = sphi %s1184_s12, %s1786_s12  }
   0x3   : > { %s39_s17 = ssub.s32 %s1162_s14, %s1203_s16  ;;  %s42_s18 = sadd.s32 1, %s1158_s13 }
   0x4   : > { %p40_p0 = scmp.eq.s32.totalorder %s39_s17, 0  ;;  %p49_p1 = scmp.ne.s32.totalorder %s1158_s13, %s1154_s12 }
   0x5   : > { %p50_p2 = scmp.eq.s32.totalorder %s1162_s14, 0  ;;  %p1096_p4 = scmp.ge.s32.totalorder %s1162_s14, 2 }
   0x6   : > { %s1212_s19 = scalar_select %p40_p0, %s1158_s13, %s42_s18  }
   0x7   : > { %p51_p3 = por %p50_p2, %p49_p1  ;;  %130 = sbr.rel (%p1096_p4) target bundleno = 180 (0xb4), region = 20 }
   0xc   : > { %133 = sbr.rel (!%p51_p3) target bundleno = 180 (0xb4), region = 24  ;;  %s135_s20 = sand.u32 (%p51_p3), 1, %s1158_s13  }
   0xd   : > { %s1113_s21 = sshll.u32 (%p51_p3), %s1162_s14, 5  ;;  %s1114_s22 = smul.u32 (%p51_p3), 1312, %s135_s20 }
   0xe   : > { %s1220_s25 = scalar_lea.vmem (%p51_p3), %s1783_s1, %s1113_s21 }
   0xf   : > { %v153_v0 = vld [vmem:[%s1220_s25] sm:$0xff] (%p51_p3)  ;;  %v155_v1 = vld [vmem:[%s1220_s25 + $0x8] sm:$0xff] (%p51_p3)  ;;  %v157_v2 = vld [vmem:[%s1220_s25 + $0x10] sm:$0xff] (%p51_p3)  ;;  %s1225_s26 = scalar_lea.vmem (%p51_p3), [#allocation2], %s1114_s22 }
  0x10   : > { %154 = vst [vmem:[%s1225_s26] sm:$0xff] (%p51_p3), %v153_v0  ;;  %v159_v3 = vld [vmem:[%s1220_s25 + $0x18] sm:$0xff] (%p51_p3)  ;;  %v161_v4 = vld [vmem:[%s1220_s25 + $0x40] sm:$0xff] (%p51_p3)  ;;  %v163_v5 = vld [vmem:[%s1220_s25 + $0x48] sm:$0xff] (%p51_p3) }
  0x11   : > { %156 = vst [vmem:[%s1225_s26 + $0x8] sm:$0xff] %v155_v1  ;;  %v165_v6 = vld [vmem:[%s1220_s25 + $0x50] sm:$0xff]  ;;  %v167_v7 = vld [vmem:[%s1220_s25 + $0x58] sm:$0xff]  ;;  %v169_v8 = vld [vmem:[%s1220_s25 + $0x80] sm:$0xff] }
  0x12   : > { %158 = vst [vmem:[%s1225_s26 + $0x10] sm:$0xff] %v157_v2  ;;  %v171_v9 = vld [vmem:[%s1220_s25 + $0x88] sm:$0xff]  ;;  %v173_v10 = vld [vmem:[%s1220_s25 + $0x90] sm:$0xff]  ;;  %v175_v11 = vld [vmem:[%s1220_s25 + $0x98] sm:$0xff] }
  0x13   : > { %160 = vst [vmem:[%s1225_s26 + $0x18] sm:$0xff] %v159_v3  ;;  %v177_v12 = vld [vmem:[%s1220_s25 + $0xc0] sm:$0xff]  ;;  %v179_v13 = vld [vmem:[%s1220_s25 + $0xc8] sm:$0xff]  ;;  %v181_v14 = vld [vmem:[%s1220_s25 + $0xd0] sm:$0xff] }
  0x14   : > { %162 = vst [vmem:[%s1225_s26 + $0x20] sm:$0xff] %v161_v4  ;;  %v183_v15 = vld [vmem:[%s1220_s25 + $0xd8] sm:$0xff]  ;;  %v185_v16 = vld [vmem:[%s1220_s25 + $0x100] sm:$0xff]  ;;  %v187_v17 = vld [vmem:[%s1220_s25 + $0x108] sm:$0xff] }
  0x15   : > { %164 = vst [vmem:[%s1225_s26 + $0x28] sm:$0xff] %v163_v5  ;;  %v189_v18 = vld [vmem:[%s1220_s25 + $0x110] sm:$0xff]  ;;  %v191_v19 = vld [vmem:[%s1220_s25 + $0x118] sm:$0xff]  ;;  %v193_v20 = vld [vmem:[%s1220_s25 + $0x140] sm:$0xff] }
  0x16   : > { %166 = vst [vmem:[%s1225_s26 + $0x30] sm:$0xff] %v165_v6  ;;  %v195_v21 = vld [vmem:[%s1220_s25 + $0x148] sm:$0xff]  ;;  %v197_v22 = vld [vmem:[%s1220_s25 + $0x150] sm:$0xff]  ;;  %v199_v23 = vld [vmem:[%s1220_s25 + $0x158] sm:$0xff] }
  0x17   : > { %168 = vst [vmem:[%s1225_s26 + $0x38] sm:$0xff] %v167_v7  ;;  %v201_v24 = vld [vmem:[%s1220_s25 + $0x180] sm:$0xff]  ;;  %v203_v25 = vld [vmem:[%s1220_s25 + $0x188] sm:$0xff]  ;;  %v205_v26 = vld [vmem:[%s1220_s25 + $0x190] sm:$0xff] }
  0x18   : > { %170 = vst [vmem:[%s1225_s26 + $0x40] sm:$0xff] %v169_v8  ;;  %v207_v27 = vld [vmem:[%s1220_s25 + $0x198] sm:$0xff]  ;;  %v209_v28 = vld [vmem:[%s1220_s25 + $0x1c0] sm:$0xff]  ;;  %v211_v29 = vld [vmem:[%s1220_s25 + $0x1c8] sm:$0xff] }
  0x19   : > { %172 = vst [vmem:[%s1225_s26 + $0x48] sm:$0xff] %v171_v9  ;;  %v213_v30 = vld [vmem:[%s1220_s25 + $0x1d0] sm:$0xff]  ;;  %v215_v31 = vld [vmem:[%s1220_s25 + $0x1d8] sm:$0xff]  ;;  %v217_v32 = vld [vmem:[%s1220_s25 + $0x200] sm:$0xff] }
  0x1a   : > { %174 = vst [vmem:[%s1225_s26 + $0x50] sm:$0xff] %v173_v10  ;;  %v219_v33 = vld [vmem:[%s1220_s25 + $0x208] sm:$0xff]  ;;  %v221_v34 = vld [vmem:[%s1220_s25 + $0x210] sm:$0xff]  ;;  %v223_v35 = vld [vmem:[%s1220_s25 + $0x218] sm:$0xff] }
  0x1b   : > { %176 = vst [vmem:[%s1225_s26 + $0x58] sm:$0xff] %v175_v11  ;;  %v225_v36 = vld [vmem:[%s1220_s25 + $0x240] sm:$0xff]  ;;  %v227_v37 = vld [vmem:[%s1220_s25 + $0x248] sm:$0xff]  ;;  %v229_v38 = vld [vmem:[%s1220_s25 + $0x250] sm:$0xff] }
  0x1c   : > { %178 = vst [vmem:[%s1225_s26 + $0x60] sm:$0xff] %v177_v12  ;;  %v231_v39 = vld [vmem:[%s1220_s25 + $0x258] sm:$0xff]  ;;  %v233_v40 = vld [vmem:[%s1220_s25 + $0x280] sm:$0xff]  ;;  %v235_v41 = vld [vmem:[%s1220_s25 + $0x288] sm:$0xff] }
  0x1d   : > { %180 = vst [vmem:[%s1225_s26 + $0x68] sm:$0xff] %v179_v13  ;;  %v237_v42 = vld [vmem:[%s1220_s25 + $0x290] sm:$0xff]  ;;  %v239_v43 = vld [vmem:[%s1220_s25 + $0x298] sm:$0xff]  ;;  %v241_v44 = vld [vmem:[%s1220_s25 + $0x2c0] sm:$0xff] }
  0x1e   : > { %182 = vst [vmem:[%s1225_s26 + $0x70] sm:$0xff] %v181_v14  ;;  %v243_v45 = vld [vmem:[%s1220_s25 + $0x2c8] sm:$0xff]  ;;  %v245_v46 = vld [vmem:[%s1220_s25 + $0x2d0] sm:$0xff]  ;;  %v247_v47 = vld [vmem:[%s1220_s25 + $0x2d8] sm:$0xff] }
  0x1f   : > { %184 = vst [vmem:[%s1225_s26 + $0x78] sm:$0xff] %v183_v15  ;;  %v249_v48 = vld [vmem:[%s1220_s25 + $0x300] sm:$0xff]  ;;  %v251_v49 = vld [vmem:[%s1220_s25 + $0x308] sm:$0xff]  ;;  %v253_v50 = vld [vmem:[%s1220_s25 + $0x310] sm:$0xff] }
  0x20   : > { %186 = vst [vmem:[%s1225_s26 + $0x80] sm:$0xff] %v185_v16  ;;  %v255_v51 = vld [vmem:[%s1220_s25 + $0x318] sm:$0xff]  ;;  %v257_v52 = vld [vmem:[%s1220_s25 + $0x340] sm:$0xff]  ;;  %v259_v53 = vld [vmem:[%s1220_s25 + $0x348] sm:$0xff] }
  0x21   : > { %188 = vst [vmem:[%s1225_s26 + $0x88] sm:$0xff] %v187_v17  ;;  %v261_v54 = vld [vmem:[%s1220_s25 + $0x350] sm:$0xff]  ;;  %v263_v55 = vld [vmem:[%s1220_s25 + $0x358] sm:$0xff]  ;;  %v265_v56 = vld [vmem:[%s1220_s25 + $0x380] sm:$0xff] }
  0x22   : > { %190 = vst [vmem:[%s1225_s26 + $0x90] sm:$0xff] %v189_v18  ;;  %v267_v57 = vld [vmem:[%s1220_s25 + $0x388] sm:$0xff]  ;;  %v269_v58 = vld [vmem:[%s1220_s25 + $0x390] sm:$0xff]  ;;  %v271_v59 = vld [vmem:[%s1220_s25 + $0x398] sm:$0xff] }
  0x23   : > { %192 = vst [vmem:[%s1225_s26 + $0x98] sm:$0xff] %v191_v19  ;;  %v273_v60 = vld [vmem:[%s1220_s25 + $0x3c0] sm:$0xff]  ;;  %v275_v61 = vld [vmem:[%s1220_s25 + $0x3c8] sm:$0xff]  ;;  %v277_v62 = vld [vmem:[%s1220_s25 + $0x3d0] sm:$0xff] }
  0x24   : > { %194 = vst [vmem:[%s1225_s26 + $0xa0] sm:$0xff] %v193_v20  ;;  %v279_v63 = vld [vmem:[%s1220_s25 + $0x3d8] sm:$0xff]  ;;  %v281_v0 = vld [vmem:[%s1220_s25 + $0x400] sm:$0xff]  ;;  %v283_v1 = vld [vmem:[%s1220_s25 + $0x408] sm:$0xff] }
  0x25   : > { %196 = vst [vmem:[%s1225_s26 + $0xa8] sm:$0xff] %v195_v21  ;;  %v285_v2 = vld [vmem:[%s1220_s25 + $0x410] sm:$0xff]  ;;  %v287_v3 = vld [vmem:[%s1220_s25 + $0x418] sm:$0xff]  ;;  %v289_v4 = vld [vmem:[%s1220_s25 + $0x440] sm:$0xff] }
  0x26   : > { %198 = vst [vmem:[%s1225_s26 + $0xb0] sm:$0xff] %v197_v22  ;;  %v291_v5 = vld [vmem:[%s1220_s25 + $0x448] sm:$0xff]  ;;  %v293_v6 = vld [vmem:[%s1220_s25 + $0x450] sm:$0xff]  ;;  %v295_v7 = vld [vmem:[%s1220_s25 + $0x458] sm:$0xff] }
  0x27   : > { %200 = vst [vmem:[%s1225_s26 + $0xb8] sm:$0xff] %v199_v23  ;;  %v297_v8 = vld [vmem:[%s1220_s25 + $0x480] sm:$0xff]  ;;  %v299_v9 = vld [vmem:[%s1220_s25 + $0x488] sm:$0xff]  ;;  %v301_v10 = vld [vmem:[%s1220_s25 + $0x490] sm:$0xff] }
  0x28   : > { %202 = vst [vmem:[%s1225_s26 + $0xc0] sm:$0xff] %v201_v24  ;;  %v303_v11 = vld [vmem:[%s1220_s25 + $0x498] sm:$0xff]  ;;  %v305_v12 = vld [vmem:[%s1220_s25 + $0x4c0] sm:$0xff]  ;;  %v307_v13 = vld [vmem:[%s1220_s25 + $0x4c8] sm:$0xff] }
  0x29   : > { %204 = vst [vmem:[%s1225_s26 + $0xc8] sm:$0xff] %v203_v25  ;;  %v309_v14 = vld [vmem:[%s1220_s25 + $0x4d0] sm:$0xff]  ;;  %v311_v15 = vld [vmem:[%s1220_s25 + $0x4d8] sm:$0xff]  ;;  %v313_v16 = vld [vmem:[%s1220_s25 + $0x500] sm:$0xff] }
  0x2a   : > { %206 = vst [vmem:[%s1225_s26 + $0xd0] sm:$0xff] %v205_v26  ;;  %v315_v17 = vld [vmem:[%s1220_s25 + $0x508] sm:$0xff]  ;;  %v317_v18 = vld [vmem:[%s1220_s25 + $0x510] sm:$0xff]  ;;  %v319_v19 = vld [vmem:[%s1220_s25 + $0x518] sm:$0xff] }
  0x2b   : > { %208 = vst [vmem:[%s1225_s26 + $0xd8] sm:$0xff] %v207_v27  ;;  %v321_v20 = vld [vmem:[%s1220_s25 + $0x540] sm:$0xff]  ;;  %v323_v21 = vld [vmem:[%s1220_s25 + $0x548] sm:$0xff]  ;;  %v325_v22 = vld [vmem:[%s1220_s25 + $0x550] sm:$0xff] }
  0x2c   : > { %210 = vst [vmem:[%s1225_s26 + $0xe0] sm:$0xff] %v209_v28  ;;  %v327_v23 = vld [vmem:[%s1220_s25 + $0x558] sm:$0xff]  ;;  %v329_v24 = vld [vmem:[%s1220_s25 + $0x580] sm:$0xff]  ;;  %v331_v25 = vld [vmem:[%s1220_s25 + $0x588] sm:$0xff] }
  0x2d   : > { %212 = vst [vmem:[%s1225_s26 + $0xe8] sm:$0xff] %v211_v29  ;;  %v333_v26 = vld [vmem:[%s1220_s25 + $0x590] sm:$0xff]  ;;  %v335_v27 = vld [vmem:[%s1220_s25 + $0x598] sm:$0xff]  ;;  %v337_v28 = vld [vmem:[%s1220_s25 + $0x5c0] sm:$0xff] }
  0x2e   : > { %214 = vst [vmem:[%s1225_s26 + $0xf0] sm:$0xff] %v213_v30  ;;  %v339_v29 = vld [vmem:[%s1220_s25 + $0x5c8] sm:$0xff]  ;;  %v341_v30 = vld [vmem:[%s1220_s25 + $0x5d0] sm:$0xff] }
  0x2f   : > { %216 = vst [vmem:[%s1225_s26 + $0xf8] sm:$0xff] %v215_v31  ;;  %v343_v31 = vld [vmem:[%s1220_s25 + $0x5d8] sm:$0xff] }
  0x30   : > { %218 = vst [vmem:[%s1225_s26 + $0x100] sm:$0xff] %v217_v32  ;;  %v345_v32 = vld [vmem:[%s1220_s25 + $0x600] sm:$0xff] }
  0x31   : > { %220 = vst [vmem:[%s1225_s26 + $0x108] sm:$0xff] %v219_v33  ;;  %v347_v33 = vld [vmem:[%s1220_s25 + $0x608] sm:$0xff] }
  0x32   : > { %222 = vst [vmem:[%s1225_s26 + $0x110] sm:$0xff] %v221_v34  ;;  %v349_v34 = vld [vmem:[%s1220_s25 + $0x610] sm:$0xff] }
  0x33   : > { %224 = vst [vmem:[%s1225_s26 + $0x118] sm:$0xff] %v223_v35  ;;  %v351_v35 = vld [vmem:[%s1220_s25 + $0x618] sm:$0xff] }
  0x34   : > { %226 = vst [vmem:[%s1225_s26 + $0x120] sm:$0xff] %v225_v36  ;;  %v353_v36 = vld [vmem:[%s1220_s25 + $0x640] sm:$0xff] }
  0x35   : > { %228 = vst [vmem:[%s1225_s26 + $0x128] sm:$0xff] %v227_v37  ;;  %v355_v37 = vld [vmem:[%s1220_s25 + $0x648] sm:$0xff] }
  0x36   : > { %230 = vst [vmem:[%s1225_s26 + $0x130] sm:$0xff] %v229_v38  ;;  %v357_v38 = vld [vmem:[%s1220_s25 + $0x650] sm:$0xff] }
  0x37   : > { %232 = vst [vmem:[%s1225_s26 + $0x138] sm:$0xff] %v231_v39  ;;  %v359_v39 = vld [vmem:[%s1220_s25 + $0x658] sm:$0xff] }
  0x38   : > { %234 = vst [vmem:[%s1225_s26 + $0x140] sm:$0xff] %v233_v40  ;;  %v361_v40 = vld [vmem:[%s1220_s25 + $0x680] sm:$0xff] }
  0x39   : > { %236 = vst [vmem:[%s1225_s26 + $0x148] sm:$0xff] %v235_v41  ;;  %v363_v41 = vld [vmem:[%s1220_s25 + $0x688] sm:$0xff] }
  0x3a   : > { %238 = vst [vmem:[%s1225_s26 + $0x150] sm:$0xff] %v237_v42  ;;  %v365_v42 = vld [vmem:[%s1220_s25 + $0x690] sm:$0xff] }
  0x3b   : > { %240 = vst [vmem:[%s1225_s26 + $0x158] sm:$0xff] %v239_v43  ;;  %v367_v43 = vld [vmem:[%s1220_s25 + $0x698] sm:$0xff] }
  0x3c   : > { %242 = vst [vmem:[%s1225_s26 + $0x160] sm:$0xff] %v241_v44  ;;  %v369_v44 = vld [vmem:[%s1220_s25 + $0x6c0] sm:$0xff] }
  0x3d   : > { %244 = vst [vmem:[%s1225_s26 + $0x168] sm:$0xff] %v243_v45  ;;  %v371_v45 = vld [vmem:[%s1220_s25 + $0x6c8] sm:$0xff] }
  0x3e   : > { %246 = vst [vmem:[%s1225_s26 + $0x170] sm:$0xff] %v245_v46  ;;  %v373_v46 = vld [vmem:[%s1220_s25 + $0x6d0] sm:$0xff] }
  0x3f   : > { %248 = vst [vmem:[%s1225_s26 + $0x178] sm:$0xff] %v247_v47  ;;  %v375_v47 = vld [vmem:[%s1220_s25 + $0x6d8] sm:$0xff] }
  0x40   : > { %250 = vst [vmem:[%s1225_s26 + $0x180] sm:$0xff] %v249_v48  ;;  %v377_v48 = vld [vmem:[%s1220_s25 + $0x700] sm:$0xff] }
  0x41   : > { %252 = vst [vmem:[%s1225_s26 + $0x188] sm:$0xff] %v251_v49  ;;  %v379_v49 = vld [vmem:[%s1220_s25 + $0x708] sm:$0xff] }
  0x42   : > { %254 = vst [vmem:[%s1225_s26 + $0x190] sm:$0xff] %v253_v50  ;;  %v381_v50 = vld [vmem:[%s1220_s25 + $0x710] sm:$0xff] }
  0x43   : > { %256 = vst [vmem:[%s1225_s26 + $0x198] sm:$0xff] %v255_v51  ;;  %v383_v51 = vld [vmem:[%s1220_s25 + $0x718] sm:$0xff] }
  0x44   : > { %258 = vst [vmem:[%s1225_s26 + $0x1a0] sm:$0xff] %v257_v52  ;;  %v385_v52 = vld [vmem:[%s1220_s25 + $0x740] sm:$0xff] }
  0x45   : > { %260 = vst [vmem:[%s1225_s26 + $0x1a8] sm:$0xff] %v259_v53  ;;  %v387_v53 = vld [vmem:[%s1220_s25 + $0x748] sm:$0xff] }
  0x46   : > { %262 = vst [vmem:[%s1225_s26 + $0x1b0] sm:$0xff] %v261_v54  ;;  %v389_v54 = vld [vmem:[%s1220_s25 + $0x750] sm:$0xff] }
  0x47   : > { %264 = vst [vmem:[%s1225_s26 + $0x1b8] sm:$0xff] %v263_v55  ;;  %v391_v55 = vld [vmem:[%s1220_s25 + $0x758] sm:$0xff] }
  0x48   : > { %266 = vst [vmem:[%s1225_s26 + $0x1c0] sm:$0xff] %v265_v56  ;;  %v393_v56 = vld [vmem:[%s1220_s25 + $0x780] sm:$0xff] }
  0x49   : > { %268 = vst [vmem:[%s1225_s26 + $0x1c8] sm:$0xff] %v267_v57  ;;  %v395_v57 = vld [vmem:[%s1220_s25 + $0x788] sm:$0xff] }
  0x4a   : > { %270 = vst [vmem:[%s1225_s26 + $0x1d0] sm:$0xff] %v269_v58  ;;  %v397_v58 = vld [vmem:[%s1220_s25 + $0x790] sm:$0xff] }
  0x4b   : > { %272 = vst [vmem:[%s1225_s26 + $0x1d8] sm:$0xff] %v271_v59  ;;  %v399_v59 = vld [vmem:[%s1220_s25 + $0x798] sm:$0xff] }
  0x4c   : > { %274 = vst [vmem:[%s1225_s26 + $0x1e0] sm:$0xff] %v273_v60  ;;  %v401_v60 = vld [vmem:[%s1220_s25 + $0x7c0] sm:$0xff] }
  0x4d   : > { %276 = vst [vmem:[%s1225_s26 + $0x1e8] sm:$0xff] %v275_v61  ;;  %v403_v61 = vld [vmem:[%s1220_s25 + $0x7c8] sm:$0xff] }
  0x4e   : > { %278 = vst [vmem:[%s1225_s26 + $0x1f0] sm:$0xff] %v277_v62  ;;  %v405_v62 = vld [vmem:[%s1220_s25 + $0x7d0] sm:$0xff] }
  0x4f   : > { %280 = vst [vmem:[%s1225_s26 + $0x1f8] sm:$0xff] %v279_v63  ;;  %v407_v63 = vld [vmem:[%s1220_s25 + $0x7d8] sm:$0xff] }
  0x50   : > { %282 = vst [vmem:[%s1225_s26 + $0x200] sm:$0xff] %v281_v0  ;;  %v409_v0 = vld [vmem:[%s1220_s25 + $0x800] sm:$0xff] }
  0x51   : > { %284 = vst [vmem:[%s1225_s26 + $0x208] sm:$0xff] %v283_v1  ;;  %v411_v1 = vld [vmem:[%s1220_s25 + $0x808] sm:$0xff] }
  0x52   : > { %286 = vst [vmem:[%s1225_s26 + $0x210] sm:$0xff] %v285_v2  ;;  %v413_v2 = vld [vmem:[%s1220_s25 + $0x810] sm:$0xff] }
  0x53   : > { %288 = vst [vmem:[%s1225_s26 + $0x218] sm:$0xff] %v287_v3  ;;  %v415_v3 = vld [vmem:[%s1220_s25 + $0x818] sm:$0xff] }
  0x54   : > { %290 = vst [vmem:[%s1225_s26 + $0x220] sm:$0xff] %v289_v4  ;;  %v417_v4 = vld [vmem:[%s1220_s25 + $0x840] sm:$0xff] }
  0x55   : > { %292 = vst [vmem:[%s1225_s26 + $0x228] sm:$0xff] %v291_v5  ;;  %v419_v5 = vld [vmem:[%s1220_s25 + $0x848] sm:$0xff] }
  0x56   : > { %294 = vst [vmem:[%s1225_s26 + $0x230] sm:$0xff] %v293_v6  ;;  %v421_v6 = vld [vmem:[%s1220_s25 + $0x850] sm:$0xff] }
  0x57   : > { %296 = vst [vmem:[%s1225_s26 + $0x238] sm:$0xff] %v295_v7  ;;  %v423_v7 = vld [vmem:[%s1220_s25 + $0x858] sm:$0xff] }
  0x58   : > { %298 = vst [vmem:[%s1225_s26 + $0x240] sm:$0xff] %v297_v8  ;;  %v425_v8 = vld [vmem:[%s1220_s25 + $0x880] sm:$0xff] }
  0x59   : > { %300 = vst [vmem:[%s1225_s26 + $0x248] sm:$0xff] %v299_v9  ;;  %v427_v9 = vld [vmem:[%s1220_s25 + $0x888] sm:$0xff] }
  0x5a   : > { %302 = vst [vmem:[%s1225_s26 + $0x250] sm:$0xff] %v301_v10  ;;  %v429_v10 = vld [vmem:[%s1220_s25 + $0x890] sm:$0xff] }
  0x5b   : > { %304 = vst [vmem:[%s1225_s26 + $0x258] sm:$0xff] %v303_v11  ;;  %v431_v11 = vld [vmem:[%s1220_s25 + $0x898] sm:$0xff] }
  0x5c   : > { %306 = vst [vmem:[%s1225_s26 + $0x260] sm:$0xff] %v305_v12  ;;  %v433_v12 = vld [vmem:[%s1220_s25 + $0x8c0] sm:$0xff] }
  0x5d   : > { %308 = vst [vmem:[%s1225_s26 + $0x268] sm:$0xff] %v307_v13  ;;  %v435_v13 = vld [vmem:[%s1220_s25 + $0x8c8] sm:$0xff] }
  0x5e   : > { %310 = vst [vmem:[%s1225_s26 + $0x270] sm:$0xff] %v309_v14  ;;  %v437_v14 = vld [vmem:[%s1220_s25 + $0x8d0] sm:$0xff] }
  0x5f   : > { %312 = vst [vmem:[%s1225_s26 + $0x278] sm:$0xff] %v311_v15  ;;  %v439_v15 = vld [vmem:[%s1220_s25 + $0x8d8] sm:$0xff] }
  0x60   : > { %314 = vst [vmem:[%s1225_s26 + $0x280] sm:$0xff] %v313_v16  ;;  %v441_v16 = vld [vmem:[%s1220_s25 + $0x900] sm:$0xff] }
  0x61   : > { %316 = vst [vmem:[%s1225_s26 + $0x288] sm:$0xff] %v315_v17  ;;  %v443_v17 = vld [vmem:[%s1220_s25 + $0x908] sm:$0xff] }
  0x62   : > { %318 = vst [vmem:[%s1225_s26 + $0x290] sm:$0xff] %v317_v18  ;;  %v445_v18 = vld [vmem:[%s1220_s25 + $0x910] sm:$0xff] }
  0x63   : > { %320 = vst [vmem:[%s1225_s26 + $0x298] sm:$0xff] %v319_v19  ;;  %v447_v19 = vld [vmem:[%s1220_s25 + $0x918] sm:$0xff] }
  0x64   : > { %322 = vst [vmem:[%s1225_s26 + $0x2a0] sm:$0xff] %v321_v20  ;;  %v449_v20 = vld [vmem:[%s1220_s25 + $0x940] sm:$0xff] }
  0x65   : > { %324 = vst [vmem:[%s1225_s26 + $0x2a8] sm:$0xff] %v323_v21  ;;  %v451_v21 = vld [vmem:[%s1220_s25 + $0x948] sm:$0xff] }
  0x66   : > { %326 = vst [vmem:[%s1225_s26 + $0x2b0] sm:$0xff] %v325_v22  ;;  %v453_v22 = vld [vmem:[%s1220_s25 + $0x950] sm:$0xff] }
  0x67   : > { %328 = vst [vmem:[%s1225_s26 + $0x2b8] sm:$0xff] %v327_v23  ;;  %v455_v23 = vld [vmem:[%s1220_s25 + $0x958] sm:$0xff] }
  0x68   : > { %330 = vst [vmem:[%s1225_s26 + $0x2c0] sm:$0xff] %v329_v24  ;;  %v457_v24 = vld [vmem:[%s1220_s25 + $0x980] sm:$0xff] }
  0x69   : > { %332 = vst [vmem:[%s1225_s26 + $0x2c8] sm:$0xff] %v331_v25  ;;  %v459_v25 = vld [vmem:[%s1220_s25 + $0x988] sm:$0xff] }
  0x6a   : > { %334 = vst [vmem:[%s1225_s26 + $0x2d0] sm:$0xff] %v333_v26  ;;  %v461_v26 = vld [vmem:[%s1220_s25 + $0x990] sm:$0xff] }
  0x6b   : > { %336 = vst [vmem:[%s1225_s26 + $0x2d8] sm:$0xff] %v335_v27  ;;  %v463_v27 = vld [vmem:[%s1220_s25 + $0x998] sm:$0xff] }
  0x6c   : > { %338 = vst [vmem:[%s1225_s26 + $0x2e0] sm:$0xff] %v337_v28  ;;  %v465_v28 = vld [vmem:[%s1220_s25 + $0x9c0] sm:$0xff] }
  0x6d   : > { %340 = vst [vmem:[%s1225_s26 + $0x2e8] sm:$0xff] %v339_v29  ;;  %v467_v29 = vld [vmem:[%s1220_s25 + $0x9c8] sm:$0xff] }
  0x6e   : > { %342 = vst [vmem:[%s1225_s26 + $0x2f0] sm:$0xff] %v341_v30  ;;  %v469_v30 = vld [vmem:[%s1220_s25 + $0x9d0] sm:$0xff] }
  0x6f   : > { %344 = vst [vmem:[%s1225_s26 + $0x2f8] sm:$0xff] %v343_v31  ;;  %v471_v31 = vld [vmem:[%s1220_s25 + $0x9d8] sm:$0xff] }
  0x70   : > { %346 = vst [vmem:[%s1225_s26 + $0x300] sm:$0xff] %v345_v32  ;;  %v473_v32 = vld [vmem:[%s1220_s25 + $0xa00] sm:$0xff] }
  0x71   : > { %348 = vst [vmem:[%s1225_s26 + $0x308] sm:$0xff] %v347_v33  ;;  %v475_v33 = vld [vmem:[%s1220_s25 + $0xa08] sm:$0xff] }
  0x72   : > { %350 = vst [vmem:[%s1225_s26 + $0x310] sm:$0xff] %v349_v34  ;;  %v477_v34 = vld [vmem:[%s1220_s25 + $0xa10] sm:$0xff] }
  0x73   : > { %352 = vst [vmem:[%s1225_s26 + $0x318] sm:$0xff] %v351_v35  ;;  %v479_v35 = vld [vmem:[%s1220_s25 + $0xa18] sm:$0xff] }
  0x74   : > { %354 = vst [vmem:[%s1225_s26 + $0x320] sm:$0xff] %v353_v36 }
  0x75   : > { %356 = vst [vmem:[%s1225_s26 + $0x328] sm:$0xff] %v355_v37 }
  0x76   : > { %358 = vst [vmem:[%s1225_s26 + $0x330] sm:$0xff] %v357_v38 }
  0x77   : > { %360 = vst [vmem:[%s1225_s26 + $0x338] sm:$0xff] %v359_v39 }
  0x78   : > { %362 = vst [vmem:[%s1225_s26 + $0x340] sm:$0xff] %v361_v40 }
  0x79   : > { %364 = vst [vmem:[%s1225_s26 + $0x348] sm:$0xff] %v363_v41 }
  0x7a   : > { %366 = vst [vmem:[%s1225_s26 + $0x350] sm:$0xff] %v365_v42 }
  0x7b   : > { %368 = vst [vmem:[%s1225_s26 + $0x358] sm:$0xff] %v367_v43 }
  0x7c   : > { %370 = vst [vmem:[%s1225_s26 + $0x360] sm:$0xff] %v369_v44 }
  0x7d   : > { %372 = vst [vmem:[%s1225_s26 + $0x368] sm:$0xff] %v371_v45 }
  0x7e   : > { %374 = vst [vmem:[%s1225_s26 + $0x370] sm:$0xff] %v373_v46 }
  0x7f   : > { %376 = vst [vmem:[%s1225_s26 + $0x378] sm:$0xff] %v375_v47 }
  0x80   : > { %378 = vst [vmem:[%s1225_s26 + $0x380] sm:$0xff] %v377_v48 }
  0x81   : > { %380 = vst [vmem:[%s1225_s26 + $0x388] sm:$0xff] %v379_v49 }
  0x82   : > { %382 = vst [vmem:[%s1225_s26 + $0x390] sm:$0xff] %v381_v50 }
  0x83   : > { %384 = vst [vmem:[%s1225_s26 + $0x398] sm:$0xff] %v383_v51 }
  0x84   : > { %386 = vst [vmem:[%s1225_s26 + $0x3a0] sm:$0xff] %v385_v52 }
  0x85   : > { %388 = vst [vmem:[%s1225_s26 + $0x3a8] sm:$0xff] %v387_v53 }
  0x86   : > { %390 = vst [vmem:[%s1225_s26 + $0x3b0] sm:$0xff] %v389_v54 }
  0x87   : > { %392 = vst [vmem:[%s1225_s26 + $0x3b8] sm:$0xff] %v391_v55 }
  0x88   : > { %394 = vst [vmem:[%s1225_s26 + $0x3c0] sm:$0xff] %v393_v56 }
  0x89   : > { %396 = vst [vmem:[%s1225_s26 + $0x3c8] sm:$0xff] %v395_v57 }
  0x8a   : > { %398 = vst [vmem:[%s1225_s26 + $0x3d0] sm:$0xff] %v397_v58 }
  0x8b   : > { %400 = vst [vmem:[%s1225_s26 + $0x3d8] sm:$0xff] %v399_v59 }
  0x8c   : > { %402 = vst [vmem:[%s1225_s26 + $0x3e0] sm:$0xff] %v401_v60 }
  0x8d   : > { %404 = vst [vmem:[%s1225_s26 + $0x3e8] sm:$0xff] %v403_v61 }
  0x8e   : > { %406 = vst [vmem:[%s1225_s26 + $0x3f0] sm:$0xff] %v405_v62 }
  0x8f   : > { %408 = vst [vmem:[%s1225_s26 + $0x3f8] sm:$0xff] %v407_v63 }
  0x90   : > { %410 = vst [vmem:[%s1225_s26 + $0x400] sm:$0xff] %v409_v0 }
  0x91   : > { %412 = vst [vmem:[%s1225_s26 + $0x408] sm:$0xff] %v411_v1 }
  0x92   : > { %414 = vst [vmem:[%s1225_s26 + $0x410] sm:$0xff] %v413_v2 }
  0x93   : > { %416 = vst [vmem:[%s1225_s26 + $0x418] sm:$0xff] %v415_v3 }
  0x94   : > { %418 = vst [vmem:[%s1225_s26 + $0x420] sm:$0xff] %v417_v4 }
  0x95   : > { %420 = vst [vmem:[%s1225_s26 + $0x428] sm:$0xff] %v419_v5 }
  0x96   : > { %422 = vst [vmem:[%s1225_s26 + $0x430] sm:$0xff] %v421_v6 }
  0x97   : > { %424 = vst [vmem:[%s1225_s26 + $0x438] sm:$0xff] %v423_v7 }
  0x98   : > { %426 = vst [vmem:[%s1225_s26 + $0x440] sm:$0xff] %v425_v8 }
  0x99   : > { %428 = vst [vmem:[%s1225_s26 + $0x448] sm:$0xff] %v427_v9 }
  0x9a   : > { %430 = vst [vmem:[%s1225_s26 + $0x450] sm:$0xff] %v429_v10 }
  0x9b   : > { %432 = vst [vmem:[%s1225_s26 + $0x458] sm:$0xff] %v431_v11 }
  0x9c   : > { %434 = vst [vmem:[%s1225_s26 + $0x460] sm:$0xff] %v433_v12 }
  0x9d   : > { %436 = vst [vmem:[%s1225_s26 + $0x468] sm:$0xff] %v435_v13 }
  0x9e   : > { %438 = vst [vmem:[%s1225_s26 + $0x470] sm:$0xff] %v437_v14 }
  0x9f   : > { %440 = vst [vmem:[%s1225_s26 + $0x478] sm:$0xff] %v439_v15 }
  0xa0   : > { %442 = vst [vmem:[%s1225_s26 + $0x480] sm:$0xff] %v441_v16 }
  0xa1   : > { %444 = vst [vmem:[%s1225_s26 + $0x488] sm:$0xff] %v443_v17 }
  0xa2   : > { %446 = vst [vmem:[%s1225_s26 + $0x490] sm:$0xff] %v445_v18 }
  0xa3   : > { %448 = vst [vmem:[%s1225_s26 + $0x498] sm:$0xff] %v447_v19 }
  0xa4   : > { %450 = vst [vmem:[%s1225_s26 + $0x4a0] sm:$0xff] %v449_v20 }
  0xa5   : > { %452 = vst [vmem:[%s1225_s26 + $0x4a8] sm:$0xff] %v451_v21 }
  0xa6   : > { %454 = vst [vmem:[%s1225_s26 + $0x4b0] sm:$0xff] %v453_v22 }
  0xa7   : > { %456 = vst [vmem:[%s1225_s26 + $0x4b8] sm:$0xff] %v455_v23 }
  0xa8   : > { %458 = vst [vmem:[%s1225_s26 + $0x4c0] sm:$0xff] %v457_v24 }
  0xa9   : > { %460 = vst [vmem:[%s1225_s26 + $0x4c8] sm:$0xff] %v459_v25 }
  0xaa   : > { %462 = vst [vmem:[%s1225_s26 + $0x4d0] sm:$0xff] %v461_v26 }
  0xab   : > { %464 = vst [vmem:[%s1225_s26 + $0x4d8] sm:$0xff] %v463_v27 }
  0xac   : > { %466 = vst [vmem:[%s1225_s26 + $0x4e0] sm:$0xff] %v465_v28 }
  0xad   : > { %468 = vst [vmem:[%s1225_s26 + $0x4e8] sm:$0xff] %v467_v29 }
  0xae   : > { %470 = vst [vmem:[%s1225_s26 + $0x4f0] sm:$0xff] %v469_v30 }
  0xaf   : > { %472 = vst [vmem:[%s1225_s26 + $0x4f8] sm:$0xff] %v471_v31 }
  0xb0   : > { %474 = vst [vmem:[%s1225_s26 + $0x500] sm:$0xff] %v473_v32 }
  0xb1   : > { %476 = vst [vmem:[%s1225_s26 + $0x508] sm:$0xff] %v475_v33 }
  0xb2   : > { %478 = vst [vmem:[%s1225_s26 + $0x510] sm:$0xff] %v477_v34 }
  0xb3   : > { %480 = vst [vmem:[%s1225_s26 + $0x518] sm:$0xff] %v479_v35 }
  0xb4 PF: > { %p1099_p5 = scmp.ge.s32.totalorder %s1162_s14, 1  ;;  %p485_p6 = scmp.lt.s32.totalorder %s1162_s14, 3 }
  0xb6   : > { %p486_p7 = pnand %p1099_p5, %p485_p6 }
  0xb7   : > { %s492_s27 = sand.u32 (!%p486_p7), 1, %s1154_s12   ;;  %s1100_s7 = sshll.u32 (!%p486_p7), %s1200_s15, 2 }
  0xb8   : > { %489 = sbr.rel (%p486_p7) target bundleno = 553 (0x229), region = 47  ;;  %p521_p8 = scmp.lt.s32.totalorder (!%p486_p7), %s1100_s7, 7 }
  0xb9   : > { %s1115_s28 = smul.u32 (!%p486_p7), 1312, %s492_s27  ;;  %p526_p9 = scmp.lt.s32.totalorder (!%p486_p7), %s1200_s15, 1 }
  0xbb   : > { %s1555_s29 = scalar_lea.vmem (!%p486_p7), [#allocation2], %s1115_s28 }
  0xbd   : > { %vm709_vm0 = vcmask 1043456   ;;  %v656_v36 = vld [vmem:[%s1555_s29 + $0x3e0] sm:$0xff]  ;;  %v593_v37 = vld [vmem:[%s1555_s29 + $0x1e8] sm:$0xff]  ;;  %v594_v33 = vld [vmem:[%s1555_s29 + $0x1f0] sm:$0xff]  ;;  %vm706_vm1 = vcmask 556032   ;;  %s1790_s7 = smov (!%p521_p8, %s1100_s7), 7 }
  0xbe   : > { %v652_v38 = vld [vmem:[%s1555_s29 + $0x3c0] sm:$0xff]  ;;  %742 = vmatpush.msra.mxu1 %v656_v36  ;;  %782 = vmatpush.msra.mxu3 %v593_v37  ;;  %v589_v39 = vld [vmem:[%s1555_s29 + $0x1c8] sm:$0xff]  ;;  %v658_v34 = vld [vmem:[%s1555_s29 + $0x3f0] sm:$0xff]  ;;  %s1101_s8 = sshll.u32 %s1790_s7, 2  ;;  %s1792_s15 = smov (!%p526_p9, %s1200_s15), 1  ;;  %vm996_vm2 = vcmask 7168  }
  0xbf   : > { %v692_v40 = vld [vmem:[%s1555_s29 + $0x500] sm:$0xf]  ;;  %v585_v42 = vld [vmem:[%s1555_s29 + $0x1a8] sm:$0xff]  ;;  %s524_s11 = scalar_lea.vmem %s1784_s2, %s1101_s8  ;;  %s1102_s12 = sshll.u32 %s1792_s15, 2  ;;  %vm998_vm3 = vcmask 11264  }
  0xc0   : > { %v648_v41 = vld [vmem:[%s1555_s29 + $0x3a0] sm:$0xff]  ;;  %1103 = vmatpush.msk.msra.mxu2 %vm709_vm0, %v692_v40  ;;  %743 = vmatpush.msra.mxu1 %v652_v38  ;;  %v581_v47 = vld [vmem:[%s1555_s29 + $0x188] sm:$0xff]  ;;  %v590_v38 = vld [vmem:[%s1555_s29 + $0x1d0] sm:$0xff]  ;;  %s529_s18 = scalar_lea.vmem %s1785_s3, %s1102_s12 }
  0xc1   : > { %v592_v43 = vld [vmem:[%s1555_s29 + $0x1e0] sm:$0xff]  ;;  %783 = vmatpush.msra.mxu3 %v589_v39  ;;  %v577_v52 = vld [vmem:[%s1555_s29 + $0x168] sm:$0xff]  ;;  %v654_v39 = vld [vmem:[%s1555_s29 + $0x3d0] sm:$0xff] }
  0xc2   : > { %v688_v44 = vld [vmem:[%s1555_s29 + $0x4e0] sm:$0xff]  ;;  %722 = vmatpush.msra.mxu0 %v592_v43  ;;  %744 = vmatpush.msra.mxu1 %v648_v41  ;;  %v573_v56 = vld [vmem:[%s1555_s29 + $0x148] sm:$0xff]  ;;  %v650_v43 = vld [vmem:[%s1555_s29 + $0x3b0] sm:$0xff] }
  0xc3   : > { %v588_v45 = vld [vmem:[%s1555_s29 + $0x1c0] sm:$0xff]  ;;  %770 = vmatpush.msra.mxu2 %v688_v44  ;;  %784 = vmatpush.msra.mxu3 %v585_v42  ;;  %v569_v60 = vld [vmem:[%s1555_s29 + $0x128] sm:$0xff]  ;;  %v586_v42 = vld [vmem:[%s1555_s29 + $0x1b0] sm:$0xff] }
  0xc4   : > { %v644_v46 = vld [vmem:[%s1555_s29 + $0x380] sm:$0xff]  ;;  %723 = vmatpush.msra.mxu0 %v588_v45  ;;  %v565_v0 = vld [vmem:[%s1555_s29 + $0x108] sm:$0xff] }
  0xc5   : > { %v684_v48 = vld [vmem:[%s1555_s29 + $0x4c0] sm:$0xff]  ;;  %745 = vmatpush.msra.mxu1 %v644_v46  ;;  %785 = vmatpush.msra.mxu3 %v581_v47  ;;  %v561_v4 = vld [vmem:[%s1555_s29 + $0xe8] sm:$0xff]  ;;  %v530_v46 = vld [vmem:[%s1782_s0] sm:$0xff] }
  0xc6   : > { %v584_v49 = vld [vmem:[%s1555_s29 + $0x1a0] sm:$0xff]  ;;  %771 = vmatpush.msra.mxu2 %v684_v48  ;;  %v557_v8 = vld [vmem:[%s1555_s29 + $0xc8] sm:$0xff]  ;;  %v582_v47 = vld [vmem:[%s1555_s29 + $0x190] sm:$0xff]  ;;  %698 = vst [vmem:[#allocation1] ss:$2 sm:$0xff] %v530_v46 }
  0xc7   : > { %v680_v50 = vld [vmem:[%s1555_s29 + $0x4a0] sm:$0xff]  ;;  %724 = vmatpush.msra.mxu0 %v584_v49  ;;  %786 = vmatpush.msra.mxu3 %v577_v52  ;;  %v657_v10 = vld [vmem:[%s1555_s29 + $0x3e8] sm:$0xff]  ;;  %v646_v48 = vld [vmem:[%s1555_s29 + $0x390] sm:$0xff] }
  0xc8   : > { %v640_v51 = vld [vmem:[%s1555_s29 + $0x360] sm:$0xff]  ;;  %772 = vmatpush.msra.mxu2 %v680_v50  ;;  %v553_v12 = vld [vmem:[%s1555_s29 + $0xa8] sm:$0xff]  ;;  %v642_v52 = vld [vmem:[%s1555_s29 + $0x370] sm:$0xff] }
  0xc9   : > { %v580_v53 = vld [vmem:[%s1555_s29 + $0x180] sm:$0xff]  ;;  %746 = vmatpush.msra.mxu1 %v640_v51  ;;  %787 = vmatpush.msra.mxu3 %v573_v56  ;;  %v653_v14 = vld [vmem:[%s1555_s29 + $0x3c8] sm:$0xff]  ;;  %v578_v51 = vld [vmem:[%s1555_s29 + $0x170] sm:$0xff] }
  0xca   : > { %v676_v54 = vld [vmem:[%s1555_s29 + $0x480] sm:$0xff]  ;;  %725 = vmatpush.msra.mxu0 %v580_v53  ;;  %v549_v16 = vld [vmem:[%s1555_s29 + $0x88] sm:$0xff]  ;;  %v638_v56 = vld [vmem:[%s1555_s29 + $0x350] sm:$0xff] }
  0xcb   : > { %v636_v55 = vld [vmem:[%s1555_s29 + $0x340] sm:$0xff]  ;;  %773 = vmatpush.msra.mxu2 %v676_v54  ;;  %788 = vmatpush.msra.mxu3 %v569_v60  ;;  %v649_v18 = vld [vmem:[%s1555_s29 + $0x3a8] sm:$0xff]  ;;  %v634_v60 = vld [vmem:[%s1555_s29 + $0x330] sm:$0xff] }
  0xcc   : > { %v576_v57 = vld [vmem:[%s1555_s29 + $0x160] sm:$0xff]  ;;  %747 = vmatpush.msra.mxu1 %v636_v55  ;;  %v545_v20 = vld [vmem:[%s1555_s29 + $0x68] sm:$0xff]  ;;  %v574_v55 = vld [vmem:[%s1555_s29 + $0x150] sm:$0xff] }
  0xcd   : > { %v672_v58 = vld [vmem:[%s1555_s29 + $0x460] sm:$0xff]  ;;  %726 = vmatpush.msra.mxu0 %v576_v57  ;;  %789 = vmatpush.msra.mxu3 %v565_v0  ;;  %v645_v22 = vld [vmem:[%s1555_s29 + $0x388] sm:$0xff]  ;;  %v566_v0 = vld [vmem:[%s1555_s29 + $0x110] sm:$0xff] }
  0xce   : > { %v632_v59 = vld [vmem:[%s1555_s29 + $0x320] sm:$0xff]  ;;  %774 = vmatpush.msra.mxu2 %v672_v58  ;;  %v541_v24 = vld [vmem:[%s1555_s29 + $0x48] sm:$0xff]  ;;  %v571_v46 = vld [vmem:[%s1555_s29 + $0x138] sm:$0xff] }
  0xcf   : > { %v572_v61 = vld [vmem:[%s1555_s29 + $0x140] sm:$0xff]  ;;  %748 = vmatpush.msra.mxu1 %v632_v59  ;;  %790 = vmatpush.msra.mxu3 %v561_v4  ;;  %v641_v26 = vld [vmem:[%s1555_s29 + $0x368] sm:$0xff]  ;;  %v570_v59 = vld [vmem:[%s1555_s29 + $0x130] sm:$0xff] }
  0xd0   : > { %v668_v62 = vld [vmem:[%s1555_s29 + $0x440] sm:$0xff]  ;;  %727 = vmatpush.msra.mxu0 %v572_v61  ;;  %v537_v28 = vld [vmem:[%s1555_s29 + $0x28] sm:$0xff]  ;;  %v562_v4 = vld [vmem:[%s1555_s29 + $0xf0] sm:$0xff] }
  0xd1   : > { %v628_v63 = vld [vmem:[%s1555_s29 + $0x300] sm:$0xff]  ;;  %775 = vmatpush.msra.mxu2 %v668_v62  ;;  %791 = vmatpush.msra.mxu3 %v557_v8  ;;  %v637_v30 = vld [vmem:[%s1555_s29 + $0x348] sm:$0xff]  ;;  %v558_v8 = vld [vmem:[%s1555_s29 + $0xd0] sm:$0xff] }
  0xd2   : > { %v568_v1 = vld [vmem:[%s1555_s29 + $0x120] sm:$0xff]  ;;  %749 = vmatpush.msra.mxu1 %v628_v63  ;;  %v533_v32 = vld [vmem:[%s1555_s29 + $0x8] sm:$0xff] }
  0xd3   : > { %v664_v2 = vld [vmem:[%s1555_s29 + $0x420] sm:$0xff]  ;;  %728 = vmatpush.msra.mxu0 %v568_v1  ;;  %792 = vmatpush.msra.mxu3 %v553_v12  ;;  %v633_v37 = vld [vmem:[%s1555_s29 + $0x328] sm:$0xff]  ;;  %v630_v1 = vld [vmem:[%s1555_s29 + $0x310] sm:$0xff] }
  0xd4   : > { %v624_v3 = vld [vmem:[%s1555_s29 + $0x2e0] sm:$0xff]  ;;  %776 = vmatpush.msra.mxu2 %v664_v2  ;;  %v629_v41 = vld [vmem:[%s1555_s29 + $0x308] sm:$0xff]  ;;  %v554_v12 = vld [vmem:[%s1555_s29 + $0xb0] sm:$0xff] }
  0xd5   : > { %v564_v5 = vld [vmem:[%s1555_s29 + $0x100] sm:$0xff]  ;;  %750 = vmatpush.msra.mxu1 %v624_v3  ;;  %793 = vmatpush.msra.mxu3 %v549_v16  ;;  %v693_v44 = vld [vmem:[%s1555_s29 + $0x508] sm:$0xf] }
  0xd6   : > { %v660_v6 = vld [vmem:[%s1555_s29 + $0x400] sm:$0xff]  ;;  %729 = vmatpush.msra.mxu0 %v564_v5  ;;  %v625_v45 = vld [vmem:[%s1555_s29 + $0x2e8] sm:$0xff]  ;;  %v626_v5 = vld [vmem:[%s1555_s29 + $0x2f0] sm:$0xff] }
  0xd7   : > { %v620_v7 = vld [vmem:[%s1555_s29 + $0x2c0] sm:$0xff]  ;;  %777 = vmatpush.msra.mxu2 %v660_v6  ;;  %794 = vmatpush.msra.mxu3 %v545_v20  ;;  %v689_v49 = vld [vmem:[%s1555_s29 + $0x4e8] sm:$0xff]  ;;  %v546_v20 = vld [vmem:[%s1555_s29 + $0x70] sm:$0xff] }
  0xd8   : > { %v560_v9 = vld [vmem:[%s1555_s29 + $0xe0] sm:$0xff]  ;;  %751 = vmatpush.msra.mxu1 %v620_v7  ;;  %v621_v50 = vld [vmem:[%s1555_s29 + $0x2c8] sm:$0xff] }
  0xd9   : > { %v616_v11 = vld [vmem:[%s1555_s29 + $0x2a0] sm:$0xff]  ;;  %730 = vmatpush.msra.mxu0 %v560_v9  ;;  %802 = vmatpush.msrb.mxu2 %v657_v10  ;;  %v685_v53 = vld [vmem:[%s1555_s29 + $0x4c8] sm:$0xff]  ;;  %v622_v9 = vld [vmem:[%s1555_s29 + $0x2d0] sm:$0xff] }
  0xda   : > { %v556_v13 = vld [vmem:[%s1555_s29 + $0xc0] sm:$0xff]  ;;  %752 = vmatpush.msra.mxu1 %v616_v11  ;;  %795 = vmatpush.msra.mxu3 %v541_v24  ;;  %v617_v54 = vld [vmem:[%s1555_s29 + $0x2a8] sm:$0xff]  ;;  %v542_v24 = vld [vmem:[%s1555_s29 + $0x50] sm:$0xff] }
  0xdb   : > { %v612_v15 = vld [vmem:[%s1555_s29 + $0x280] sm:$0xff]  ;;  %731 = vmatpush.msra.mxu0 %v556_v13  ;;  %803 = vmatpush.msrb.mxu2 %v653_v14  ;;  %v681_v57 = vld [vmem:[%s1555_s29 + $0x4a8] sm:$0xff]  ;;  %v618_v13 = vld [vmem:[%s1555_s29 + $0x2b0] sm:$0xff] }
  0xdc   : > { %v552_v17 = vld [vmem:[%s1555_s29 + $0xa0] sm:$0xff]  ;;  %753 = vmatpush.msra.mxu1 %v612_v15  ;;  %796 = vmatpush.msra.mxu3 %v537_v28  ;;  %v613_v58 = vld [vmem:[%s1555_s29 + $0x288] sm:$0xff]  ;;  %v1672_v14 = vld.sshfl [vmem:[#allocation1] sm:$0xff pattern:$0x75316420] }
  0xdd   : > { %v608_v19 = vld [vmem:[%s1555_s29 + $0x260] sm:$0xff]  ;;  %732 = vmatpush.msra.mxu0 %v552_v17  ;;  %804 = vmatpush.msrb.mxu2 %v649_v18  ;;  %v677_v62 = vld [vmem:[%s1555_s29 + $0x488] sm:$0xff]  ;;  %v550_v17 = vld [vmem:[%s1555_s29 + $0x90] sm:$0xff] }
  0xde   : > { %v548_v21 = vld [vmem:[%s1555_s29 + $0x80] sm:$0xff]  ;;  %754 = vmatpush.msra.mxu1 %v608_v19  ;;  %797 = vmatpush.msra.mxu3 %v533_v32  ;;  %v609_v63 = vld [vmem:[%s1555_s29 + $0x268] sm:$0xff]  ;;  %v614_v18 = vld [vmem:[%s1555_s29 + $0x290] sm:$0xff] }
  0xdf   : > { %v604_v23 = vld [vmem:[%s1555_s29 + $0x240] sm:$0xff]  ;;  %733 = vmatpush.msra.mxu0 %v548_v21  ;;  %805 = vmatpush.msrb.mxu2 %v645_v22  ;;  %v673_v2 = vld [vmem:[%s1555_s29 + $0x468] sm:$0xff]  ;;  %v694_v19 = vld [vmem:[%s1555_s29 + $0x510] sm:$0xf] }
  0xe0   : > { %v544_v25 = vld [vmem:[%s1555_s29 + $0x60] sm:$0xff]  ;;  %755 = vmatpush.msra.mxu1 %v604_v23  ;;  %862 = vmatpush.msrb.mxu3 %v658_v34  ;;  %v605_v3 = vld [vmem:[%s1555_s29 + $0x248] sm:$0xff]  ;;  %v595_v21 = vld [vmem:[%s1555_s29 + $0x1f8] sm:$0xff] }
  0xe1   : > { %v600_v27 = vld [vmem:[%s1555_s29 + $0x220] sm:$0xff]  ;;  %734 = vmatpush.msra.mxu0 %v544_v25  ;;  %806 = vmatpush.msrb.mxu2 %v641_v26  ;;  %v669_v6 = vld [vmem:[%s1555_s29 + $0x448] sm:$0xff]  ;;  %v610_v22 = vld [vmem:[%s1555_s29 + $0x270] sm:$0xff] }
  0xe2   : > { %v540_v29 = vld [vmem:[%s1555_s29 + $0x40] sm:$0xff]  ;;  %756 = vmatpush.msra.mxu1 %v600_v27  ;;  %863 = vmatpush.msrb.mxu3 %v654_v39  ;;  %v601_v7 = vld [vmem:[%s1555_s29 + $0x228] sm:$0xff]  ;;  %v690_v23 = vld [vmem:[%s1555_s29 + $0x4f0] sm:$0xff] }
  0xe3   : > { %v596_v31 = vld [vmem:[%s1555_s29 + $0x200] sm:$0xff]  ;;  %735 = vmatpush.msra.mxu0 %v540_v29  ;;  %807 = vmatpush.msrb.mxu2 %v637_v30  ;;  %v665_v10 = vld [vmem:[%s1555_s29 + $0x428] sm:$0xff]  ;;  %v591_v25 = vld [vmem:[%s1555_s29 + $0x1d8] sm:$0xff] }
  0xe4   : > { %v531_v35 = vld [vmem:[%s1782_s0 + $0x8] sm:$0xf]  ;;  %757 = vmatpush.msra.mxu1 %v596_v31  ;;  %864 = vmatpush.msrb.mxu3 %v650_v43  ;;  %v597_v11 = vld [vmem:[%s1555_s29 + $0x208] sm:$0xff]  ;;  %v606_v26 = vld [vmem:[%s1555_s29 + $0x250] sm:$0xff] }
  0xe5   : > { %v536_v36 = vld [vmem:[%s1555_s29 + $0x20] sm:$0xff]  ;;  %700 = vst [vmem:[#allocation1 + $0x10] ss:$2 sm:$0xff] %v531_v35  ;;  %808 = vmatpush.msrb.mxu2 %v633_v37  ;;  %v661_v16 = vld [vmem:[%s1555_s29 + $0x408] sm:$0xff]  ;;  %798 = vmatmul.f32.vlgmr.msra.gmra.mxu3 %v1672_v14  ;;  %v686_v27 = vld [vmem:[%s1555_s29 + $0x4d0] sm:$0xff] }
  0xe6   : > { %842 = vmatpush.msrb.mxu1 %v594_v33  ;;  %v532_v40 = vld [vmem:[%s1555_s29] sm:$0xff]  ;;  %736 = vmatpush.msra.mxu0 %v536_v36  ;;  %v538_v28 = vld [vmem:[%s1555_s29 + $0x30] sm:$0xff]  ;;  %v587_v31 = vld [vmem:[%s1555_s29 + $0x1b8] sm:$0xff] }
  0xe7   : > { %809 = vmatpush.msrb.mxu2 %v629_v41  ;;  %865 = vmatpush.msrb.mxu3 %v646_v48  ;;  %v1674_v15 = vld.sshfl [vmem:[#allocation1 + $0x8] sm:$0xff pattern:$0x75316420]  ;;  %v602_v29 = vld [vmem:[%s1555_s29 + $0x230] sm:$0xff]  ;;  %v583_v35 = vld [vmem:[%s1555_s29 + $0x198] sm:$0xff] }
  0xe8   : > { %843 = vmatpush.msrb.mxu1 %v590_v38  ;;  %737 = vmatpush.msra.mxu0 %v532_v40  ;;  %v682_v30 = vld [vmem:[%s1555_s29 + $0x4b0] sm:$0xff]  ;;  %v659_v36 = vld [vmem:[%s1555_s29 + $0x3f8] sm:$0xff] }
  0xe9   : > { %810 = vmatpush.msrb.mxu2 %v625_v45  ;;  %866 = vmatpush.msrb.mxu3 %v642_v52  ;;  %v534_v32 = vld [vmem:[%s1555_s29 + $0x10] sm:$0xff]  ;;  %v695_v38 = vld [vmem:[%s1555_s29 + $0x518] sm:$0xf] }
  0xea   : > { %844 = vmatpush.msrb.mxu1 %v586_v42  ;;  %1105 = vmatpush.msk.msrb.mxu0 %vm709_vm0, %v693_v44  ;;  %v598_v33 = vld [vmem:[%s1555_s29 + $0x210] sm:$0xff]  ;;  %v579_v39 = vld [vmem:[%s1555_s29 + $0x178] sm:$0xff] }
  0xeb   : > { %811 = vmatpush.msrb.mxu2 %v621_v50  ;;  %867 = vmatpush.msrb.mxu3 %v638_v56  ;;  %v678_v34 = vld [vmem:[%s1555_s29 + $0x490] sm:$0xff]  ;;  %v655_v40 = vld [vmem:[%s1555_s29 + $0x3d8] sm:$0xff] }
  0xec   : > { %845 = vmatpush.msrb.mxu1 %v582_v47  ;;  %830 = vmatpush.msrb.mxu0 %v689_v49  ;;  %v1652_v61 = vld.sshfl [vmem:[#allocation1 + $0x10] sm:$0xff pattern:$0x75316420]  ;;  %v674_v37 = vld [vmem:[%s1555_s29 + $0x470] sm:$0xff]  ;;  %v691_v42 = vld [vmem:[%s1555_s29 + $0x4f8] sm:$0xff] }
  0xed   : > { %812 = vmatpush.msrb.mxu2 %v617_v54  ;;  %868 = vmatpush.msrb.mxu3 %v634_v60  ;;  %v670_v41 = vld [vmem:[%s1555_s29 + $0x450] sm:$0xff]  ;;  %v575_v43 = vld [vmem:[%s1555_s29 + $0x158] sm:$0xff] }
  0xee   : > { %846 = vmatpush.msrb.mxu1 %v578_v51  ;;  %831 = vmatpush.msrb.mxu0 %v685_v53  ;;  %v651_v44 = vld [vmem:[%s1555_s29 + $0x3b8] sm:$0xff]  ;;  %v666_v45 = vld [vmem:[%s1555_s29 + $0x430] sm:$0xff] }
  0xef   : > { %813 = vmatpush.msrb.mxu2 %v613_v58  ;;  %869 = vmatpush.msrb.mxu3 %v630_v1  ;;  %v647_v47 = vld [vmem:[%s1555_s29 + $0x398] sm:$0xff]  ;;  %v662_v48 = vld [vmem:[%s1555_s29 + $0x410] sm:$0xff] }
  0xf0   : > { %847 = vmatpush.msrb.mxu1 %v574_v55  ;;  %832 = vmatpush.msrb.mxu0 %v681_v57  ;;  %v687_v49 = vld [vmem:[%s1555_s29 + $0x4d8] sm:$0xff] }
  0xf1   : > { %1104 = vmatmul.msk.f32.vlgmr.msra.gmra.mxu2 %vm706_vm1, %v1652_v61  ;;  %870 = vmatpush.msrb.mxu3 %v626_v5  ;;  %v567_v50 = vld [vmem:[%s1555_s29 + $0x118] sm:$0xff] }
  0xf2   : > { %848 = vmatpush.msrb.mxu1 %v570_v59  ;;  %833 = vmatpush.msrb.mxu0 %v677_v62  ;;  %v643_v51 = vld [vmem:[%s1555_s29 + $0x378] sm:$0xff] }
  0xf3   : > { %814 = vmatpush.msrb.mxu2 %v609_v63  ;;  %871 = vmatpush.msrb.mxu3 %v622_v9  ;;  %v683_v52 = vld [vmem:[%s1555_s29 + $0x4b8] sm:$0xff] }
  0xf4   : > { %849 = vmatpush.msrb.mxu1 %v566_v0  ;;  %834 = vmatpush.msrb.mxu0 %v673_v2  ;;  %v563_v53 = vld [vmem:[%s1555_s29 + $0xf8] sm:$0xff] }
  0xf5   : > { %815 = vmatpush.msrb.mxu2 %v605_v3  ;;  %872 = vmatpush.msrb.mxu3 %v618_v13  ;;  %v639_v54 = vld [vmem:[%s1555_s29 + $0x358] sm:$0xff] }
  0xf6   : > { %850 = vmatpush.msrb.mxu1 %v562_v4  ;;  %835 = vmatpush.msrb.mxu0 %v669_v6  ;;  %v679_v55 = vld [vmem:[%s1555_s29 + $0x498] sm:$0xff] }
  0xf7   : > { %816 = vmatpush.msrb.mxu2 %v601_v7  ;;  %738 = vmatmul.f32.vlgmr.msra.gmra.mxu0 %v1672_v14  ;;  %v559_v56 = vld [vmem:[%s1555_s29 + $0xd8] sm:$0xff] }
  0xf8   : > { %851 = vmatpush.msrb.mxu1 %v558_v8  ;;  %836 = vmatpush.msrb.mxu0 %v665_v10  ;;  %v635_v57 = vld [vmem:[%s1555_s29 + $0x338] sm:$0xff] }
  0xf9   : > { %817 = vmatpush.msrb.mxu2 %v597_v11  ;;  %873 = vmatpush.msrb.mxu3 %v614_v18  ;;  %v675_v58 = vld [vmem:[%s1555_s29 + $0x478] sm:$0xff] }
  0xfa   : > { %852 = vmatpush.msrb.mxu1 %v554_v12  ;;  %818 = vmatmul.f32.vlgmr.msrb.gmra.mxu2 %v1674_v15  ;;  %v555_v59 = vld [vmem:[%s1555_s29 + $0xb8] sm:$0xff] }
  0xfb   : > { %837 = vmatpush.msrb.mxu0 %v661_v16  ;;  %902 = vmatpush.msra.mxu2 %v595_v21  ;;  %v631_v60 = vld [vmem:[%s1555_s29 + $0x318] sm:$0xff] }
  0xfc   : > { %853 = vmatpush.msrb.mxu1 %v550_v17  ;;  %874 = vmatpush.msrb.mxu3 %v610_v22  ;;  %v671_v62 = vld [vmem:[%s1555_s29 + $0x458] sm:$0xff] }
  0xfd   : > { %1107 = vmatpush.msk.msra.mxu0 %vm709_vm0, %v694_v19  ;;  %903 = vmatpush.msra.mxu2 %v591_v25  ;;  %v551_v63 = vld [vmem:[%s1555_s29 + $0x98] sm:$0xff] }
  0xfe   : > { %854 = vmatpush.msrb.mxu1 %v546_v20  ;;  %875 = vmatpush.msrb.mxu3 %v606_v26  ;;  %v627_v0 = vld [vmem:[%s1555_s29 + $0x2f8] sm:$0xff] }
  0xff   : > { %890 = vmatpush.msra.mxu0 %v690_v23  ;;  %758 = vmatmul.f32.vlgmr.msra.gmra.mxu1 %v1674_v15  ;;  %v667_v1 = vld [vmem:[%s1555_s29 + $0x438] sm:$0xff] }
 0x100   : > { %855 = vmatpush.msrb.mxu1 %v542_v24  ;;  %1106 = vmatmul.msk.f32.vlgmr.msrb.gmra.mxu0 %vm706_vm1, %v1652_v61  ;;  %v547_v2 = vld [vmem:[%s1555_s29 + $0x78] sm:$0xff] }
 0x101   : > { %891 = vmatpush.msra.mxu0 %v686_v27  ;;  %876 = vmatpush.msrb.mxu3 %v602_v29  ;;  %v623_v3 = vld [vmem:[%s1555_s29 + $0x2d8] sm:$0xff] }
 0x102   : > { %856 = vmatpush.msrb.mxu1 %v538_v28  ;;  %904 = vmatpush.msra.mxu2 %v587_v31  ;;  %v663_v4 = vld [vmem:[%s1555_s29 + $0x418] sm:$0xff] }
 0x103   : > { %892 = vmatpush.msra.mxu0 %v682_v30  ;;  %877 = vmatpush.msrb.mxu3 %v598_v33  ;;  %v543_v5 = vld [vmem:[%s1555_s29 + $0x58] sm:$0xff] }
 0x104   : > { %857 = vmatpush.msrb.mxu1 %v534_v32  ;;  %878 = vmatmul.f32.vlgmr.msrb.gmra.mxu3 %v1674_v15  ;;  %v619_v6 = vld [vmem:[%s1555_s29 + $0x2b8] sm:$0xff] }
 0x105   : > { %893 = vmatpush.msra.mxu0 %v678_v34  ;;  %905 = vmatpush.msra.mxu2 %v583_v35  ;;  %v539_v7 = vld [vmem:[%s1555_s29 + $0x38] sm:$0xff] }
 0x106   : > { %922 = vmatpush.msra.mxu1 %v659_v36  ;;  %1109 = vmatpush.msk.msra.mxu3 %vm709_vm0, %v695_v38  ;;  %v615_v8 = vld [vmem:[%s1555_s29 + $0x298] sm:$0xff] }
 0x107   : > { %894 = vmatpush.msra.mxu0 %v674_v37  ;;  %906 = vmatpush.msra.mxu2 %v579_v39  ;;  %v535_v9 = vld [vmem:[%s1555_s29 + $0x18] sm:$0xff] }
 0x108   : > { %923 = vmatpush.msra.mxu1 %v655_v40  ;;  %950 = vmatpush.msra.mxu3 %v691_v42  ;;  %v611_v10 = vld [vmem:[%s1555_s29 + $0x278] sm:$0xff] }
 0x109   : > { %895 = vmatpush.msra.mxu0 %v670_v41  ;;  %907 = vmatpush.msra.mxu2 %v575_v43  ;;  %v607_v11 = vld [vmem:[%s1555_s29 + $0x258] sm:$0xff] }
 0x10a   : > { %924 = vmatpush.msra.mxu1 %v651_v44  ;;  %951 = vmatpush.msra.mxu3 %v687_v49  ;;  %v603_v12 = vld [vmem:[%s1555_s29 + $0x238] sm:$0xff] }
 0x10b   : > { %896 = vmatpush.msra.mxu0 %v666_v45  ;;  %858 = vmatmul.f32.vlgmr.msrb.gmra.mxu1 %v1672_v14  ;;  %v599_v13 = vld [vmem:[%s1555_s29 + $0x218] sm:$0xff] }
 0x10c   : > { %908 = vmatpush.msra.mxu2 %v571_v46  ;;  %925 = vmatpush.msra.mxu1 %v647_v47 }
 0x10d   : > { %897 = vmatpush.msra.mxu0 %v662_v48  ;;  %952 = vmatpush.msra.mxu3 %v683_v52 }
 0x10e   : > { %1108 = vmatmul.msk.f32.vlgmr.msra.gmra.mxu0 %vm706_vm1, %v1652_v61  ;;  %909 = vmatpush.msra.mxu2 %v567_v50 }
 0x10f   : > { %926 = vmatpush.msra.mxu1 %v643_v51  ;;  %953 = vmatpush.msra.mxu3 %v679_v55 }
 0x110   : > { %910 = vmatpush.msra.mxu2 %v563_v53 }
 0x111   : > { %927 = vmatpush.msra.mxu1 %v639_v54  ;;  %954 = vmatpush.msra.mxu3 %v675_v58 }
 0x112   : > { %911 = vmatpush.msra.mxu2 %v559_v56 }
 0x113   : > { %928 = vmatpush.msra.mxu1 %v635_v57  ;;  %955 = vmatpush.msra.mxu3 %v671_v62 }
 0x114   : > { %912 = vmatpush.msra.mxu2 %v555_v59 }
 0x115   : > { %929 = vmatpush.msra.mxu1 %v631_v60  ;;  %956 = vmatpush.msra.mxu3 %v667_v1 }
 0x116   : > { %913 = vmatpush.msra.mxu2 %v551_v63 }
 0x117   : > { %930 = vmatpush.msra.mxu1 %v627_v0  ;;  %957 = vmatpush.msra.mxu3 %v663_v4 }
 0x118   : > { %914 = vmatpush.msra.mxu2 %v547_v2  ;;  %1110 = vmatmul.msk.f32.vlgmr.msra.gmra.mxu3 %vm706_vm1, %v1652_v61 }
 0x119   : > { %931 = vmatpush.msra.mxu1 %v623_v3 }
 0x11a   : > { %915 = vmatpush.msra.mxu2 %v543_v5 }
 0x11b   : > { %932 = vmatpush.msra.mxu1 %v619_v6 }
 0x11c   : > { %916 = vmatpush.msra.mxu2 %v539_v7 }
 0x11d   : > { %933 = vmatpush.msra.mxu1 %v615_v8 }
 0x11e   : > { %917 = vmatpush.msra.mxu2 %v535_v9 }
 0x11f   : > { %934 = vmatpush.msra.mxu1 %v611_v10  ;;  %918 = vmatmul.f32.vlgmr.msra.gmra.mxu2 %v1672_v14 }
 0x121   : > { %935 = vmatpush.msra.mxu1 %v607_v11 }
 0x123   : > { %936 = vmatpush.msra.mxu1 %v603_v12 }
 0x125   : > { %937 = vmatpush.msra.mxu1 %v599_v13 }
 0x126   : > { %938 = vmatmul.f32.vlgmr.msra.gmra.mxu1 %v1674_v15 }
 0x168   : > { %v799_v17 = vpop.f32.mrf.mxu3 }
 0x174   : > { %v779_v16 = vpop.f32.mrf.mxu2  ;;  %v739_v61 = vpop.f32.mrf.mxu0 }
 0x17c   : > { %v759_v21 = vpop.f32.mrf.mxu1 }
 0x17d   : > { %v819_v18 = vpop.f32.mrf.mxu2  ;;  %v839_v20 = vpop.f32.mrf.mxu0  ;;  %v760_v14 = vadd.f32 %v759_v21, %v739_v61 }
 0x17e   : > { %v820_v19 = vadd.f32 %v819_v18, %v799_v17 }
 0x17f   : > { %v780_v24 = vadd.f32 %v779_v16, %v760_v14 }
 0x180   : > { %v840_v22 = vadd.f32 %v839_v20, %v820_v19 }
 0x181   : > { %v974_v31 = vsel %vm709_vm0, %v780_v24, 0.0  ;;  %v983_v38 = vmul.f32 %v780_v24, %v780_v24 }
 0x182   : > { %v966_v23 = vrot.slane %v840_v22, 4  ;;  %v975_v32 = vsel %vm709_vm0, %v840_v22, 0.0  ;;  %v984_v39 = vmul.f32 %v840_v22, %v840_v22 }
 0x183   : > { %v976_v37 = vadd.f32 %v975_v32, %v974_v31  ;;  %v987_v48 = vsel %vm709_vm0, %v983_v38, 0.0 }
 0x184   : > { %v968_v15 = vsel %vm709_vm0, %v780_v24, %v966_v23  ;;  %v988_v49 = vsel %vm709_vm0, %v984_v39, 0.0 }
 0x185   : > { %972 = vst [vmem:[%s524_s11] sm:$0xff] %v968_v15  ;;  %v989_v51 = vadd.f32 %v988_v49, %v987_v48 }
 0x187   : > { %v879_v26 = vpop.f32.mrf.mxu3 }
 0x188   : > { %v859_v25 = vpop.f32.mrf.mxu1 }
 0x189   : > { %v880_v27 = vadd.f32 %v879_v26, %v859_v25 }
 0x18b   : > { %v899_v28 = vpop.f32.mrf.mxu0 }
 0x18c   : > { %v900_v29 = vadd.f32 %v899_v28, %v880_v27 }
 0x18e   : > { %v977_v36 = vsel %vm709_vm0, %v900_v29, 0.0  ;;  %v985_v42 = vmul.f32 %v900_v29, %v900_v29 }
 0x18f   : > { %v978_v41 = vadd.f32 %v977_v36, %v976_v37 }
 0x190   : > { %v990_v50 = vsel %vm709_vm0, %v985_v42, 0.0 }
 0x191   : > { %v991_v53 = vadd.f32 %v990_v50, %v989_v51 }
 0x19b   : > { %v959_v34 = vpop.f32.mrf.mxu3 }
 0x1a2   : > { %v919_v30 = vpop.f32.mrf.mxu2 }
 0x1a3   : > { %v939_v33 = vpop.f32.mrf.mxu1 }
 0x1a4   : > { %v940_v35 = vadd.f32 %v939_v33, %v919_v30 }
 0x1a6   : > { %v960_v40 = vadd.f32 %v959_v34, %v940_v35 }
 0x1a8   : > { %v967_v43 = vrot.slane %v960_v40, 4  ;;  %v979_v44 = vsel %vm709_vm0, %v960_v40, 0.0  ;;  %v986_v47 = vmul.f32 %v960_v40, %v960_v40 }
 0x1a9   : > { %v980_v45 = vadd.f32 %v979_v44, %v978_v41 }
 0x1aa   : > { %v969_v46 = vsel %vm709_vm0, %v900_v29, %v967_v43  ;;  %v992_v52 = vsel %vm709_vm0, %v986_v47, 0.0 }
 0x1ab   : > { %973 = vst [vmem:[%s524_s11 + $0x8] sm:$0xff] %v969_v46  ;;  %981 = vadd.xlane.f32.xlu0 %v980_v45  ;;  %v993_v54 = vadd.f32 %v992_v52, %v991_v53 }
 0x1b3   : > { %994 = vadd.xlane.f32.xlu0 %v993_v54 }
 0x21e   : > { %v982_v55 = vpop.xlane.xlu0 %981 }
 0x226   : > { %v995_v56 = vpop.xlane.xlu0 %994 }
 0x227   : > { %v997_v57 = vsel %vm996_vm2, %v982_v55, %v995_v56 }
 0x228   : > { %999 = vst.msk [vmem:[%s529_s18] sm:$0xf] %vm998_vm3, %v997_v57 }
 0x229 PF: > { %p11_p10 = scmp.ge.s32.totalorder %s1203_s16, 4   ;;  %s1786_s12 = smov %s1158_s13 }
 0x22a   : > { %s1787_s13 = smov %s1212_s19  ;;  %s1788_s14 = smov %s1203_s16 }
 0x22b   :  { %13 = sbr.rel (!%p11_p10) target bundleno = 2 (0x2), region = 99 }

// kernel: dilated_conv_forward.7
= control target key start
LH: loop header
LB: loop body
LE: loop exit
PB: predicated region body
PF: predicated region fallthrough
CT: control target
= control target key end

     0   :  { %s312_s12 = smov 0   ;;  %s335_s0 = inlined_call_operand.vmem [shape: f32[4,1024], index: 0, kind: input, shape index: {}]   ;;  %s336_s1 = inlined_call_operand.vmem [shape: f32[4,1], index: 1, kind: input, shape index: {}]   ;;  %s337_s2 = inlined_call_operand.vmem [shape: f32[4,1], index: 2, kind: input, shape index: {}]   ;;  %s338_s3 = inlined_call_operand.vmem [shape: f32[4,1024], index: 3, kind: output, shape index: {}]  }
   0x1 LB: > { %s260_s13 = sadd.s32 4294967295, %s288_s12   ;;  %p264_p0 = scmp.ge.s32.totalorder %s288_s12, 1  ;;  %s288_s12 = sphi %s312_s12, %s13_s12  }
   0x2   : > { %p138_p1 = scmp.lt.s32.totalorder %s288_s12, 3 }
   0x4   : > { %p139_p2 = pnand %p264_p0, %p138_p1 }
   0x5   : > { %s265_s18 = sshll.u32 (!%p139_p2), %s260_s13, 2 }
   0x6   : > { %142 = sbr.rel (%p139_p2) target bundleno = 144 (0x90), region = 32  ;;  %p163_p3 = scmp.lt.s32.totalorder (!%p139_p2), %s265_s18, 7 }
   0xb   : > { %v176_v0 = vld [vmem:[%s336_s1] sm:$0xf]  ;;  %v290_v1 = vmov 0   ;;  %s340_s18 = smov (!%p163_p3, %s265_s18), 7  ;;  %v291_v3 = vmov 839922192  }
   0xc   : > { %281 = vset.pattern.permute.xlu0 %v290_v1  ;;  %v188_v2 = vld [vmem:[%s337_s2] sm:$0xf]  ;;  %v182_v4 = vunpack.c.l.s4 %v291_v3  ;;  %s266_s19 = sshll.u32 %s340_s18, 2 }
   0xd   : > { %179 = vperm.xlu0 %281, %v176_v0   ;;  %s166_s22 = scalar_lea.vmem %s335_s0, %s266_s19  ;;  %s172_s25 = scalar_lea.vmem %s338_s3, %s266_s19 }
   0xe   : > { %v183_v6 = vunpack.c.0.s8 %v182_v4  ;;  %v174_v8 = vld [vmem:[%s166_s22] sm:$0xff]  ;;  %v175_v9 = vld [vmem:[%s166_s22 + $0x8] sm:$0xff] }
  0x15   : > { %191 = vperm.xlu0 %281, %v188_v2  }
  0x7f   : > { %v180_v5 = vpop.permute.xlu0 %179 }
  0x80   : > { %v184_v7 = vperm.slane %v180_v5, %v183_v6 }
  0x82   : > { %v186_v11 = vmul.f32 %v184_v7, %v174_v8  ;;  %v187_v12 = vmul.f32 %v184_v7, %v175_v9 }
  0x87   : > { %v192_v10 = vpop.permute.xlu0 %191 }
  0x88   : > { %v196_v13 = vperm.slane %v192_v10, %v183_v6 }
  0x8a   : > { %v198_v14 = vadd.f32 %v196_v13, %v186_v11  ;;  %v199_v15 = vadd.f32 %v196_v13, %v187_v12 }
  0x8c   : > { %v200_v16 = vmax.f32 %v198_v14, 0.0  ;;  %v201_v17 = vmax.f32 %v199_v15, 0.0 }
  0x8e   : > { %202 = vst [vmem:[%s172_s25] sm:$0xff] %v200_v16 }
  0x8f   : > { %203 = vst [vmem:[%s172_s25 + $0x8] sm:$0xff] %v201_v17 }
  0x90 PF: > { %s13_s12 = sadd.s32 1, %s288_s12  }
  0x91   : > { %p10_p4 = scmp.ge.s32.totalorder %s13_s12, 4  }
  0x93   :  { %12 = sbr.rel (!%p10_p4) target bundleno = 1 (0x1), region = 62 }

</bundles_post_ra>
